<compile_context>
chip_gen: v7x
topology: tpu7x:2x2x1
jax: 0.10.0
libtpu: 0.0.40
codegen_flags: <defaults>
</compile_context>

<pallas_src>
import jax
import jax.numpy as jnp
from jax.experimental import pallas as pl
from jax.experimental.pallas import tpu as pltpu


# ----------------------------------------------------------------------------
# small static helpers (all trace-time Python)
# ----------------------------------------------------------------------------

def _divisors(n: int):
    ds = set()
    d = 1
    while d * d <= n:
        if n % d == 0:
            ds.add(d)
            ds.add(n // d)
        d += 1
    return sorted(ds)


def _pick_fold(h: int, w: int, sh: int, sw: int, max_r: int = 16) -> int:
    """Smallest r | h such that the folded output row r*sh*sw*w is a multiple
    of 128 lanes (-> unmasked, lane-dense stores).  Falls back to r=1."""
    line = sh * sw * w
    if line % 128 == 0:
        return 1
    for r in range(2, min(h, max_r) + 1):
        if h % r == 0 and (r * line) % 128 == 0 and (sh == 1 or r * sh <= 64):
            return r
    return 1  # still correct, just lane-sparse (no small exact fold exists)


def _device_kind() -> str:
    try:
        return jax.devices()[0].device_kind.lower()
    except Exception:
        return ""


def _num_tensorcores() -> int:
    kind = _device_kind()
    # v7x has 2 TensorCores per chip; v5e / v6e have 1.
    return 2 if ("v7" in kind or "7x" in kind) else 1


def _vmem_limit_bytes() -> int:
    try:
        cap = int(pltpu.get_tpu_info().vmem_capacity_bytes)
        return max(16 * 1024 * 1024, min(64 * 1024 * 1024, (cap * 3) // 4))
    except Exception:
        pass
    kind = _device_kind()
    if "v7" in kind or "7x" in kind:
        return 48 * 1024 * 1024       # 64 MiB physical on v7x -> leave headroom
    if "v2" in kind or "v3" in kind:
        return 16 * 1024 * 1024
    return 64 * 1024 * 1024           # v4/v5e/v5p/v6e: 128 MiB physical VMEM


def _plan_tiles(b, hr, line_in, line_out, itemsize, vmem_limit, min_steps):
    """Pick (tb, th): planes and folded-row-groups per grid step.

    Blocks are sized against the padded (sublane/lane) input+output windows,
    double-buffered, within ~half of the scoped-VMEM limit.  `th` is either a
    multiple of 8 or the full extent (keeps BlockSpec layout-legal & dense)."""
    budget = max(int(0.5 * vmem_limit), 1)
    divs_b = _divisors(b)
    valid_th = sorted({hr} | {d for d in _divisors(hr) if d % 8 == 0})

    def bytes_for(tb, th):
        th_p = ((th + 7) // 8) * 8
        li_p = ((line_in + 127) // 128) * 128
        lo_p = ((line_out + 127) // 128) * 128
        # double-buffered input and output windows
        return tb * th_p * (2 * li_p + 2 * lo_p) * itemsize

    best_tb, best_th, best_units = 1, min(valid_th), 0
    for th in valid_th:
        for tb in divs_b:
            if bytes_for(tb, th) > budget:
                continue
            units = tb * th
            if units > best_units or (units == best_units and th > best_th):
                best_tb, best_th, best_units = tb, th, units
    tb, th = best_tb, best_th

    # keep enough grid steps for multi-TensorCore chips / pipeline overlap
    def steps(tb_, th_):
        return (b // tb_) * (hr // th_)

    while steps(tb, th) < min_steps:
        smaller_tb = [d for d in divs_b if d < tb]
        smaller_th = [t for t in valid_th if t < th]
        if smaller_tb:
            tb = max(smaller_tb)
        elif smaller_th:
            th = max(smaller_th)
        else:
            break
    return tb, th


# ----------------------------------------------------------------------------
# kernel
# ----------------------------------------------------------------------------

_CHUNK_IN_ELEMS = 8192   # per inner-iteration input elements (bounds relayout temps)


def _make_nearest_kernel(sh: int, sw: int, r: int, w: int):
    """Kernel for one block: x (tb, th, r*w) -> o (tb, th, r*sh*sw*w)."""
    seg = w * sw                      # one W-replicated source row

    def _replicate(x):
        cb, cs, li = x.shape
        # --- W replication: each element expands into sw adjacent lanes -----
        if sw > 1:
            xw = jnp.broadcast_to(x[..., None], (cb, cs, li, sw))
            xw = xw.reshape(cb, cs, li * sw)
        else:
            xw = x
        # --- H replication: each source row spawns sh consecutive output rows
        if sh > 1:
            if r == 1:
                y = jnp.concatenate([xw] * sh, axis=-1)
            else:
                parts = []
                for k in range(r):
                    blk = xw[:, :, k * seg:(k + 1) * seg]
                    parts.extend([blk] * sh)
                y = jnp.concatenate(parts, axis=-1)
        else:
            y = xw
        return y

    def kernel(x_ref, o_ref):
        tb, th, line_in = x_ref.shape

        # Chunk the replication compute so that the lane-interleave temporaries
        # stay small in VMEM/vregs regardless of Mosaic's relayout strategy.
        # TODO(synk): audit the W-interleave lowering on v7x (strided stores /
        #             bf16 bit-pack alternatives) once bundle dumps are available.
        if sw == 1:                    # intermediates are lane-dense: no chunking
            ctb, sub = tb, th
        else:
            sub_cands = [d for d in _divisors(th)
                         if d <= 8 and d * line_in <= _CHUNK_IN_ELEMS]
            sub = max(sub_cands) if sub_cands else 1
            ctb_cands = [d for d in _divisors(tb)
                         if d * sub * line_in <= _CHUNK_IN_ELEMS]
            ctb = max(ctb_cands) if ctb_cands else 1
        n_tb, n_th = tb // ctb, th // sub
        n_iter = n_tb * n_th

        if n_iter <= 8:                # fully unrolled, static offsets
            for it in range(n_tb):
                for ih in range(n_th):
                    b0, r0 = it * ctb, ih * sub
                    o_ref[pl.ds(b0, ctb), pl.ds(r0, sub), :] = _replicate(
                        x_ref[pl.ds(b0, ctb), pl.ds(r0, sub), :])
        else:
            def body(i, carry):
                b0 = pl.multiple_of((i // n_th) * ctb, ctb)
                r0 = pl.multiple_of((i % n_th) * sub, sub)
                o_ref[pl.ds(b0, ctb), pl.ds(r0, sub), :] = _replicate(
                    x_ref[pl.ds(b0, ctb), pl.ds(r0, sub), :])
                return carry
            jax.lax.fori_loop(0, n_iter, body, 0)

    return kernel


# ----------------------------------------------------------------------------
# wrapper
# ----------------------------------------------------------------------------

def _resolve_factors(shape, scale_factor, size):
    _, _, h, w = shape
    if size is not None:
        oh, ow = (size, size) if isinstance(size, int) else tuple(size)
        if oh % h != 0 or ow % w != 0:
            # TODO(synk): fractional nearest indexing (floor(dst*in/out)) not implemented.
            raise NotImplementedError("only integer upsampling ratios supported")
        return oh // h, ow // w
    if isinstance(scale_factor, (tuple, list)):
        sfh, sfw = scale_factor
    else:
        sfh = sfw = scale_factor
    sh, sw = int(sfh), int(sfw)
    if sh != sfh or sw != sfw or sh < 1 or sw < 1:
        # TODO(synk): fractional scale factors are not implemented.
        raise NotImplementedError("only integer scale factors supported")
    return sh, sw


def upsample_nearest(x, scale_factor=None, size=None):
    """Equivalent of F.interpolate(x, size/scale_factor, mode='nearest') for NCHW x."""
    n, c, h, w = x.shape
    sh, sw = _resolve_factors((n, c, h, w), scale_factor, size)
    if sh == 1 and sw == 1:
        return x

    h_out, w_out = h * sh, w * sw
    b = n * c
    itemsize = jnp.dtype(x.dtype).itemsize

    # lane-dense fold: r | h source rows share one flattened output "super row"
    r = _pick_fold(h, w, sh, sw)
    hr = h // r
    line_in = r * w
    line_out = r * sh * sw * w

    vmem_limit = _vmem_limit_bytes()
    total_out_bytes = b * h_out * w_out * itemsize
    if _num_tensorcores() >= 2:            # v7x: keep both cores fed + pipelined
        min_steps = 8 if total_out_bytes > (8 << 20) else 4
    else:                                  # v5e/v6e: 1 step is fine for small maps
        min_steps = 4 if total_out_bytes > (8 << 20) else 1
    tb, th = _plan_tiles(b, hr, line_in, line_out, itemsize, vmem_limit, min_steps)

    xb = x.reshape(b, hr, line_in)         # free row-major view of (N,C,H,W)
    grid = (b // tb, hr // th)

    cost = pl.CostEstimate(                # pure data movement: 0 flops
        flops=0, transcendentals=0,
        bytes_accessed=(b * h * w + b * h_out * w_out) * itemsize)

    out = pl.pallas_call(
        _make_nearest_kernel(sh, sw, r, w),
        out_shape=jax.ShapeDtypeStruct((b, hr, line_out), x.dtype),
        grid_spec=pltpu.PrefetchScalarGridSpec(
            num_scalar_prefetch=0,
            grid=grid,
            in_specs=[pl.BlockSpec((tb, th, line_in), lambda i, j: (i, j, 0))],
            out_specs=pl.BlockSpec((tb, th, line_out), lambda i, j: (i, j, 0)),
        ),
        compiler_params=pltpu.CompilerParams(
            dimension_semantics=("parallel", "parallel"),
            vmem_limit_bytes=vmem_limit),
        cost_estimate=cost,
    )(xb)

    # (B, H/r, r*sh*sw*W) is a row-major view of (N, C, H_out, W_out): free reshape.
    return out.reshape(n, c, h_out, w_out)


class Upsample:
    """Pallas equivalent of nnUNet's Upsample module (forward only)."""

    def __init__(self, size=None, scale_factor=None, mode='nearest', align_corners=False):
        if mode != 'nearest':
            # TODO(synk): bilinear / trilinear / bicubic modes are not implemented.
            raise NotImplementedError("only mode='nearest' is implemented")
        self.size = size
        self.scale_factor = scale_factor
        self.align_corners = align_corners  # ignored for nearest (matches PyTorch)

    def __call__(self, x):
        return upsample_nearest(x, scale_factor=self.scale_factor, size=self.size)


# ----------------------------------------------------------------------------
# self-test
# ----------------------------------------------------------------------------

if __name__ == "__main__":
    key = jax.random.PRNGKey(0)
    k0, k1 = jax.random.split(key)

    def ref_up(a, sh, sw):
        return jnp.repeat(jnp.repeat(a, sh, axis=2), sw, axis=3)

    # 1) primary nnUNet-style case: f32, scale_factor=2 (sh=sw=2)
    x = jax.random.normal(k0, (2, 4, 16, 16), dtype=jnp.float32)
    y = jax.block_until_ready(Upsample(scale_factor=2)(x))
    assert y.shape == (2, 4, 32, 32), y.shape
    assert y.dtype == x.dtype, y.dtype
    assert bool(jnp.all(y == ref_up(x, 2, 2))), "f32 2x2 mismatch vs reference"

    # 2) bf16, scale_factor=2 (exercises 16-bit sublane packing)
    xb16 = x.astype(jnp.bfloat16)
    yb16 = jax.block_until_ready(upsample_nearest(xb16, scale_factor=2))
    assert yb16.dtype == jnp.bfloat16
    assert bool(jnp.all(yb16 == ref_up(xb16, 2, 2))), "bf16 2x2 mismatch"

    # 3) asymmetric factors: sh=2, sw=1
    x2 = jax.random.normal(k1, (1, 3, 8, 32), dtype=jnp.float32)
    y2 = jax.block_until_ready(upsample_nearest(x2, scale_factor=(2, 1)))
    assert y2.shape == (1, 3, 16, 32), y2.shape
    assert bool(jnp.all(y2 == ref_up(x2, 2, 1))), "(2,1) mismatch"

    # 4) asymmetric via size=: sh=1, sw=2
    y3 = jax.block_until_ready(upsample_nearest(x2, size=(8, 64)))
    assert y3.shape == (1, 3, 8, 64), y3.shape
    assert bool(jnp.all(y3 == ref_up(x2, 1, 2))), "(1,2) mismatch"

    print("KERNEL_OK")
</pallas_src>

<mosaic_0001>
module attributes {stable_mosaic.version = 11 : i64} {
  func.func @kernel(%arg0: i32, %arg1: i32, %arg2: memref<8x8x32xf32, #tpu.memory_space<vmem>>, %arg3: memref<8x8x128xf32, #tpu.memory_space<vmem>>) attributes {dimension_semantics = [#tpu.dimension_semantics<parallel>, #tpu.dimension_semantics<parallel>], iteration_bounds = array<i64: 1, 1>, scalar_prefetch = 0 : i64, scratch_operands = 0 : i64, tpu.core_type = #tpu.core_type<tc>, window_params = [{transform_indices = @transform_0, window_bounds = array<i64: 8, 8, 32>}, {transform_indices = @transform_1, window_bounds = array<i64: 8, 8, 128>}]} {
    %c0 = arith.constant 0 : index
    %c0_0 = arith.constant 0 : index
    %c0_1 = arith.constant 0 : index
    %0 = vector.load %arg2[%c0, %c0_0, %c0_1] : memref<8x8x32xf32, #tpu.memory_space<vmem>>, vector<8x8x32xf32>
    %1 = vector.shape_cast %0 : vector<8x8x32xf32> to vector<8x8x32x1xf32>
    %2 = vector.shape_cast %1 : vector<8x8x32x1xf32> to vector<8x8x32x1xf32>
    %3 = vector.broadcast %2 : vector<8x8x32x1xf32> to vector<8x8x32x2xf32>
    %4 = vector.shape_cast %3 : vector<8x8x32x2xf32> to vector<8x8x64xf32>
    %5 = vector.extract_strided_slice %4 {offsets = [0, 0, 0], sizes = [8, 8, 32], strides = [1, 1, 1]} : vector<8x8x64xf32> to vector<8x8x32xf32>
    %6 = vector.extract_strided_slice %4 {offsets = [0, 0, 32], sizes = [8, 8, 32], strides = [1, 1, 1]} : vector<8x8x64xf32> to vector<8x8x32xf32>
    %7 = tpu.concatenate %5, %5, %6, %6 in 2 : vector<8x8x32xf32>, vector<8x8x32xf32>, vector<8x8x32xf32>, vector<8x8x32xf32> -> vector<8x8x128xf32>
    %c0_2 = arith.constant 0 : index
    %c0_3 = arith.constant 0 : index
    %c0_4 = arith.constant 0 : index
    %8 = vector.load %arg3[%c0_2, %c0_3, %c0_4] : memref<8x8x128xf32, #tpu.memory_space<vmem>>, vector<8x8x128xf32>
    tpu.vector_store %arg3[%c0_2, %c0_3, %c0_4], %7 {strides = array<i32>} : memref<8x8x128xf32, #tpu.memory_space<vmem>>, vector<8x8x128xf32>,
    return
  }
  func.func @transform_0(%arg0: i32, %arg1: i32) -> (i32, i32, i32) {
    %c0_i32 = arith.constant 0 : i32
    %c0_i32_0 = arith.constant 0 : i32
    return %arg0, %arg1, %c0_i32 : i32, i32, i32
  }
  func.func @transform_1(%arg0: i32, %arg1: i32) -> (i32, i32, i32) {
    %c0_i32 = arith.constant 0 : i32
    %c0_i32_0 = arith.constant 0 : i32
    return %arg0, %arg1, %c0_i32 : i32, i32, i32
  }
}

</mosaic_0001>

<bundles_post_ra>
// kernel: tpu_custom_call.1
= control target key start
LH: loop header
LB: loop body
LE: loop exit
PB: predicated region body
PF: predicated region fallthrough
CT: control target
= control target key end

     0   :  { %6 = vsyncpa [#allocation3], 0  ;;  %s11742_s0 = inlined_call_operand.hbm [shape: f32[8,8,32], index: 0, kind: input, shape index: {}]   ;;  %s11743_s1 = inlined_call_operand.hbm [shape: f32[8,8,128], index: 1, kind: output, shape index: {}]  }
   0x1   :  { %7 = vsyncpa [#allocation4], 0  ;;  %s7062_s6 = smov [#allocation2]   ;;  %s7014_s10 = scalar_lea.hbm %s11742_s0, 1024 }
   0x2   :  { %s13_s7 = sshll.u32 %s7062_s6, 4  ;;  %p7015_p0 = scmp.ne.s32.totalorder %s11742_s0, %s7014_s10  ;;  %s14_s7 = int_to_ptr.vmem [resolvable:$true] %s13_s7 }
   0x3   :  { %p7018_p1 = scmp.lt.u32.totalorder %s7014_s10, %s11742_s0 }
   0x5   :  { %p7020_p2 = pnand %p7018_p1, %p7015_p0 }
   0x7   :  { %7023 = shalt.err (!%p7020_p2)
}
   0x8   :  { %s7024_s15 = scalar_lea.vmem %s14_s7, 1024  ;;  %p7029_p4 = scmp.lt.s32.totalorder %s14_s7, %s14_s7 }
   0x9   :  { %p7025_p3 = scmp.ne.s32.totalorder %s14_s7, %s7024_s15  ;;  %p7030_p5 = scmp.lt.s32.totalorder %s7024_s15, %s7024_s15 }
   0xb   :  { %p7031_p6 = por %p7030_p5, %p7029_p4 }
   0xd   :  { %p7032_p7 = pnand %p7031_p6, %p7025_p3 }
   0xf   :  { %7035 = shalt.err (!%p7032_p7)
}
  0x10   :  { %s7063_s16 = smov 128   ;;  %s7064_s17 = smov 8  }
  0x11   :  { %19 = dma.hbm_to_vmem [thread:$0]  %s11742_s0, 1024, %s14_s7, [#allocation3], %s7063_s16, %s7063_s16, %s7064_s17  }
  0x12   :  { %7058 = dma.done.wait [#allocation3], 1024  }
  0x13   :  { %7059 = vsyncadd [#allocation3], 4294966272  ;;  %v31_v0 = vlaneseq  ;;  %v23_v3 = vld [vmem:[#allocation2] sm:$0xff]  ;;  %v24_v19 = vld [vmem:[#allocation2 + $0x8] sm:$0xff]  ;;  %v7065_v60 = vmov 1983009808  }
  0x14   :  { %v7174_v32 = vld [vmem:[#allocation2 + $0x10] sm:$0xff]  ;;  %v1250_v61 = vunpack.c.l.s4 %v7065_v60  ;;  %s7067_s0 = smov 2   ;;  %s7068_s20 = smov 4   ;;  %vm6591_vm0 = vcmask 15360   ;;  %vm6600_vm1 = vcmask 31744   ;;  %vm6609_vm2 = vcmask 48128  }
  0x15   :  { %v7124_v1 = vshrl.u32 %v31_v0, 7  ;;  %s7069_s21 = smov 6   ;;  %s7070_s22 = smov 10   ;;  %vm6618_vm3 = vcmask 64512   ;;  %vm12010_vm4 = vcmask 80896   ;;  %vm12009_vm5 = vcmask 97280  }
  0x16   :  { %s7071_s23 = smov 12   ;;  %s7072_s24 = smov 14   ;;  %vm12006_vm6 = vcmask 113664   ;;  %vm12007_vm7 = vcmask 130048   ;;  %vm12008_vm8 = vcmask 146432   ;;  %vm12011_vm9 = vcmask 162816  }
  0x17   :  { %v7127_v2 = vsub.s32 0, %v7124_v1  ;;  %v7131_v5 = vsub.s32 1, %v7124_v1  ;;  %v7135_v7 = vsub.s32 2, %v7124_v1  ;;  %v7139_v9 = vsub.s32 3, %v7124_v1  ;;  %s7073_s25 = smov 16   ;;  %s7074_s26 = smov 18  }
  0x18   :  { %v7143_v11 = vsub.s32 4, %v7124_v1  ;;  %v7147_v13 = vsub.s32 5, %v7124_v1  ;;  %v7151_v15 = vsub.s32 6, %v7124_v1  ;;  %v7155_v17 = vsub.s32 7, %v7124_v1  ;;  %s7075_s27 = smov 20   ;;  %s7076_s28 = smov 22  }
  0x19   :  { %v34_v4 = vrot.slane %v23_v3, %v7127_v2  ;;  %v53_v6 = vrot.slane %v23_v3, %v7131_v5  ;;  %v72_v8 = vrot.slane %v23_v3, %v7135_v7  ;;  %v91_v10 = vrot.slane %v23_v3, %v7139_v9  ;;  %s7077_s29 = smov 24   ;;  %s7078_s30 = smov 26  }
  0x1a   :  { %v110_v12 = vrot.slane %v23_v3, %v7143_v11  ;;  %v129_v14 = vrot.slane %v23_v3, %v7147_v13  ;;  %v148_v16 = vrot.slane %v23_v3, %v7151_v15  ;;  %v167_v18 = vrot.slane %v23_v3, %v7155_v17  ;;  %s7079_s2 = smov 28   ;;  %s7080_s3 = smov 30  }
  0x1b   :  { %44 = vbcast.lane.b32.xlu1 %v34_v4, 272  ;;  %36 = vbcast.lane.b32.xlu0 %v34_v4, 256  ;;  %v186_v20 = vrot.slane %v24_v19, %v7127_v2  ;;  %v205_v21 = vrot.slane %v24_v19, %v7131_v5  ;;  %v224_v22 = vrot.slane %v24_v19, %v7135_v7  ;;  %v1251_v3 = vunpack.c.0.s8 %v1250_v61  ;;  %s7081_s4 = smov 32   ;;  %s7082_s5 = smov 34  }
  0x1c   :  { %v243_v23 = vrot.slane %v24_v19, %v7139_v9  ;;  %v262_v24 = vrot.slane %v24_v19, %v7143_v11  ;;  %v281_v25 = vrot.slane %v24_v19, %v7147_v13  ;;  %v300_v26 = vrot.slane %v24_v19, %v7151_v15  ;;  %s7083_s6 = smov 36   ;;  %s7084_s7 = smov 38  }
  0x1d   :  { %v319_v29 = vrot.slane %v24_v19, %v7155_v17  ;;  %v338_v35 = vrot.slane %v7174_v32, %v7127_v2  ;;  %v357_v40 = vrot.slane %v7174_v32, %v7131_v5  ;;  %v376_v45 = vrot.slane %v7174_v32, %v7135_v7  ;;  %s7085_s8 = smov 40   ;;  %s7086_s9 = smov 42  }
  0x1e   :  { %v395_v50 = vrot.slane %v7174_v32, %v7139_v9  ;;  %v414_v55 = vrot.slane %v7174_v32, %v7143_v11  ;;  %v433_v62 = vrot.slane %v7174_v32, %v7147_v13  ;;  %v471_v61 = vrot.slane %v7174_v32, %v7155_v17  ;;  %s7087_s10 = smov 44   ;;  %s7088_s11 = smov 46  }
  0x1f   :  { %48 = vbcast.lane.b32.xlu1 %v34_v4, 280  ;;  %40 = vbcast.lane.b32.xlu0 %v34_v4, 264  ;;  %v7066_v4 = vmov 1934713408   ;;  %s7089_s12 = smov 48   ;;  %s7090_s13 = smov 50  }
  0x20   :  { %s7091_s14 = smov 52   ;;  %s7092_s15 = smov 54   ;;  %vm6681_vm10 = vcmask 179200   ;;  %vm6690_vm11 = vcmask 195584   ;;  %vm6699_vm12 = vcmask 211968   ;;  %vm6708_vm13 = vcmask 228352  }
  0x21   :  { %s7093_s18 = smov 56   ;;  %vm6717_vm14 = vcmask 244736   ;;  %vm6726_vm15 = vcmask 261120   ;;  %s7094_s19 = smov 58  }
  0x23   :  { %59 = vbcast.lane.b32.xlu1 %v53_v6, 264  ;;  %55 = vbcast.lane.b32.xlu0 %v53_v6, 256 }
  0x27   :  { %67 = vbcast.lane.b32.xlu1 %v53_v6, 280  ;;  %63 = vbcast.lane.b32.xlu0 %v53_v6, 272  ;;  %v1314_v6 = vunpack.c.l.s4 %v7066_v4 }
  0x2b   :  { %78 = vbcast.lane.b32.xlu1 %v72_v8, 264  ;;  %74 = vbcast.lane.b32.xlu0 %v72_v8, 256 }
  0x2f   :  { %86 = vbcast.lane.b32.xlu1 %v72_v8, 280  ;;  %82 = vbcast.lane.b32.xlu0 %v72_v8, 272 }
  0x33   :  { %97 = vbcast.lane.b32.xlu1 %v91_v10, 264  ;;  %93 = vbcast.lane.b32.xlu0 %v91_v10, 256 }
  0x37   :  { %105 = vbcast.lane.b32.xlu1 %v91_v10, 280  ;;  %101 = vbcast.lane.b32.xlu0 %v91_v10, 272 }
  0x3b   :  { %116 = vbcast.lane.b32.xlu1 %v110_v12, 264  ;;  %112 = vbcast.lane.b32.xlu0 %v110_v12, 256 }
  0x3f   :  { %124 = vbcast.lane.b32.xlu1 %v110_v12, 280  ;;  %120 = vbcast.lane.b32.xlu0 %v110_v12, 272 }
  0x43   :  { %135 = vbcast.lane.b32.xlu1 %v129_v14, 264  ;;  %131 = vbcast.lane.b32.xlu0 %v129_v14, 256 }
  0x47   :  { %143 = vbcast.lane.b32.xlu1 %v129_v14, 280  ;;  %139 = vbcast.lane.b32.xlu0 %v129_v14, 272 }
  0x4b   :  { %154 = vbcast.lane.b32.xlu1 %v148_v16, 264  ;;  %150 = vbcast.lane.b32.xlu0 %v148_v16, 256 }
  0x4f   :  { %162 = vbcast.lane.b32.xlu1 %v148_v16, 280  ;;  %158 = vbcast.lane.b32.xlu0 %v148_v16, 272  ;;  %v7245_v16 = vsub.s32 %v1251_v3, %v7124_v1 }
  0x51   :  { %12043 = vst [vmem:[#allocation30_spill] sm:$0xff] %v7245_v16 }
  0x53   :  { %173 = vbcast.lane.b32.xlu1 %v167_v18, 264  ;;  %169 = vbcast.lane.b32.xlu0 %v167_v18, 256 }
  0x57   :  { %181 = vbcast.lane.b32.xlu1 %v167_v18, 280  ;;  %177 = vbcast.lane.b32.xlu0 %v167_v18, 272 }
  0x5b   :  { %192 = vbcast.lane.b32.xlu1 %v186_v20, 264  ;;  %188 = vbcast.lane.b32.xlu0 %v186_v20, 256 }
  0x5f   :  { %200 = vbcast.lane.b32.xlu1 %v186_v20, 280  ;;  %196 = vbcast.lane.b32.xlu0 %v186_v20, 272  ;;  %v452_v20 = vrot.slane %v7174_v32, %v7151_v15 }
  0x63   :  { %211 = vbcast.lane.b32.xlu1 %v205_v21, 264  ;;  %207 = vbcast.lane.b32.xlu0 %v205_v21, 256 }
  0x67   :  { %219 = vbcast.lane.b32.xlu1 %v205_v21, 280  ;;  %215 = vbcast.lane.b32.xlu0 %v205_v21, 272  ;;  %v1315_v21 = vunpack.c.0.s8 %v1314_v6  ;;  %v7294_v6 = vld [vmem:[#allocation2 + $0x18] sm:$0xff] }
  0x68   :  { %v490_v32 = vrot.slane %v7294_v6, %v7127_v2 }
  0x6b   :  { %230 = vbcast.lane.b32.xlu1 %v224_v22, 264  ;;  %226 = vbcast.lane.b32.xlu0 %v224_v22, 256 }
  0x6f   :  { %238 = vbcast.lane.b32.xlu1 %v224_v22, 280  ;;  %234 = vbcast.lane.b32.xlu0 %v224_v22, 272 }
  0x73   :  { %249 = vbcast.lane.b32.xlu1 %v243_v23, 264  ;;  %245 = vbcast.lane.b32.xlu0 %v243_v23, 256 }
  0x77   :  { %257 = vbcast.lane.b32.xlu1 %v243_v23, 280  ;;  %253 = vbcast.lane.b32.xlu0 %v243_v23, 272 }
  0x7b   :  { %268 = vbcast.lane.b32.xlu1 %v262_v24, 264  ;;  %264 = vbcast.lane.b32.xlu0 %v262_v24, 256 }
  0x7f   :  { %276 = vbcast.lane.b32.xlu1 %v262_v24, 280  ;;  %272 = vbcast.lane.b32.xlu0 %v262_v24, 272 }
  0x83   :  { %287 = vbcast.lane.b32.xlu1 %v281_v25, 264  ;;  %283 = vbcast.lane.b32.xlu0 %v281_v25, 256 }
  0x87   :  { %295 = vbcast.lane.b32.xlu1 %v281_v25, 280  ;;  %291 = vbcast.lane.b32.xlu0 %v281_v25, 272 }
  0x8b   :  { %306 = vbcast.lane.b32.xlu1 %v300_v26, 264  ;;  %302 = vbcast.lane.b32.xlu0 %v300_v26, 256 }
  0x8d   :  { %v7165_v27 = vpop.permute.xlu1 %44  ;;  %v7167_v28 = vpop.permute.xlu0 %36 }
  0x8e   :  { %12021 = vst [vmem:[#allocation8_spill] sm:$0xff] %v7165_v27 }
  0x8f   :  { %314 = vbcast.lane.b32.xlu1 %v300_v26, 280  ;;  %310 = vbcast.lane.b32.xlu0 %v300_v26, 272 }
  0x91   :  { %v7170_v30 = vpop.permute.xlu1 %48  ;;  %v7172_v31 = vpop.permute.xlu0 %40 }
  0x92   :  { %12022 = vst [vmem:[#allocation9_spill] sm:$0xff] %v7170_v30  ;;  %12023 = vst [vmem:[#allocation10_spill] sm:$0xff] %v7172_v31 }
  0x93   :  { %325 = vbcast.lane.b32.xlu1 %v319_v29, 264  ;;  %321 = vbcast.lane.b32.xlu0 %v319_v29, 256 }
  0x95   :  { %v7176_v33 = vpop.permute.xlu1 %59  ;;  %v7178_v34 = vpop.permute.xlu0 %55 }
  0x96   :  { %12024 = vst [vmem:[#allocation11_spill] sm:$0xff] %v7176_v33 }
  0x97   :  { %333 = vbcast.lane.b32.xlu1 %v319_v29, 280  ;;  %329 = vbcast.lane.b32.xlu0 %v319_v29, 272 }
  0x99   :  { %v7182_v36 = vpop.permute.xlu1 %67  ;;  %v7184_v37 = vpop.permute.xlu0 %63 }
  0x9a   :  { %12025 = vst [vmem:[#allocation12_spill] sm:$0xff] %v7182_v36  ;;  %12026 = vst [vmem:[#allocation13_spill] sm:$0xff] %v7184_v37 }
  0x9b   :  { %344 = vbcast.lane.b32.xlu1 %v338_v35, 264  ;;  %340 = vbcast.lane.b32.xlu0 %v338_v35, 256 }
  0x9d   :  { %v7186_v38 = vpop.permute.xlu1 %78  ;;  %v7188_v39 = vpop.permute.xlu0 %74 }
  0x9e   :  { %12027 = vst [vmem:[#allocation14_spill] sm:$0xff] %v7186_v38  ;;  %v1247_v18 = vcombine.low %v7167_v28, %v7188_v39 }
  0x9f   :  { %352 = vbcast.lane.b32.xlu1 %v338_v35, 280  ;;  %348 = vbcast.lane.b32.xlu0 %v338_v35, 272 }
  0xa0   :  { %v7267_v29 = vrot.slane %v1247_v18, %v7245_v16 }
  0xa1   :  { %v7192_v41 = vpop.permute.xlu1 %86  ;;  %v7194_v42 = vpop.permute.xlu0 %82 }
  0xa2   :  { %12028 = vst [vmem:[#allocation15_spill] sm:$0xff] %v7192_v41  ;;  %12029 = vst [vmem:[#allocation16_spill] sm:$0xff] %v7194_v42  ;;  %v547_v41 = vrot.slane %v7294_v6, %v7139_v9 }
  0xa3   :  { %363 = vbcast.lane.b32.xlu1 %v357_v40, 264  ;;  %359 = vbcast.lane.b32.xlu0 %v357_v40, 256 }
  0xa5   :  { %v7196_v43 = vpop.permute.xlu1 %97  ;;  %v7198_v44 = vpop.permute.xlu0 %93 }
  0xa6   :  { %12030 = vst [vmem:[#allocation17_spill] sm:$0xff] %v7196_v43  ;;  %v1263_v8 = vcombine.low %v7178_v34, %v7198_v44 }
  0xa7   :  { %371 = vbcast.lane.b32.xlu1 %v357_v40, 280  ;;  %367 = vbcast.lane.b32.xlu0 %v357_v40, 272  ;;  %v7272_v40 = vsub.s32 %v1315_v21, %v7124_v1 }
  0xa8   :  { %v7254_v22 = vrot.slane %v1263_v8, %v7245_v16 }
  0xa9   :  { %v7202_v46 = vpop.permute.xlu1 %105  ;;  %v7204_v47 = vpop.permute.xlu0 %101 }
  0xaa   :  { %12031 = vst [vmem:[#allocation18_spill] sm:$0xff] %v7202_v46  ;;  %12032 = vst [vmem:[#allocation19_spill] sm:$0xff] %v7204_v47 }
  0xab   :  { %382 = vbcast.lane.b32.xlu1 %v376_v45, 264  ;;  %378 = vbcast.lane.b32.xlu0 %v376_v45, 256 }
  0xad   :  { %v7206_v48 = vpop.permute.xlu1 %116  ;;  %v7208_v49 = vpop.permute.xlu0 %112 }
  0xae   :  { %12033 = vst [vmem:[#allocation20_spill] sm:$0xff] %v7206_v48 }
  0xaf   :  { %390 = vbcast.lane.b32.xlu1 %v376_v45, 280  ;;  %386 = vbcast.lane.b32.xlu0 %v376_v45, 272  ;;  %v1311_v45 = vcombine.low %v7267_v29, %v7254_v22 }
  0xb1   :  { %v7212_v51 = vpop.permute.xlu1 %124  ;;  %v7214_v52 = vpop.permute.xlu0 %120 }
  0xb2   :  { %12034 = vst [vmem:[#allocation21_spill] sm:$0xff] %v7212_v51  ;;  %12035 = vst [vmem:[#allocation22_spill] sm:$0xff] %v7214_v52 }
  0xb3   :  { %401 = vbcast.lane.b32.xlu1 %v395_v50, 264  ;;  %397 = vbcast.lane.b32.xlu0 %v395_v50, 256 }
  0xb5   :  { %v7216_v53 = vpop.permute.xlu1 %135  ;;  %v7218_v54 = vpop.permute.xlu0 %131 }
  0xb6   :  { %12036 = vst [vmem:[#allocation23_spill] sm:$0xff] %v7216_v53 }
  0xb7   :  { %409 = vbcast.lane.b32.xlu1 %v395_v50, 280  ;;  %405 = vbcast.lane.b32.xlu0 %v395_v50, 272 }
  0xb9   :  { %v7222_v56 = vpop.permute.xlu1 %143  ;;  %v7224_v57 = vpop.permute.xlu0 %139 }
  0xba   :  { %12037 = vst [vmem:[#allocation24_spill] sm:$0xff] %v7222_v56  ;;  %12038 = vst [vmem:[#allocation25_spill] sm:$0xff] %v7224_v57 }
  0xbb   :  { %420 = vbcast.lane.b32.xlu1 %v414_v55, 264  ;;  %416 = vbcast.lane.b32.xlu0 %v414_v55, 256 }
  0xbd   :  { %v7226_v58 = vpop.permute.xlu1 %154  ;;  %v7228_v59 = vpop.permute.xlu0 %150 }
  0xbe   :  { %12039 = vst [vmem:[#allocation26_spill] sm:$0xff] %v7226_v58  ;;  %v1279_v10 = vcombine.low %v7208_v49, %v7228_v59 }
  0xbf   :  { %428 = vbcast.lane.b32.xlu1 %v414_v55, 280  ;;  %424 = vbcast.lane.b32.xlu0 %v414_v55, 272 }
  0xc0   :  { %v7260_v24 = vrot.slane %v1279_v10, %v7245_v16 }
  0xc1   :  { %v7232_v63 = vpop.permute.xlu1 %162  ;;  %v7234_v0 = vpop.permute.xlu0 %158 }
  0xc2   :  { %12040 = vst [vmem:[#allocation27_spill] sm:$0xff] %v7232_v63  ;;  %12041 = vst [vmem:[#allocation28_spill] sm:$0xff] %v7234_v0 }
  0xc3   :  { %439 = vbcast.lane.b32.xlu1 %v433_v62, 264  ;;  %435 = vbcast.lane.b32.xlu0 %v433_v62, 256 }
  0xc5   :  { %v7240_v12 = vpop.permute.xlu1 %173  ;;  %v7242_v14 = vpop.permute.xlu0 %169 }
  0xc6   :  { %12042 = vst [vmem:[#allocation29_spill] sm:$0xff] %v7240_v12  ;;  %v1295_v19 = vcombine.low %v7218_v54, %v7242_v14 }
  0xc7   :  { %447 = vbcast.lane.b32.xlu1 %v433_v62, 280  ;;  %443 = vbcast.lane.b32.xlu0 %v433_v62, 272  ;;  %v7286_v62 = vrot.slane %v1311_v45, %v7272_v40 }
  0xc8   :  { %v7257_v23 = vrot.slane %v1295_v19, %v7245_v16 }
  0xc9   :  { %v7262_v25 = vpop.permute.xlu1 %181  ;;  %v7264_v26 = vpop.permute.xlu0 %177  ;;  %12049 = vst [vmem:[#allocation36_spill] sm:$0xff] %v7286_v62 }
  0xca   :  { %12044 = vst [vmem:[#allocation31_spill] sm:$0xff] %v7262_v25  ;;  %12045 = vst [vmem:[#allocation32_spill] sm:$0xff] %v7264_v26  ;;  %v1343_v35 = vcombine.low %v7260_v24, %v7257_v23 }
  0xcb   :  { %458 = vbcast.lane.b32.xlu1 %v452_v20, 264  ;;  %454 = vbcast.lane.b32.xlu0 %v452_v20, 256 }
  0xcc   :  { %v7281_v60 = vrot.slane %v1343_v35, %v7272_v40  ;;  %v509_v35 = vrot.slane %v7294_v6, %v7131_v5 }
  0xcd   :  { %v7276_v50 = vpop.permute.xlu1 %192  ;;  %v7278_v55 = vpop.permute.xlu0 %188 }
  0xce   :  { %12046 = vst [vmem:[#allocation33_spill] sm:$0xff] %v7276_v50  ;;  %12047 = vst [vmem:[#allocation34_spill] sm:$0xff] %v7278_v55 }
  0xcf   :  { %12048 = vst [vmem:[#allocation35_spill] sm:$0xff] %v7281_v60  ;;  %466 = vbcast.lane.b32.xlu1 %v452_v20, 280  ;;  %462 = vbcast.lane.b32.xlu0 %v452_v20, 272 }
  0xd1   :  { %v7288_v1 = vpop.permute.xlu1 %200  ;;  %v7290_v3 = vpop.permute.xlu0 %196 }
  0xd2   :  { %12050 = vst [vmem:[#allocation37_spill] sm:$0xff] %v7288_v1  ;;  %12051 = vst [vmem:[#allocation38_spill] sm:$0xff] %v7290_v3  ;;  %v566_v3 = vrot.slane %v7294_v6, %v7143_v11 }
  0xd3   :  { %477 = vbcast.lane.b32.xlu1 %v471_v61, 264  ;;  %473 = vbcast.lane.b32.xlu0 %v471_v61, 256 }
  0xd5   :  { %v7296_v8 = vpop.permute.xlu1 %211  ;;  %v7298_v10 = vpop.permute.xlu0 %207 }
  0xd6   :  { %12052 = vst [vmem:[#allocation39_spill] sm:$0xff] %v7296_v8  ;;  %12053 = vst [vmem:[#allocation40_spill] sm:$0xff] %v7298_v10 }
  0xd7   :  { %485 = vbcast.lane.b32.xlu1 %v471_v61, 280  ;;  %481 = vbcast.lane.b32.xlu0 %v471_v61, 272 }
  0xd9   :  { %v7302_v18 = vpop.permute.xlu1 %219  ;;  %v7304_v19 = vpop.permute.xlu0 %215 }
  0xda   :  { %12054 = vst [vmem:[#allocation41_spill] sm:$0xff] %v7302_v18  ;;  %12055 = vst [vmem:[#allocation42_spill] sm:$0xff] %v7304_v19 }
  0xdb   :  { %496 = vbcast.lane.b32.xlu1 %v490_v32, 264  ;;  %492 = vbcast.lane.b32.xlu0 %v490_v32, 256 }
  0xdd   :  { %v7306_v20 = vpop.permute.xlu1 %230  ;;  %v7308_v21 = vpop.permute.xlu0 %226 }
  0xde   :  { %12056 = vst [vmem:[#allocation43_spill] sm:$0xff] %v7306_v20  ;;  %12057 = vst [vmem:[#allocation44_spill] sm:$0xff] %v7308_v21  ;;  %v1791_v61 = vcombine.low %v7278_v55, %v7308_v21 }
  0xdf   :  { %504 = vbcast.lane.b32.xlu1 %v490_v32, 280  ;;  %500 = vbcast.lane.b32.xlu0 %v490_v32, 272  ;;  %v528_v32 = vrot.slane %v7294_v6, %v7135_v7 }
  0xe0   :  { %v1799_v25 = vrot.slane %v1791_v61, %v7245_v16 }
  0xe1   :  { %v7312_v45 = vpop.permute.xlu1 %238  ;;  %v7314_v4 = vpop.permute.xlu0 %234 }
  0xe2   :  { %12058 = vst [vmem:[#allocation45_spill] sm:$0xff] %v7312_v45  ;;  %12059 = vst [vmem:[#allocation46_spill] sm:$0xff] %v7314_v4 }
  0xe3   :  { %515 = vbcast.lane.b32.xlu1 %v509_v35, 264  ;;  %511 = vbcast.lane.b32.xlu0 %v509_v35, 256 }
  0xe5   :  { %v7318_v18 = vpop.permute.xlu1 %249  ;;  %v7320_v1 = vpop.permute.xlu0 %245 }
  0xe6   :  { %12060 = vst [vmem:[#allocation47_spill] sm:$0xff] %v7318_v18  ;;  %12061 = vst [vmem:[#allocation48_spill] sm:$0xff] %v7320_v1  ;;  %v1807_v56 = vcombine.low %v7298_v10, %v7320_v1 }
  0xe7   :  { %523 = vbcast.lane.b32.xlu1 %v509_v35, 280  ;;  %519 = vbcast.lane.b32.xlu0 %v509_v35, 272 }
  0xe8   :  { %v1815_v45 = vrot.slane %v1807_v56, %v7245_v16 }
  0xe9   :  { %v7328_v51 = vpop.permute.xlu1 %257  ;;  %v7330_v63 = vpop.permute.xlu0 %253 }
  0xea   :  { %12062 = vst [vmem:[#allocation49_spill] sm:$0xff] %v7328_v51  ;;  %12063 = vst [vmem:[#allocation50_spill] sm:$0xff] %v7330_v63  ;;  %v1856_v36 = vcombine.high %v1799_v25, %v1815_v45 }
  0xeb   :  { %534 = vbcast.lane.b32.xlu1 %v528_v32, 264  ;;  %530 = vbcast.lane.b32.xlu0 %v528_v32, 256 }
  0xed   :  { %v7332_v46 = vpop.permute.xlu1 %268  ;;  %v7334_v30 = vpop.permute.xlu0 %264 }
  0xee   :  { %12064 = vst [vmem:[#allocation51_spill] sm:$0xff] %v7332_v46  ;;  %12065 = vst [vmem:[#allocation52_spill] sm:$0xff] %v7334_v30 }
  0xef   :  { %542 = vbcast.lane.b32.xlu1 %v528_v32, 280  ;;  %538 = vbcast.lane.b32.xlu0 %v528_v32, 272 }
  0xf1   :  { %v7338_v56 = vpop.permute.xlu1 %276  ;;  %v7340_v35 = vpop.permute.xlu0 %272 }
  0xf2   :  { %12066 = vst [vmem:[#allocation53_spill] sm:$0xff] %v7338_v56  ;;  %12067 = vst [vmem:[#allocation54_spill] sm:$0xff] %v7340_v35  ;;  %v585_v35 = vrot.slane %v7294_v6, %v7147_v13 }
  0xf3   :  { %553 = vbcast.lane.b32.xlu1 %v547_v41, 264  ;;  %549 = vbcast.lane.b32.xlu0 %v547_v41, 256 }
  0xf5   :  { %v7342_v61 = vpop.permute.xlu1 %287  ;;  %v7344_v51 = vpop.permute.xlu0 %283 }
  0xf6   :  { %12068 = vst [vmem:[#allocation55_spill] sm:$0xff] %v7342_v61  ;;  %12069 = vst [vmem:[#allocation56_spill] sm:$0xff] %v7344_v51 }
  0xf7   :  { %561 = vbcast.lane.b32.xlu1 %v547_v41, 280  ;;  %557 = vbcast.lane.b32.xlu0 %v547_v41, 272 }
  0xf9   :  { %v7348_v4 = vpop.permute.xlu1 %295  ;;  %v7350_v19 = vpop.permute.xlu0 %291 }
  0xfa   :  { %12070 = vst [vmem:[#allocation57_spill] sm:$0xff] %v7348_v4  ;;  %12071 = vst [vmem:[#allocation58_spill] sm:$0xff] %v7350_v19 }
  0xfb   :  { %572 = vbcast.lane.b32.xlu1 %v566_v3, 264  ;;  %568 = vbcast.lane.b32.xlu0 %v566_v3, 256 }
  0xfd   :  { %v7352_v32 = vpop.permute.xlu1 %306  ;;  %v7354_v56 = vpop.permute.xlu0 %302 }
  0xfe   :  { %12072 = vst [vmem:[#allocation59_spill] sm:$0xff] %v7352_v32  ;;  %12073 = vst [vmem:[#allocation60_spill] sm:$0xff] %v7354_v56  ;;  %v1823_v41 = vcombine.low %v7334_v30, %v7354_v56  ;;  %v7520_v56 = vld [vmem:[#allocation2 + $0x28] sm:$0xff] }
  0xff   :  { %580 = vbcast.lane.b32.xlu1 %v566_v3, 280  ;;  %576 = vbcast.lane.b32.xlu0 %v566_v3, 272  ;;  %v604_v3 = vrot.slane %v7294_v6, %v7151_v15 }
 0x100   :  { %v1831_v57 = vrot.slane %v1823_v41, %v7245_v16 }
 0x101   :  { %v7358_v63 = vpop.permute.xlu1 %314  ;;  %v7360_v52 = vpop.permute.xlu0 %310 }
 0x102   :  { %12074 = vst [vmem:[#allocation61_spill] sm:$0xff] %v7358_v63  ;;  %12075 = vst [vmem:[#allocation62_spill] sm:$0xff] %v7360_v52  ;;  %v1855_v52 = vcombine.low %v1799_v25, %v1815_v45  ;;  %v7389_v25 = vrot.slane %v1856_v36, %v7272_v40 }
 0x103   :  { %591 = vbcast.lane.b32.xlu1 %v585_v35, 264  ;;  %587 = vbcast.lane.b32.xlu0 %v585_v35, 256 }
 0x104   :  { %12083 = vst [vmem:[#allocation70_spill] sm:$0xff] %v7389_v25 }
 0x105   :  { %v7364_v4 = vpop.permute.xlu1 %325  ;;  %v7366_v19 = vpop.permute.xlu0 %321 }
 0x106   :  { %12076 = vst [vmem:[#allocation63_spill] sm:$0xff] %v7364_v4  ;;  %12077 = vst [vmem:[#allocation64_spill] sm:$0xff] %v7366_v19  ;;  %v1839_v0 = vcombine.low %v7344_v51, %v7366_v19  ;;  %v7383_v4 = vrot.slane %v1855_v52, %v7272_v40 }
 0x107   :  { %599 = vbcast.lane.b32.xlu1 %v585_v35, 280  ;;  %595 = vbcast.lane.b32.xlu0 %v585_v35, 272 }
 0x108   :  { %v1847_v63 = vrot.slane %v1839_v0, %v7245_v16  ;;  %12081 = vst [vmem:[#allocation68_spill] sm:$0xff] %v7383_v4 }
 0x109   :  { %v7374_v26 = vpop.permute.xlu1 %333  ;;  %v7376_v37 = vpop.permute.xlu0 %329 }
 0x10a   :  { %12078 = vst [vmem:[#allocation65_spill] sm:$0xff] %v7374_v26  ;;  %12079 = vst [vmem:[#allocation66_spill] sm:$0xff] %v7376_v37  ;;  %v1887_v47 = vcombine.low %v1831_v57, %v1847_v63  ;;  %v1888_v27 = vcombine.high %v1831_v57, %v1847_v63  ;;  %v623_v57 = vrot.slane %v7294_v6, %v7155_v17 }
 0x10b   :  { %610 = vbcast.lane.b32.xlu1 %v604_v3, 264  ;;  %606 = vbcast.lane.b32.xlu0 %v604_v3, 256 }
 0x10c   :  { %v7386_v0 = vrot.slane %v1887_v47, %v7272_v40  ;;  %v7392_v45 = vrot.slane %v1888_v27, %v7272_v40  ;;  %v7406_v27 = vld [vmem:[#allocation2 + $0x20] sm:$0xff] }
 0x10d   :  { %v7378_v42 = vpop.permute.xlu1 %344  ;;  %v7380_v61 = vpop.permute.xlu0 %340  ;;  %v642_v63 = vrot.slane %v7406_v27, %v7127_v2 }
 0x10e   :  { %12080 = vst [vmem:[#allocation67_spill] sm:$0xff] %v7378_v42  ;;  %12082 = vst [vmem:[#allocation69_spill] sm:$0xff] %v7386_v0 }
 0x10f   :  { %12084 = vst [vmem:[#allocation71_spill] sm:$0xff] %v7392_v45  ;;  %618 = vbcast.lane.b32.xlu1 %v604_v3, 280  ;;  %614 = vbcast.lane.b32.xlu0 %v604_v3, 272 }
 0x111   :  { %v7402_v35 = vpop.permute.xlu1 %352  ;;  %v7404_v36 = vpop.permute.xlu0 %348 }
 0x112   :  { %12085 = vst [vmem:[#allocation72_spill] sm:$0xff] %v7402_v35  ;;  %12086 = vst [vmem:[#allocation73_spill] sm:$0xff] %v7404_v36  ;;  %v661_v35 = vrot.slane %v7406_v27, %v7131_v5 }
 0x113   :  { %629 = vbcast.lane.b32.xlu1 %v623_v57, 264  ;;  %625 = vbcast.lane.b32.xlu0 %v623_v57, 256 }
 0x115   :  { %v7408_v41 = vpop.permute.xlu1 %363  ;;  %v7410_v6 = vpop.permute.xlu0 %359 }
 0x116   :  { %12087 = vst [vmem:[#allocation74_spill] sm:$0xff] %v7408_v41 }
 0x117   :  { %637 = vbcast.lane.b32.xlu1 %v623_v57, 280  ;;  %633 = vbcast.lane.b32.xlu0 %v623_v57, 272 }
 0x119   :  { %v7414_v52 = vpop.permute.xlu1 %371  ;;  %v7416_v3 = vpop.permute.xlu0 %367 }
 0x11a   :  { %12088 = vst [vmem:[#allocation75_spill] sm:$0xff] %v7414_v52  ;;  %12089 = vst [vmem:[#allocation76_spill] sm:$0xff] %v7416_v3  ;;  %v680_v3 = vrot.slane %v7406_v27, %v7135_v7 }
 0x11b   :  { %648 = vbcast.lane.b32.xlu1 %v642_v63, 264  ;;  %644 = vbcast.lane.b32.xlu0 %v642_v63, 256 }
 0x11d   :  { %v7418_v47 = vpop.permute.xlu1 %382  ;;  %v7420_v26 = vpop.permute.xlu0 %378 }
 0x11e   :  { %12090 = vst [vmem:[#allocation77_spill] sm:$0xff] %v7418_v47 }
 0x11f   :  { %656 = vbcast.lane.b32.xlu1 %v642_v63, 280  ;;  %652 = vbcast.lane.b32.xlu0 %v642_v63, 272 }
 0x121   :  { %v7424_v37 = vpop.permute.xlu1 %390  ;;  %v7426_v36 = vpop.permute.xlu0 %386 }
 0x122   :  { %12091 = vst [vmem:[#allocation78_spill] sm:$0xff] %v7424_v37  ;;  %12092 = vst [vmem:[#allocation79_spill] sm:$0xff] %v7426_v36  ;;  %v699_v36 = vrot.slane %v7406_v27, %v7139_v9 }
 0x123   :  { %667 = vbcast.lane.b32.xlu1 %v661_v35, 264  ;;  %663 = vbcast.lane.b32.xlu0 %v661_v35, 256 }
 0x125   :  { %v7428_v57 = vpop.permute.xlu1 %401  ;;  %v7430_v52 = vpop.permute.xlu0 %397 }
 0x126   :  { %12093 = vst [vmem:[#allocation80_spill] sm:$0xff] %v7428_v57 }
 0x127   :  { %675 = vbcast.lane.b32.xlu1 %v661_v35, 280  ;;  %671 = vbcast.lane.b32.xlu0 %v661_v35, 272 }
 0x129   :  { %v7434_v46 = vpop.permute.xlu1 %409  ;;  %v7436_v32 = vpop.permute.xlu0 %405 }
 0x12a   :  { %12094 = vst [vmem:[#allocation81_spill] sm:$0xff] %v7434_v46  ;;  %12095 = vst [vmem:[#allocation82_spill] sm:$0xff] %v7436_v32  ;;  %v718_v32 = vrot.slane %v7406_v27, %v7143_v11 }
 0x12b   :  { %686 = vbcast.lane.b32.xlu1 %v680_v3, 264  ;;  %682 = vbcast.lane.b32.xlu0 %v680_v3, 256 }
 0x12d   :  { %v7438_v63 = vpop.permute.xlu1 %420  ;;  %v7440_v37 = vpop.permute.xlu0 %416 }
 0x12e   :  { %12096 = vst [vmem:[#allocation83_spill] sm:$0xff] %v7438_v63 }
 0x12f   :  { %694 = vbcast.lane.b32.xlu1 %v680_v3, 280  ;;  %690 = vbcast.lane.b32.xlu0 %v680_v3, 272 }
 0x131   :  { %v7444_v8 = vpop.permute.xlu1 %428  ;;  %v7446_v18 = vpop.permute.xlu0 %424 }
 0x132   :  { %12097 = vst [vmem:[#allocation84_spill] sm:$0xff] %v7444_v8  ;;  %12098 = vst [vmem:[#allocation85_spill] sm:$0xff] %v7446_v18  ;;  %v737_v18 = vrot.slane %v7406_v27, %v7147_v13 }
 0x133   :  { %705 = vbcast.lane.b32.xlu1 %v699_v36, 264  ;;  %701 = vbcast.lane.b32.xlu0 %v699_v36, 256 }
 0x135   :  { %v7448_v35 = vpop.permute.xlu1 %439  ;;  %v7450_v46 = vpop.permute.xlu0 %435 }
 0x136   :  { %12099 = vst [vmem:[#allocation86_spill] sm:$0xff] %v7448_v35 }
 0x137   :  { %713 = vbcast.lane.b32.xlu1 %v699_v36, 280  ;;  %709 = vbcast.lane.b32.xlu0 %v699_v36, 272  ;;  %v2351_v36 = vcombine.low %v7410_v6, %v7430_v52 }
 0x139   :  { %v7454_v50 = vpop.permute.xlu1 %447  ;;  %v7456_v20 = vpop.permute.xlu0 %443 }
 0x13a   :  { %12100 = vst [vmem:[#allocation87_spill] sm:$0xff] %v7454_v50  ;;  %12101 = vst [vmem:[#allocation88_spill] sm:$0xff] %v7456_v20 }
 0x13b   :  { %724 = vbcast.lane.b32.xlu1 %v718_v32, 264  ;;  %720 = vbcast.lane.b32.xlu0 %v718_v32, 256 }
 0x13d   :  { %v7458_v3 = vpop.permute.xlu1 %458  ;;  %v7460_v8 = vpop.permute.xlu0 %454 }
 0x13e   :  { %12102 = vst [vmem:[#allocation89_spill] sm:$0xff] %v7458_v3  ;;  %v2367_v50 = vcombine.low %v7440_v37, %v7460_v8  ;;  %v2335_v3 = vcombine.low %v7380_v61, %v7420_v26 }
 0x13f   :  { %732 = vbcast.lane.b32.xlu1 %v718_v32, 280  ;;  %728 = vbcast.lane.b32.xlu0 %v718_v32, 272 }
 0x140   :  { %v7486_v57 = vrot.slane %v2367_v50, %v7245_v16  ;;  %v7494_v47 = vrot.slane %v2335_v3, %v7245_v16  ;;  %v775_v3 = vrot.slane %v7406_v27, %v7155_v17 }
 0x141   :  { %v7464_v35 = vpop.permute.xlu1 %466  ;;  %v7466_v63 = vpop.permute.xlu0 %462 }
 0x142   :  { %12103 = vst [vmem:[#allocation90_spill] sm:$0xff] %v7464_v35  ;;  %12104 = vst [vmem:[#allocation91_spill] sm:$0xff] %v7466_v63  ;;  %v756_v35 = vrot.slane %v7406_v27, %v7151_v15  ;;  %v7483_v63 = vrot.slane %v2351_v36, %v7245_v16  ;;  %v794_v27 = vrot.slane %v7520_v56, %v7127_v2 }
 0x143   :  { %743 = vbcast.lane.b32.xlu1 %v737_v18, 264  ;;  %739 = vbcast.lane.b32.xlu0 %v737_v18, 256 }
 0x145   :  { %v7472_v20 = vpop.permute.xlu1 %477  ;;  %v7476_v41 = vpop.permute.xlu0 %473 }
 0x146   :  { %12105 = vst [vmem:[#allocation92_spill] sm:$0xff] %v7472_v20  ;;  %v2383_v32 = vcombine.low %v7450_v46, %v7476_v41 }
 0x147   :  { %751 = vbcast.lane.b32.xlu1 %v737_v18, 280  ;;  %747 = vbcast.lane.b32.xlu0 %v737_v18, 272  ;;  %v2399_v18 = vcombine.low %v7494_v47, %v7483_v63 }
 0x148   :  { %v7489_v20 = vrot.slane %v2383_v32, %v7245_v16 }
 0x149   :  { %v7491_v42 = vpop.permute.xlu1 %485  ;;  %v7496_v55 = vpop.permute.xlu0 %481 }
 0x14a   :  { %12106 = vst [vmem:[#allocation93_spill] sm:$0xff] %v7491_v42  ;;  %12107 = vst [vmem:[#allocation94_spill] sm:$0xff] %v7496_v55  ;;  %v2431_v21 = vcombine.low %v7486_v57, %v7489_v20  ;;  %v7512_v42 = vrot.slane %v2399_v18, %v7272_v40 }
 0x14b   :  { %762 = vbcast.lane.b32.xlu1 %v756_v35, 264  ;;  %758 = vbcast.lane.b32.xlu0 %v756_v35, 256 }
 0x14c   :  { %v7507_v32 = vrot.slane %v2431_v21, %v7272_v40  ;;  %12111 = vst [vmem:[#allocation98_spill] sm:$0xff] %v7512_v42 }
 0x14d   :  { %v7502_v50 = vpop.permute.xlu1 %496  ;;  %v7504_v36 = vpop.permute.xlu0 %492 }
 0x14e   :  { %12108 = vst [vmem:[#allocation95_spill] sm:$0xff] %v7502_v50  ;;  %12109 = vst [vmem:[#allocation96_spill] sm:$0xff] %v7504_v36 }
 0x14f   :  { %12110 = vst [vmem:[#allocation97_spill] sm:$0xff] %v7507_v32  ;;  %770 = vbcast.lane.b32.xlu1 %v756_v35, 280  ;;  %766 = vbcast.lane.b32.xlu0 %v756_v35, 272 }
 0x151   :  { %v7514_v55 = vpop.permute.xlu1 %504  ;;  %v7516_v30 = vpop.permute.xlu0 %500 }
 0x152   :  { %12112 = vst [vmem:[#allocation99_spill] sm:$0xff] %v7514_v55  ;;  %12113 = vst [vmem:[#allocation100_spill] sm:$0xff] %v7516_v30  ;;  %v813_v30 = vrot.slane %v7520_v56, %v7131_v5 }
 0x153   :  { %781 = vbcast.lane.b32.xlu1 %v775_v3, 264  ;;  %777 = vbcast.lane.b32.xlu0 %v775_v3, 256 }
 0x155   :  { %v7522_v21 = vpop.permute.xlu1 %515  ;;  %v7524_v10 = vpop.permute.xlu0 %511 }
 0x156   :  { %12114 = vst [vmem:[#allocation101_spill] sm:$0xff] %v7522_v21  ;;  %12115 = vst [vmem:[#allocation102_spill] sm:$0xff] %v7524_v10 }
 0x157   :  { %789 = vbcast.lane.b32.xlu1 %v775_v3, 280  ;;  %785 = vbcast.lane.b32.xlu0 %v775_v3, 272 }
 0x159   :  { %v7528_v35 = vpop.permute.xlu1 %523  ;;  %v7530_v18 = vpop.permute.xlu0 %519 }
 0x15a   :  { %12116 = vst [vmem:[#allocation103_spill] sm:$0xff] %v7528_v35  ;;  %12117 = vst [vmem:[#allocation104_spill] sm:$0xff] %v7530_v18 }
 0x15b   :  { %800 = vbcast.lane.b32.xlu1 %v794_v27, 264  ;;  %796 = vbcast.lane.b32.xlu0 %v794_v27, 256 }
 0x15d   :  { %v7532_v50 = vpop.permute.xlu1 %534  ;;  %v7534_v55 = vpop.permute.xlu0 %530 }
 0x15e   :  { %12118 = vst [vmem:[#allocation105_spill] sm:$0xff] %v7532_v50  ;;  %12119 = vst [vmem:[#allocation106_spill] sm:$0xff] %v7534_v55  ;;  %v2879_v3 = vcombine.low %v7504_v36, %v7534_v55 }
 0x15f   :  { %808 = vbcast.lane.b32.xlu1 %v794_v27, 280  ;;  %804 = vbcast.lane.b32.xlu0 %v794_v27, 272  ;;  %v832_v27 = vrot.slane %v7520_v56, %v7135_v7 }
 0x161   :  { %v7538_v21 = vpop.permute.xlu1 %542  ;;  %v7540_v1 = vpop.permute.xlu0 %538 }
 0x162   :  { %12120 = vst [vmem:[#allocation107_spill] sm:$0xff] %v7538_v21  ;;  %12121 = vst [vmem:[#allocation108_spill] sm:$0xff] %v7540_v1  ;;  %v2887_v21 = vrot.slane %v2879_v3, %v7245_v16 }
 0x163   :  { %819 = vbcast.lane.b32.xlu1 %v813_v30, 264  ;;  %815 = vbcast.lane.b32.xlu0 %v813_v30, 256 }
 0x165   :  { %v7544_v35 = vpop.permute.xlu1 %553  ;;  %v7546_v18 = vpop.permute.xlu0 %549 }
 0x166   :  { %12122 = vst [vmem:[#allocation109_spill] sm:$0xff] %v7544_v35  ;;  %12123 = vst [vmem:[#allocation110_spill] sm:$0xff] %v7546_v18  ;;  %v2895_v50 = vcombine.low %v7524_v10, %v7546_v18  ;;  %v851_v10 = vrot.slane %v7520_v56, %v7139_v9 }
 0x167   :  { %827 = vbcast.lane.b32.xlu1 %v813_v30, 280  ;;  %823 = vbcast.lane.b32.xlu0 %v813_v30, 272 }
 0x168   :  { %v2903_v1 = vrot.slane %v2895_v50, %v7245_v16 }
 0x169   :  { %v7554_v51 = vpop.permute.xlu1 %561  ;;  %v7556_v19 = vpop.permute.xlu0 %557 }
 0x16a   :  { %12124 = vst [vmem:[#allocation111_spill] sm:$0xff] %v7554_v51  ;;  %12125 = vst [vmem:[#allocation112_spill] sm:$0xff] %v7556_v19  ;;  %v2944_v36 = vcombine.high %v2887_v21, %v2903_v1  ;;  %v870_v19 = vrot.slane %v7520_v56, %v7143_v11 }
 0x16b   :  { %838 = vbcast.lane.b32.xlu1 %v832_v27, 264  ;;  %834 = vbcast.lane.b32.xlu0 %v832_v27, 256 }
 0x16d   :  { %v7558_v35 = vpop.permute.xlu1 %572  ;;  %v7560_v55 = vpop.permute.xlu0 %568 }
 0x16e   :  { %12126 = vst [vmem:[#allocation113_spill] sm:$0xff] %v7558_v35  ;;  %12127 = vst [vmem:[#allocation114_spill] sm:$0xff] %v7560_v55 }
 0x16f   :  { %846 = vbcast.lane.b32.xlu1 %v832_v27, 280  ;;  %842 = vbcast.lane.b32.xlu0 %v832_v27, 272 }
 0x171   :  { %v7564_v30 = vpop.permute.xlu1 %580  ;;  %v7566_v3 = vpop.permute.xlu0 %576 }
 0x172   :  { %12128 = vst [vmem:[#allocation115_spill] sm:$0xff] %v7564_v30  ;;  %12129 = vst [vmem:[#allocation116_spill] sm:$0xff] %v7566_v3  ;;  %v889_v3 = vrot.slane %v7520_v56, %v7147_v13 }
 0x173   :  { %857 = vbcast.lane.b32.xlu1 %v851_v10, 264  ;;  %853 = vbcast.lane.b32.xlu0 %v851_v10, 256 }
 0x175   :  { %v7568_v50 = vpop.permute.xlu1 %591  ;;  %v7570_v51 = vpop.permute.xlu0 %587 }
 0x176   :  { %12130 = vst [vmem:[#allocation117_spill] sm:$0xff] %v7568_v50  ;;  %12131 = vst [vmem:[#allocation118_spill] sm:$0xff] %v7570_v51 }
 0x177   :  { %865 = vbcast.lane.b32.xlu1 %v851_v10, 280  ;;  %861 = vbcast.lane.b32.xlu0 %v851_v10, 272 }
 0x179   :  { %v7574_v35 = vpop.permute.xlu1 %599  ;;  %v7576_v18 = vpop.permute.xlu0 %595 }
 0x17a   :  { %12132 = vst [vmem:[#allocation119_spill] sm:$0xff] %v7574_v35  ;;  %12133 = vst [vmem:[#allocation120_spill] sm:$0xff] %v7576_v18 }
 0x17b   :  { %876 = vbcast.lane.b32.xlu1 %v870_v19, 264  ;;  %872 = vbcast.lane.b32.xlu0 %v870_v19, 256 }
 0x17d   :  { %v7578_v27 = vpop.permute.xlu1 %610  ;;  %v7580_v30 = vpop.permute.xlu0 %606 }
 0x17e   :  { %12134 = vst [vmem:[#allocation121_spill] sm:$0xff] %v7578_v27  ;;  %12135 = vst [vmem:[#allocation122_spill] sm:$0xff] %v7580_v30  ;;  %v2911_v10 = vcombine.low %v7560_v55, %v7580_v30 }
 0x17f   :  { %884 = vbcast.lane.b32.xlu1 %v870_v19, 280  ;;  %880 = vbcast.lane.b32.xlu0 %v870_v19, 272  ;;  %v908_v19 = vrot.slane %v7520_v56, %v7151_v15 }
 0x181   :  { %v7584_v50 = vpop.permute.xlu1 %618  ;;  %v7586_v53 = vpop.permute.xlu0 %614 }
 0x182   :  { %12136 = vst [vmem:[#allocation123_spill] sm:$0xff] %v7584_v50  ;;  %12137 = vst [vmem:[#allocation124_spill] sm:$0xff] %v7586_v53  ;;  %v2943_v50 = vcombine.low %v2887_v21, %v2903_v1  ;;  %v2919_v53 = vrot.slane %v2911_v10, %v7245_v16  ;;  %v7613_v1 = vrot.slane %v2944_v36, %v7272_v40  ;;  %v7632_v10 = vld [vmem:[#allocation2 + $0x30] sm:$0xff] }
 0x183   :  { %895 = vbcast.lane.b32.xlu1 %v889_v3, 264  ;;  %891 = vbcast.lane.b32.xlu0 %v889_v3, 256 }
 0x184   :  { %12145 = vst [vmem:[#allocation132_spill] sm:$0xff] %v7613_v1 }
 0x185   :  { %v7590_v35 = vpop.permute.xlu1 %629  ;;  %v7592_v18 = vpop.permute.xlu0 %625 }
 0x186   :  { %12138 = vst [vmem:[#allocation125_spill] sm:$0xff] %v7590_v35  ;;  %12139 = vst [vmem:[#allocation126_spill] sm:$0xff] %v7592_v18  ;;  %v2927_v27 = vcombine.low %v7570_v51, %v7592_v18  ;;  %v7607_v51 = vrot.slane %v2943_v50, %v7272_v40 }
 0x187   :  { %903 = vbcast.lane.b32.xlu1 %v889_v3, 280  ;;  %899 = vbcast.lane.b32.xlu0 %v889_v3, 272 }
 0x188   :  { %v2935_v12 = vrot.slane %v2927_v27, %v7245_v16  ;;  %12143 = vst [vmem:[#allocation130_spill] sm:$0xff] %v7607_v51 }
 0x189   :  { %v7600_v48 = vpop.permute.xlu1 %637  ;;  %v7602_v55 = vpop.permute.xlu0 %633 }
 0x18a   :  { %12140 = vst [vmem:[#allocation127_spill] sm:$0xff] %v7600_v48  ;;  %12141 = vst [vmem:[#allocation128_spill] sm:$0xff] %v7602_v55  ;;  %v2975_v35 = vcombine.low %v2919_v53, %v2935_v12  ;;  %v2976_v30 = vcombine.high %v2919_v53, %v2935_v12  ;;  %v927_v53 = vrot.slane %v7520_v56, %v7155_v17 }
 0x18b   :  { %914 = vbcast.lane.b32.xlu1 %v908_v19, 264  ;;  %910 = vbcast.lane.b32.xlu0 %v908_v19, 256  ;;  %v946_v12 = vrot.slane %v7632_v10, %v7127_v2  ;;  %v965_v55 = vrot.slane %v7632_v10, %v7131_v5 }
 0x18c   :  { %v7610_v3 = vrot.slane %v2975_v35, %v7272_v40  ;;  %v7616_v21 = vrot.slane %v2976_v30, %v7272_v40 }
 0x18d   :  { %v7604_v58 = vpop.permute.xlu1 %648  ;;  %v7618_v27 = vpop.permute.xlu0 %644 }
 0x18e   :  { %12142 = vst [vmem:[#allocation129_spill] sm:$0xff] %v7604_v58  ;;  %12144 = vst [vmem:[#allocation131_spill] sm:$0xff] %v7610_v3 }
 0x18f   :  { %12146 = vst [vmem:[#allocation133_spill] sm:$0xff] %v7616_v21  ;;  %12147 = vst [vmem:[#allocation134_spill] sm:$0xff] %v7618_v27  ;;  %922 = vbcast.lane.b32.xlu1 %v908_v19, 280  ;;  %918 = vbcast.lane.b32.xlu0 %v908_v19, 272 }
 0x191   :  { %v7628_v36 = vpop.permute.xlu1 %656  ;;  %v7630_v30 = vpop.permute.xlu0 %652 }
 0x192   :  { %12148 = vst [vmem:[#allocation135_spill] sm:$0xff] %v7628_v36  ;;  %12149 = vst [vmem:[#allocation136_spill] sm:$0xff] %v7630_v30 }
 0x193   :  { %933 = vbcast.lane.b32.xlu1 %v927_v53, 264  ;;  %929 = vbcast.lane.b32.xlu0 %v927_v53, 256 }
 0x195   :  { %v7634_v48 = vpop.permute.xlu1 %667  ;;  %v7636_v56 = vpop.permute.xlu0 %663 }
 0x196   :  { %12150 = vst [vmem:[#allocation137_spill] sm:$0xff] %v7634_v48 }
 0x197   :  { %941 = vbcast.lane.b32.xlu1 %v927_v53, 280  ;;  %937 = vbcast.lane.b32.xlu0 %v927_v53, 272 }
 0x199   :  { %v7640_v50 = vpop.permute.xlu1 %675  ;;  %v7642_v19 = vpop.permute.xlu0 %671 }
 0x19a   :  { %12151 = vst [vmem:[#allocation138_spill] sm:$0xff] %v7640_v50  ;;  %12152 = vst [vmem:[#allocation139_spill] sm:$0xff] %v7642_v19  ;;  %v984_v19 = vrot.slane %v7632_v10, %v7135_v7 }
 0x19b   :  { %952 = vbcast.lane.b32.xlu1 %v946_v12, 264  ;;  %948 = vbcast.lane.b32.xlu0 %v946_v12, 256 }
 0x19d   :  { %v7644_v35 = vpop.permute.xlu1 %686  ;;  %v7646_v36 = vpop.permute.xlu0 %682 }
 0x19e   :  { %12153 = vst [vmem:[#allocation140_spill] sm:$0xff] %v7644_v35  ;;  %12154 = vst [vmem:[#allocation141_spill] sm:$0xff] %v7646_v36 }
 0x19f   :  { %960 = vbcast.lane.b32.xlu1 %v946_v12, 280  ;;  %956 = vbcast.lane.b32.xlu0 %v946_v12, 272 }
 0x1a1   :  { %v7650_v30 = vpop.permute.xlu1 %694  ;;  %v7652_v48 = vpop.permute.xlu0 %690 }
 0x1a2   :  { %12155 = vst [vmem:[#allocation142_spill] sm:$0xff] %v7650_v30  ;;  %12156 = vst [vmem:[#allocation143_spill] sm:$0xff] %v7652_v48  ;;  %v1003_v48 = vrot.slane %v7632_v10, %v7139_v9 }
 0x1a3   :  { %971 = vbcast.lane.b32.xlu1 %v965_v55, 264  ;;  %967 = vbcast.lane.b32.xlu0 %v965_v55, 256 }
 0x1a5   :  { %v7654_v53 = vpop.permute.xlu1 %705  ;;  %v7656_v50 = vpop.permute.xlu0 %701 }
 0x1a6   :  { %12157 = vst [vmem:[#allocation144_spill] sm:$0xff] %v7654_v53 }
 0x1a7   :  { %979 = vbcast.lane.b32.xlu1 %v965_v55, 280  ;;  %975 = vbcast.lane.b32.xlu0 %v965_v55, 272 }
 0x1a9   :  { %v7660_v58 = vpop.permute.xlu1 %713  ;;  %v7662_v35 = vpop.permute.xlu0 %709 }
 0x1aa   :  { %12158 = vst [vmem:[#allocation145_spill] sm:$0xff] %v7660_v58  ;;  %12159 = vst [vmem:[#allocation146_spill] sm:$0xff] %v7662_v35  ;;  %v1022_v35 = vrot.slane %v7632_v10, %v7143_v11 }
 0x1ab   :  { %990 = vbcast.lane.b32.xlu1 %v984_v19, 264  ;;  %986 = vbcast.lane.b32.xlu0 %v984_v19, 256 }
 0x1ad   :  { %v7664_v12 = vpop.permute.xlu1 %724  ;;  %v7666_v30 = vpop.permute.xlu0 %720 }
 0x1ae   :  { %12160 = vst [vmem:[#allocation147_spill] sm:$0xff] %v7664_v12  ;;  %12161 = vst [vmem:[#allocation148_spill] sm:$0xff] %v7666_v30 }
 0x1af   :  { %998 = vbcast.lane.b32.xlu1 %v984_v19, 280  ;;  %994 = vbcast.lane.b32.xlu0 %v984_v19, 272 }
 0x1b1   :  { %v7670_v53 = vpop.permute.xlu1 %732  ;;  %v7672_v18 = vpop.permute.xlu0 %728 }
 0x1b2   :  { %12162 = vst [vmem:[#allocation149_spill] sm:$0xff] %v7670_v53  ;;  %12163 = vst [vmem:[#allocation150_spill] sm:$0xff] %v7672_v18  ;;  %v1041_v18 = vrot.slane %v7632_v10, %v7147_v13 }
 0x1b3   :  { %1009 = vbcast.lane.b32.xlu1 %v1003_v48, 264  ;;  %1005 = vbcast.lane.b32.xlu0 %v1003_v48, 256 }
 0x1b5   :  { %v7674_v55 = vpop.permute.xlu1 %743  ;;  %v7676_v58 = vpop.permute.xlu0 %739 }
 0x1b6   :  { %12164 = vst [vmem:[#allocation151_spill] sm:$0xff] %v7674_v55 }
 0x1b7   :  { %1017 = vbcast.lane.b32.xlu1 %v1003_v48, 280  ;;  %1013 = vbcast.lane.b32.xlu0 %v1003_v48, 272  ;;  %v3439_v48 = vcombine.low %v7636_v56, %v7656_v50 }
 0x1b9   :  { %v7680_v12 = vpop.permute.xlu1 %751  ;;  %v7682_v21 = vpop.permute.xlu0 %747 }
 0x1ba   :  { %12165 = vst [vmem:[#allocation152_spill] sm:$0xff] %v7680_v12  ;;  %12166 = vst [vmem:[#allocation153_spill] sm:$0xff] %v7682_v21  ;;  %v3423_v21 = vcombine.low %v7618_v27, %v7646_v36  ;;  %v7744_v36 = vld [vmem:[#allocation2 + $0x38] sm:$0xff] }
 0x1bb   :  { %1028 = vbcast.lane.b32.xlu1 %v1022_v35, 264  ;;  %1024 = vbcast.lane.b32.xlu0 %v1022_v35, 256 }
 0x1bc   :  { %v7718_v38 = vrot.slane %v3423_v21, %v7245_v16  ;;  %v1079_v21 = vrot.slane %v7632_v10, %v7155_v17 }
 0x1bd   :  { %v7684_v19 = vpop.permute.xlu1 %762  ;;  %v7686_v53 = vpop.permute.xlu0 %758 }
 0x1be   :  { %12167 = vst [vmem:[#allocation154_spill] sm:$0xff] %v7684_v19  ;;  %12168 = vst [vmem:[#allocation155_spill] sm:$0xff] %v7686_v53  ;;  %v3455_v12 = vcombine.low %v7666_v30, %v7686_v53 }
 0x1bf   :  { %1036 = vbcast.lane.b32.xlu1 %v1022_v35, 280  ;;  %1032 = vbcast.lane.b32.xlu0 %v1022_v35, 272 }
 0x1c0   :  { %v7712_v43 = vrot.slane %v3455_v12, %v7245_v16 }
 0x1c1   :  { %v7690_v55 = vpop.permute.xlu1 %770  ;;  %v7692_v1 = vpop.permute.xlu0 %766 }
 0x1c2   :  { %12169 = vst [vmem:[#allocation156_spill] sm:$0xff] %v7690_v55  ;;  %12170 = vst [vmem:[#allocation157_spill] sm:$0xff] %v7692_v1  ;;  %v1060_v55 = vrot.slane %v7632_v10, %v7151_v15  ;;  %v7707_v1 = vrot.slane %v3439_v48, %v7245_v16  ;;  %v1098_v10 = vrot.slane %v7744_v36, %v7127_v2 }
 0x1c3   :  { %1047 = vbcast.lane.b32.xlu1 %v1041_v18, 264  ;;  %1043 = vbcast.lane.b32.xlu0 %v1041_v18, 256 }
 0x1c4   :  { %v3487_v48 = vcombine.low %v7718_v38, %v7707_v1 }
 0x1c5   :  { %v7700_v19 = vpop.permute.xlu0 %777  ;;  %v7709_v33 = vpop.permute.xlu1 %781 }
 0x1c6   :  { %v3471_v35 = vcombine.low %v7676_v58, %v7700_v19  ;;  %12171 = vst [vmem:[#allocation158_spill] sm:$0xff] %v7709_v33 }
 0x1c7   :  { %1055 = vbcast.lane.b32.xlu1 %v1041_v18, 280  ;;  %1051 = vbcast.lane.b32.xlu0 %v1041_v18, 272 }
 0x1c8   :  { %v7715_v31 = vrot.slane %v3471_v35, %v7245_v16 }
 0x1c9   :  { %v7720_v45 = vpop.permute.xlu0 %785  ;;  %v7726_v18 = vpop.permute.xlu1 %789 }
 0x1ca   :  { %12172 = vst [vmem:[#allocation159_spill] sm:$0xff] %v7720_v45  ;;  %v3519_v25 = vcombine.low %v7712_v43, %v7715_v31  ;;  %12173 = vst [vmem:[#allocation160_spill] sm:$0xff] %v7726_v18  ;;  %v7736_v45 = vrot.slane %v3487_v48, %v7272_v40 }
 0x1cb   :  { %1066 = vbcast.lane.b32.xlu1 %v1060_v55, 264  ;;  %1062 = vbcast.lane.b32.xlu0 %v1060_v55, 256 }
 0x1cc   :  { %v7731_v35 = vrot.slane %v3519_v25, %v7272_v40  ;;  %12176 = vst [vmem:[#allocation163_spill] sm:$0xff] %v7736_v45 }
 0x1cd   :  { %v7728_v12 = vpop.permute.xlu0 %796  ;;  %v7742_v18 = vpop.permute.xlu1 %800 }
 0x1ce   :  { %12174 = vst [vmem:[#allocation161_spill] sm:$0xff] %v7728_v12  ;;  %12175 = vst [vmem:[#allocation162_spill] sm:$0xff] %v7731_v35 }
 0x1cf   :  { %1074 = vbcast.lane.b32.xlu1 %v1060_v55, 280  ;;  %1070 = vbcast.lane.b32.xlu0 %v1060_v55, 272  ;;  %12178 = vst [vmem:[#allocation165_spill] sm:$0xff] %v7742_v18 }
 0x1d1   :  { %v7738_v33 = vpop.permute.xlu0 %804  ;;  %v7750_v55 = vpop.permute.xlu1 %808 }
 0x1d2   :  { %12177 = vst [vmem:[#allocation164_spill] sm:$0xff] %v7738_v33  ;;  %12180 = vst [vmem:[#allocation167_spill] sm:$0xff] %v7750_v55  ;;  %v1117_v33 = vrot.slane %v7744_v36, %v7131_v5  ;;  %v1136_v5 = vrot.slane %v7744_v36, %v7135_v7 }
 0x1d3   :  { %1085 = vbcast.lane.b32.xlu1 %v1079_v21, 264  ;;  %1081 = vbcast.lane.b32.xlu0 %v1079_v21, 256 }
 0x1d5   :  { %v7746_v25 = vpop.permute.xlu0 %815  ;;  %v7758_v18 = vpop.permute.xlu1 %819 }
 0x1d6   :  { %12179 = vst [vmem:[#allocation166_spill] sm:$0xff] %v7746_v25  ;;  %12183 = vst [vmem:[#allocation170_spill] sm:$0xff] %v7758_v18 }
 0x1d7   :  { %1093 = vbcast.lane.b32.xlu1 %v1079_v21, 280  ;;  %1089 = vbcast.lane.b32.xlu0 %v1079_v21, 272 }
 0x1d9   :  { %v7752_v48 = vpop.permute.xlu0 %823  ;;  %v7764_v21 = vpop.permute.xlu1 %827 }
 0x1da   :  { %12181 = vst [vmem:[#allocation168_spill] sm:$0xff] %v7752_v48  ;;  %12185 = vst [vmem:[#allocation172_spill] sm:$0xff] %v7764_v21 }
 0x1db   :  { %1104 = vbcast.lane.b32.xlu1 %v1098_v10, 264  ;;  %1100 = vbcast.lane.b32.xlu0 %v1098_v10, 256 }
 0x1dd   :  { %v7754_v27 = vpop.permute.xlu0 %834 }
 0x1de   :  { %12182 = vst [vmem:[#allocation169_spill] sm:$0xff] %v7754_v27  ;;  %v3967_v2 = vcombine.low %v7728_v12, %v7754_v27  ;;  %v7776_v12 = vpop.permute.xlu1 %838  ;;  %v1155_v27 = vrot.slane %v7744_v36, %v7139_v9 }
 0x1df   :  { %1112 = vbcast.lane.b32.xlu1 %v1098_v10, 280  ;;  %1108 = vbcast.lane.b32.xlu0 %v1098_v10, 272  ;;  %12188 = vst [vmem:[#allocation175_spill] sm:$0xff] %v7776_v12 }
 0x1e0   :  { %v3975_v10 = vrot.slane %v3967_v2, %v7245_v16  ;;  %v1174_v2 = vrot.slane %v7744_v36, %v7143_v11 }
 0x1e1   :  { %v7760_v30 = vpop.permute.xlu0 %842 }
 0x1e2   :  { %12184 = vst [vmem:[#allocation171_spill] sm:$0xff] %v7760_v30  ;;  %v7782_v7 = vpop.permute.xlu1 %846 }
 0x1e3   :  { %1123 = vbcast.lane.b32.xlu1 %v1117_v33, 264  ;;  %1119 = vbcast.lane.b32.xlu0 %v1117_v33, 256  ;;  %12190 = vst [vmem:[#allocation177_spill] sm:$0xff] %v7782_v7  ;;  %v1193_v7 = vrot.slane %v7744_v36, %v7147_v13 }
 0x1e5   :  { %v7766_v55 = vpop.permute.xlu0 %853 }
 0x1e6   :  { %12186 = vst [vmem:[#allocation173_spill] sm:$0xff] %v7766_v55  ;;  %v3983_v48 = vcombine.low %v7746_v25, %v7766_v55 }
 0x1e7   :  { %1131 = vbcast.lane.b32.xlu1 %v1117_v33, 280  ;;  %1127 = vbcast.lane.b32.xlu0 %v1117_v33, 272 }
 0x1e8   :  { %v3991_v30 = vrot.slane %v3983_v48, %v7245_v16 }
 0x1e9   :  { %v7774_v18 = vpop.permute.xlu0 %861 }
 0x1ea   :  { %12187 = vst [vmem:[#allocation174_spill] sm:$0xff] %v7774_v18  ;;  %v4032_v53 = vcombine.high %v3975_v10, %v3991_v30  ;;  %v7790_v18 = vpop.permute.xlu1 %857  ;;  %v4031_v13 = vcombine.low %v3975_v10, %v3991_v30 }
 0x1eb   :  { %1142 = vbcast.lane.b32.xlu1 %v1136_v5, 264  ;;  %1138 = vbcast.lane.b32.xlu0 %v1136_v5, 256  ;;  %12193 = vst [vmem:[#allocation180_spill] sm:$0xff] %v7790_v18  ;;  %v1212_v18 = vrot.slane %v7744_v36, %v7151_v15 }
 0x1ec   :  { %v7819_v55 = vrot.slane %v4031_v13, %v7272_v40  ;;  %v7825_v15 = vrot.slane %v4032_v53, %v7272_v40 }
 0x1ed   :  { %v7778_v21 = vpop.permute.xlu0 %872 }
 0x1ee   :  { %12189 = vst [vmem:[#allocation176_spill] sm:$0xff] %v7778_v21  ;;  %v7794_v9 = vpop.permute.xlu1 %865  ;;  %12201 = vst [vmem:[#allocation188_spill] sm:$0xff] %v7819_v55 }
 0x1ef   :  { %1150 = vbcast.lane.b32.xlu1 %v1136_v5, 280  ;;  %1146 = vbcast.lane.b32.xlu0 %v1136_v5, 272  ;;  %12195 = vst [vmem:[#allocation182_spill] sm:$0xff] %v7794_v9 }
 0x1f1   :  { %v7784_v33 = vpop.permute.xlu0 %880 }
 0x1f2   :  { %12191 = vst [vmem:[#allocation178_spill] sm:$0xff] %v7784_v33  ;;  %v7802_v11 = vpop.permute.xlu1 %876 }
 0x1f3   :  { %1161 = vbcast.lane.b32.xlu1 %v1155_v27, 264  ;;  %1157 = vbcast.lane.b32.xlu0 %v1155_v27, 256  ;;  %12198 = vst [vmem:[#allocation185_spill] sm:$0xff] %v7802_v11 }
 0x1f5   :  { %v7786_v48 = vpop.permute.xlu0 %891 }
 0x1f6   :  { %12192 = vst [vmem:[#allocation179_spill] sm:$0xff] %v7786_v48  ;;  %v7814_v11 = vpop.permute.xlu1 %884 }
 0x1f7   :  { %1169 = vbcast.lane.b32.xlu1 %v1155_v27, 280  ;;  %1165 = vbcast.lane.b32.xlu0 %v1155_v27, 272  ;;  %12199 = vst [vmem:[#allocation186_spill] sm:$0xff] %v7814_v11 }
 0x1f9   :  { %v7792_v12 = vpop.permute.xlu0 %899 }
 0x1fa   :  { %12194 = vst [vmem:[#allocation181_spill] sm:$0xff] %v7792_v12  ;;  %v7840_v53 = vpop.permute.xlu1 %895 }
 0x1fb   :  { %1180 = vbcast.lane.b32.xlu1 %v1174_v2, 264  ;;  %1176 = vbcast.lane.b32.xlu0 %v1174_v2, 256  ;;  %12203 = vst [vmem:[#allocation190_spill] sm:$0xff] %v7840_v53 }
 0x1fd   :  { %v7796_v5 = vpop.permute.xlu0 %910 }
 0x1fe   :  { %12196 = vst [vmem:[#allocation183_spill] sm:$0xff] %v7796_v5  ;;  %v3999_v27 = vcombine.low %v7778_v21, %v7796_v5 }
 0x1ff   :  { %1188 = vbcast.lane.b32.xlu1 %v1174_v2, 280  ;;  %1184 = vbcast.lane.b32.xlu0 %v1174_v2, 272 }
 0x200   :  { %v4007_v2 = vrot.slane %v3999_v27, %v7245_v16  ;;  %v7844_v27 = vpop.permute.xlu1 %903 }
 0x201   :  { %v7800_v33 = vpop.permute.xlu0 %918  ;;  %12205 = vst [vmem:[#allocation192_spill] sm:$0xff] %v7844_v27 }
 0x202   :  { %12197 = vst [vmem:[#allocation184_spill] sm:$0xff] %v7800_v33 }
 0x203   :  { %1199 = vbcast.lane.b32.xlu1 %v1193_v7, 264  ;;  %1195 = vbcast.lane.b32.xlu0 %v1193_v7, 256 }
 0x205   :  { %v7806_v12 = vpop.permute.xlu0 %929 }
 0x206   :  { %v4015_v9 = vcombine.low %v7786_v48, %v7806_v12 }
 0x207   :  { %1207 = vbcast.lane.b32.xlu1 %v1193_v7, 280  ;;  %1203 = vbcast.lane.b32.xlu0 %v1193_v7, 272  ;;  %v1231_v7 = vrot.slane %v7744_v36, %v7155_v17  ;;  %v1920_v17 = vcombine.high %v7383_v4, %v7386_v0 }
 0x208   :  { %v4023_v33 = vrot.slane %v4015_v9, %v7245_v16 }
 0x209   :  { %v7816_v25 = vpop.permute.xlu0 %937 }
 0x20a   :  { %12200 = vst [vmem:[#allocation187_spill] sm:$0xff] %v7816_v25  ;;  %v4063_v21 = vcombine.low %v4007_v2, %v4023_v33  ;;  %v4064_v5 = vcombine.high %v4007_v2, %v4023_v33  ;;  %v1376_v2 = vcombine.high %v7286_v62, %v7281_v60  ;;  %v3008_v33 = vcombine.high %v7607_v51, %v7610_v3 }
 0x20b   :  { %1218 = vbcast.lane.b32.xlu1 %v1212_v18, 264  ;;  %1214 = vbcast.lane.b32.xlu0 %v1212_v18, 256 }
 0x20c   :  { %v7822_v48 = vrot.slane %v4063_v21, %v7272_v40  ;;  %v7828_v30 = vrot.slane %v4064_v5, %v7272_v40 }
 0x20d   :  { %v7830_v10 = vpop.permute.xlu0 %948 }
 0x20e   :  { %12202 = vst [vmem:[#allocation189_spill] sm:$0xff] %v7822_v48  ;;  %v4096_v9 = vcombine.high %v7819_v55, %v7822_v48 }
 0x20f   :  { %1226 = vbcast.lane.b32.xlu1 %v1212_v18, 280  ;;  %1222 = vbcast.lane.b32.xlu0 %v1212_v18, 272  ;;  %v7855_v18 = vpop.permute.xlu1 %914 }
 0x210   :  { %12207 = vst [vmem:[#allocation194_spill] sm:$0xff] %v7855_v18 }
 0x211   :  { %v7842_v5 = vpop.permute.xlu0 %956 }
 0x212   :  { %12204 = vst [vmem:[#allocation191_spill] sm:$0xff] %v7842_v5 }
 0x213   :  { %1237 = vbcast.lane.b32.xlu1 %v1231_v7, 264  ;;  %1233 = vbcast.lane.b32.xlu0 %v1231_v7, 256 }
 0x215   :  { %v7846_v13 = vpop.permute.xlu0 %967 }
 0x217   :  { %1245 = vbcast.lane.b32.xlu1 %v1231_v7, 280  ;;  %1241 = vbcast.lane.b32.xlu0 %v1231_v7, 272  ;;  %v2464_v7 = vcombine.high %v7512_v42, %v7507_v32 }
 0x219   :  { %v7850_v36 = vpop.permute.xlu0 %975 }
 0x21a   :  { %12206 = vst [vmem:[#allocation193_spill] sm:$0xff] %v7850_v36 }
 0x21b   :  { %5609 = vrot.lane.b32.xlu1 %v1920_v17, %s7067_s0  ;;  %5607 = vrot.lane.b32.xlu0 %v1376_v2, %s7067_s0  ;;  %v7868_v17 = vpop.permute.xlu1 %922  ;;  %v3552_v2 = vcombine.high %v7736_v45, %v7731_v35 }
 0x21c   :  { %12208 = vst [vmem:[#allocation195_spill] sm:$0xff] %v7868_v17 }
 0x21d   :  { %v7860_v21 = vpop.permute.xlu0 %986 }
 0x21e   :  { %v4511_v62 = vcombine.low %v7830_v10, %v7860_v21 }
 0x21f   :  { %5613 = vrot.lane.b32.xlu1 %v3008_v33, %s7067_s0  ;;  %5611 = vrot.lane.b32.xlu0 %v2464_v7, %s7067_s0  ;;  %v7878_v51 = vpop.permute.xlu1 %933 }
 0x220   :  { %12210 = vst [vmem:[#allocation197_spill] sm:$0xff] %v7878_v51  ;;  %v12272_v51 = vld [vmem:[#allocation89_spill] sm:$0xff] }
 0x221   :  { %v7870_v0 = vpop.permute.xlu0 %994 }
 0x222   :  { %12209 = vst [vmem:[#allocation196_spill] sm:$0xff] %v7870_v0 }
 0x223   :  { %5617 = vrot.lane.b32.xlu1 %v4096_v9, %s7067_s0  ;;  %5615 = vrot.lane.b32.xlu0 %v3552_v2, %s7067_s0  ;;  %v7882_v7 = vpop.permute.xlu1 %941 }
 0x224   :  { %12212 = vst [vmem:[#allocation199_spill] sm:$0xff] %v7882_v7 }
 0x225   :  { %v7876_v3 = vpop.permute.xlu0 %1005 }
 0x226   :  { %v4527_v42 = vcombine.low %v7846_v13, %v7876_v3 }
 0x227   :  { %v7888_v4 = vpop.permute.xlu1 %952 }
 0x228   :  { %12214 = vst [vmem:[#allocation201_spill] sm:$0xff] %v7888_v4  ;;  %v4535_v27 = vrot.slane %v4527_v42, %v7245_v16  ;;  %v1344_v42 = vcombine.high %v7260_v24, %v7257_v23 }
 0x229   :  { %v7880_v33 = vpop.permute.xlu0 %1013 }
 0x22a   :  { %12211 = vst [vmem:[#allocation198_spill] sm:$0xff] %v7880_v33  ;;  %v1358_v24 = vrot.slane %v1344_v42, %v7272_v40 }
 0x22b   :  { %v7892_v35 = vpop.permute.xlu1 %960 }
 0x22c   :  { %12215 = vst [vmem:[#allocation202_spill] sm:$0xff] %v7892_v35  ;;  %v4519_v35 = vrot.slane %v4511_v62, %v7245_v16 }
 0x22d   :  { %v7884_v48 = vpop.permute.xlu0 %1024 }
 0x22e   :  { %v4575_v5 = vcombine.low %v4519_v35, %v4535_v27 }
 0x22f   :  { %v7898_v45 = vpop.permute.xlu1 %971 }
 0x230   :  { %v7927_v62 = vrot.slane %v4575_v5, %v7272_v40 }
 0x231   :  { %v7886_v55 = vpop.permute.xlu0 %1032 }
 0x232   :  { %12213 = vst [vmem:[#allocation200_spill] sm:$0xff] %v7886_v55  ;;  %12220 = vst [vmem:[#allocation207_spill] sm:$0xff] %v7927_v62 }
 0x233   :  { %v7909_v11 = vpop.permute.xlu1 %979 }
 0x234   :  { %12218 = vst [vmem:[#allocation205_spill] sm:$0xff] %v7909_v11  ;;  %v1312_v11 = vcombine.high %v7267_v29, %v7254_v22 }
 0x235   :  { %v7890_v32 = vpop.permute.xlu0 %1043 }
 0x236   :  { %v1326_v22 = vrot.slane %v1312_v11, %v7272_v40 }
 0x237   :  { %v7922_v33 = vpop.permute.xlu1 %990 }
 0x239   :  { %v7894_v9 = vpop.permute.xlu0 %1051 }
 0x23a   :  { %12216 = vst [vmem:[#allocation203_spill] sm:$0xff] %v7894_v9 }
 0x23b   :  { %v7943_v29 = vpop.permute.xlu1 %998 }
 0x23c   :  { %12222 = vst [vmem:[#allocation209_spill] sm:$0xff] %v7943_v29 }
 0x23d   :  { %v7896_v2 = vpop.permute.xlu0 %1062 }
 0x23e   :  { %v4543_v7 = vcombine.low %v7884_v48, %v7896_v2 }
 0x240   :  { %v4551_v0 = vrot.slane %v4543_v7, %v7245_v16 }
 0x241   :  { %v7902_v60 = vpop.permute.xlu0 %1070 }
 0x242   :  { %12217 = vst [vmem:[#allocation204_spill] sm:$0xff] %v7902_v60 }
 0x245   :  { %v7911_v17 = vpop.permute.xlu0 %1081 }
 0x246   :  { %v4559_v25 = vcombine.low %v7890_v32, %v7911_v17 }
 0x248   :  { %v4567_v55 = vrot.slane %v4559_v25, %v7245_v16  ;;  %v2432_v25 = vcombine.high %v7486_v57, %v7489_v20  ;;  %v1377_v20 = vcombine.low %v1326_v22, %v1358_v24 }
 0x249   :  { %v7918_v60 = vpop.permute.xlu0 %1089 }
 0x24a   :  { %12219 = vst [vmem:[#allocation206_spill] sm:$0xff] %v7918_v60  ;;  %v4607_v36 = vcombine.low %v4551_v0, %v4567_v55  ;;  %v2400_v60 = vcombine.high %v7494_v47, %v7483_v63  ;;  %v2446_v57 = vrot.slane %v2432_v25, %v7272_v40  ;;  %v3488_v47 = vcombine.high %v7718_v38, %v7707_v1 }
 0x24b   :  { %v4576_v25 = vcombine.high %v4519_v35, %v4535_v27  ;;  %v1296_v35 = vcombine.high %v7218_v54, %v7242_v14  ;;  %v2384_v54 = vcombine.high %v7450_v46, %v7476_v41  ;;  %v2336_v41 = vcombine.high %v7380_v61, %v7420_v26  ;;  %v12229_v61 = vld [vmem:[#allocation155_spill] sm:$0xff] }
 0x24c   :  { %v7930_v9 = vrot.slane %v4607_v36, %v7272_v40  ;;  %v3520_v36 = vcombine.high %v7712_v43, %v7715_v31  ;;  %v2414_v63 = vrot.slane %v2400_v60, %v7272_v40  ;;  %v7959_v43 = vpop.permute.xlu1 %1009  ;;  %v3502_v42 = vrot.slane %v3488_v47, %v7272_v40 }
 0x24d   :  { %v7932_v7 = vpop.permute.xlu0 %1100  ;;  %v4590_v60 = vrot.slane %v4576_v25, %v7272_v40  ;;  %v1280_v47 = vcombine.high %v7208_v49, %v7228_v59  ;;  %v1248_v25 = vcombine.high %v7167_v28, %v7188_v39  ;;  %v2352_v59 = vcombine.high %v7410_v6, %v7430_v52 }
 0x24e   :  { %12221 = vst [vmem:[#allocation208_spill] sm:$0xff] %v7930_v9  ;;  %v4640_v23 = vcombine.high %v7927_v62, %v7930_v9  ;;  %v2465_v29 = vcombine.low %v2414_v63, %v2446_v57  ;;  %v3534_v31 = vrot.slane %v3520_v36, %v7272_v40  ;;  %v2368_v28 = vcombine.high %v7440_v37, %v7460_v8 }
 0x24f   :  { %v7997_v49 = vrot.slane %v1280_v47, %v7245_v16  ;;  %v8005_v39 = vrot.slane %v1248_v25, %v7245_v16  ;;  %v3472_v37 = vcombine.high %v7676_v58, %v7700_v19  ;;  %v3440_v26 = vcombine.high %v7636_v56, %v7656_v50 }
 0x250   :  { %5619 = vrot.lane.b32.xlu0 %v4640_v23, %s7067_s0  ;;  %v4608_v23 = vcombine.high %v4551_v0, %v4567_v55  ;;  %v3553_v38 = vcombine.low %v3502_v42, %v3534_v31  ;;  %v7968_v0 = vpop.permute.xlu1 %1017  ;;  %v3554_v8 = vcombine.high %v3502_v42, %v3534_v31  ;;  %v8034_v58 = vrot.slane %v2336_v41, %v7245_v16 }
 0x251   :  { %v7945_v5 = vpop.permute.xlu0 %1108  ;;  %12225 = vst [vmem:[#allocation212_spill] sm:$0xff] %v7968_v0  ;;  %v8044_v50 = vrot.slane %v3472_v37, %v7245_v16  ;;  %v4560_v56 = vcombine.high %v7890_v32, %v7911_v17  ;;  %v4528_v41 = vcombine.high %v7846_v13, %v7876_v3  ;;  %v4544_v32 = vcombine.high %v7884_v48, %v7896_v2 }
 0x252   :  { %12223 = vst [vmem:[#allocation210_spill] sm:$0xff] %v7945_v5  ;;  %v4622_v1 = vrot.slane %v4608_v23, %v7272_v40 }
 0x253   :  { %v8075_v3 = vrot.slane %v4560_v56, %v7245_v16  ;;  %v8080_v13 = vrot.slane %v4528_v41, %v7245_v16  ;;  %v8083_v2 = vrot.slane %v4544_v32, %v7245_v16 }
 0x254   :  { %5639 = vrot.lane.b32.xlu0 %v1377_v20, %s7068_s20  ;;  %v4641_v36 = vcombine.low %v4590_v60, %v4622_v1  ;;  %v1264_v20 = vcombine.high %v7178_v34, %v7198_v44  ;;  %v7981_v23 = vpop.permute.xlu1 %1028  ;;  %v2466_v34 = vcombine.high %v2414_v63, %v2446_v57  ;;  %v8023_v57 = vrot.slane %v2352_v59, %v7245_v16 }
 0x255   :  { %v7956_v11 = vpop.permute.xlu0 %1119  ;;  %v8026_v63 = vrot.slane %v2368_v28, %v7245_v16  ;;  %v4642_v25 = vcombine.high %v4590_v60, %v4622_v1  ;;  %v8054_v28 = vrot.slane %v3440_v26, %v7245_v16 }
 0x256   :  { %v7994_v44 = vrot.slane %v1264_v20, %v7245_v16  ;;  %v12232_v20 = vld [vmem:[#allocation134_spill] sm:$0xff] }
 0x258   :  { %5643 = vrot.lane.b32.xlu0 %v2465_v29, %s7068_s20  ;;  %v1378_v29 = vcombine.high %v1326_v22, %v1358_v24  ;;  %v8012_v24 = vrot.slane %v2384_v54, %v7245_v16  ;;  %v8014_v22 = vpop.permute.xlu1 %1036  ;;  %v1327_v6 = vcombine.low %v8005_v39, %v7994_v44  ;;  %v2415_v54 = vcombine.low %v8034_v58, %v8023_v57 }
 0x259   :  { %v7963_v9 = vpop.permute.xlu0 %1127  ;;  %12227 = vst [vmem:[#allocation214_spill] sm:$0xff] %v8014_v22  ;;  %v1328_v5 = vcombine.high %v8005_v39, %v7994_v44 }
 0x25a   :  { %12224 = vst [vmem:[#allocation211_spill] sm:$0xff] %v7963_v9  ;;  %v2447_v19 = vcombine.low %v8026_v63, %v8012_v24  ;;  %v1335_v59 = vrot.slane %v1327_v6, %v7272_v40  ;;  %v4512_v6 = vcombine.high %v7830_v10, %v7860_v21  ;;  %v2423_v26 = vrot.slane %v2415_v54, %v7272_v40  ;;  %v12262_v9 = vld [vmem:[#allocation40_spill] sm:$0xff] }
 0x25b   :  { %v4623_v21 = vcombine.low %v8083_v2, %v8075_v3  ;;  %v8163_v44 = vrot.slane %v1328_v5, %v7272_v40 }
 0x25c   :  { %5647 = vrot.lane.b32.xlu0 %v3553_v38, %s7068_s20  ;;  %v7987_v38 = vrot.slane %v1296_v35, %v7245_v16  ;;  %v2455_v60 = vrot.slane %v2447_v19, %v7272_v40  ;;  %v8092_v10 = vrot.slane %v4512_v6, %v7245_v16 }
 0x25d   :  { %v7970_v55 = vpop.permute.xlu0 %1138 }
 0x25e   :  { %v1359_v46 = vcombine.low %v7997_v49, %v7987_v38  ;;  %v2468_v22 = vcombine.high %v2423_v26, %v2455_v60 }
 0x260   :  { %5651 = vrot.lane.b32.xlu0 %v4641_v36, %s7068_s20  ;;  %v12230_v36 = vld [vmem:[#allocation148_spill] sm:$0xff]  ;;  %v1367_v31 = vrot.slane %v1359_v46, %v7272_v40 }
 0x261   :  { %v7975_v27 = vpop.permute.xlu0 %1146  ;;  %v3456_v35 = vcombine.high %v12230_v36, %v12229_v61 }
 0x262   :  { %12226 = vst [vmem:[#allocation213_spill] sm:$0xff] %v7975_v27  ;;  %v1379_v1 = vcombine.low %v1335_v59, %v1367_v31 }
 0x263   :  { %v8057_v46 = vrot.slane %v3456_v35, %v7245_v16  ;;  %v2467_v35 = vcombine.low %v2423_v26, %v2455_v60 }
 0x264   :  { %5671 = vrot.lane.b32.xlu0 %v1378_v29, %s7069_s21  ;;  %v12231_v29 = vld [vmem:[#allocation141_spill] sm:$0xff] }
 0x265   :  { %v7991_v14 = vpop.permute.xlu0 %1157  ;;  %v3424_v47 = vcombine.high %v12232_v20, %v12231_v29  ;;  %v4591_v29 = vcombine.low %v8092_v10, %v8080_v13  ;;  %v3536_v39 = vcombine.high %v8057_v46, %v8044_v50 }
 0x267   :  { %v8068_v37 = vrot.slane %v3424_v47, %v7245_v16  ;;  %v4599_v41 = vrot.slane %v4591_v29, %v7272_v40 }
 0x268   :  { %5675 = vrot.lane.b32.xlu0 %v2466_v34, %s7069_s21  ;;  %v8050_v34 = vpop.permute.xlu1 %1047 }
 0x269   :  { %v8016_v52 = vpop.permute.xlu0 %1165  ;;  %12233 = vst [vmem:[#allocation155_spill] sm:$0xff] %v8050_v34  ;;  %v3503_v48 = vcombine.low %v8068_v37, %v8054_v28  ;;  %v3504_v5 = vcombine.high %v8068_v37, %v8054_v28  ;;  %v12247_v37 = vld [vmem:[#allocation14_spill] sm:$0xff] }
 0x26a   :  { %12228 = vst [vmem:[#allocation215_spill] sm:$0xff] %v8016_v52 }
 0x26b   :  { %v3511_v20 = vrot.slane %v3503_v48, %v7272_v40 }
 0x26c   :  { %5679 = vrot.lane.b32.xlu0 %v3554_v8, %s7069_s21  ;;  %v3535_v8 = vcombine.low %v8057_v46, %v8044_v50  ;;  %v8087_v61 = vpop.permute.xlu1 %1055  ;;  %v12244_v50 = vld [vmem:[#allocation70_spill] sm:$0xff]  ;;  %v12245_v46 = vld [vmem:[#allocation71_spill] sm:$0xff] }
 0x26d   :  { %v8038_v42 = vpop.permute.xlu0 %1176  ;;  %12235 = vst [vmem:[#allocation141_spill] sm:$0xff] %v8087_v61 }
 0x26e   :  { %v3543_v19 = vrot.slane %v3535_v8, %v7272_v40  ;;  %v5071_v8 = vcombine.low %v7956_v11, %v7991_v14 }
 0x270   :  { %5683 = vrot.lane.b32.xlu0 %v4642_v25, %s7069_s21  ;;  %v3555_v56 = vcombine.low %v3511_v20, %v3543_v19  ;;  %v4631_v25 = vrot.slane %v4623_v21, %v7272_v40  ;;  %v8104_v54 = vpop.permute.xlu1 %1066  ;;  %v5055_v21 = vcombine.low %v7932_v7, %v7970_v55  ;;  %v3556_v0 = vcombine.high %v3511_v20, %v3543_v19 }
 0x271   :  { %v8064_v17 = vpop.permute.xlu0 %1184  ;;  %v12246_v20 = vcombine.low %v12244_v50, %v12245_v46 }
 0x272   :  { %12234 = vst [vmem:[#allocation148_spill] sm:$0xff] %v8064_v17 }
 0x274   :  { %5703 = vrot.lane.b32.xlu0 %v1379_v1, %s7064_s17  ;;  %v4643_v1 = vcombine.low %v4599_v41, %v4631_v25  ;;  %v8113_v6 = vpop.permute.xlu1 %1074 }
 0x275   :  { %v8089_v36 = vpop.permute.xlu0 %1195  ;;  %12237 = vst [vmem:[#allocation216_spill] sm:$0xff] %v8113_v6 }
 0x278   :  { %5707 = vrot.lane.b32.xlu0 %v2467_v35, %s7064_s17  ;;  %v1380_v35 = vcombine.high %v1335_v59, %v1367_v31  ;;  %v8132_v6 = vpop.permute.xlu1 %1085 }
 0x279   :  { %v8101_v47 = vpop.permute.xlu0 %1203  ;;  %12239 = vst [vmem:[#allocation218_spill] sm:$0xff] %v8132_v6 }
 0x27a   :  { %12236 = vst [vmem:[#allocation134_spill] sm:$0xff] %v8101_v47 }
 0x27c   :  { %5711 = vrot.lane.b32.xlu0 %v3555_v56, %s7064_s17  ;;  %v8120_v56 = vrot.slane %v5071_v8, %v7245_v16 }
 0x27d   :  { %v8108_v32 = vpop.permute.xlu0 %1214 }
 0x27e   :  { %v5087_v29 = vcombine.low %v8038_v42, %v8108_v32 }
 0x280   :  { %5715 = vrot.lane.b32.xlu0 %v4643_v1, %s7064_s17  ;;  %v8128_v1 = vrot.slane %v5055_v21, %v7245_v16  ;;  %v5095_v59 = vrot.slane %v5087_v29, %v7245_v16  ;;  %v8150_v29 = vpop.permute.xlu1 %1093 }
 0x281   :  { %v8115_v48 = vpop.permute.xlu0 %1222  ;;  %12242 = vst [vmem:[#allocation221_spill] sm:$0xff] %v8150_v29  ;;  %v12257_v29 = vld [vmem:[#allocation133_spill] sm:$0xff] }
 0x282   :  { %12238 = vst [vmem:[#allocation217_spill] sm:$0xff] %v8115_v48  ;;  %v5119_v31 = vcombine.low %v8128_v1, %v8120_v56  ;;  %v12261_v48 = vld [vmem:[#allocation48_spill] sm:$0xff] }
 0x284   :  { %5735 = vrot.lane.b32.xlu0 %v1380_v35, %s7070_s22  ;;  %v1360_v35 = vcombine.high %v7997_v49, %v7987_v38  ;;  %v8145_v60 = vrot.slane %v5119_v31, %v7272_v40  ;;  %v8173_v19 = vpop.permute.xlu1 %1104  ;;  %v8192_v31 = vrot.slane %v3536_v39, %v7272_v40  ;;  %v12253_v39 = vld [vmem:[#allocation29_spill] sm:$0xff] }
 0x285   :  { %v8125_v62 = vpop.permute.xlu0 %1233  ;;  %12243 = vst [vmem:[#allocation222_spill] sm:$0xff] %v8173_v19  ;;  %v12270_v19 = vld [vmem:[#allocation80_spill] sm:$0xff] }
 0x286   :  { %v5103_v61 = vcombine.low %v8089_v36, %v8125_v62  ;;  %12240 = vst [vmem:[#allocation219_spill] sm:$0xff] %v8145_v60  ;;  %v8157_v49 = vrot.slane %v1360_v35, %v7272_v40  ;;  %v12248_v35 = vld [vmem:[#allocation10_spill] sm:$0xff] }
 0x288   :  { %v5111_v8 = vrot.slane %v5103_v61, %v7245_v16  ;;  %5739 = vrot.lane.b32.xlu0 %v2468_v22, %s7070_s22  ;;  %v2448_v22 = vcombine.high %v8026_v63, %v8012_v24  ;;  %v4644_v61 = vcombine.high %v4599_v41, %v4631_v25  ;;  %v1381_v24 = vcombine.low %v8163_v44, %v8157_v49 }
 0x289   :  { %v4624_v25 = vcombine.high %v8083_v2, %v8075_v3  ;;  %v8202_v3 = vrot.slane %v3504_v5, %v7272_v40  ;;  %v12251_v2 = vld [vmem:[#allocation26_spill] sm:$0xff] }
 0x28a   :  { %v5151_v21 = vcombine.low %v5095_v59, %v5111_v8  ;;  %v8171_v63 = vrot.slane %v2448_v22, %v7272_v40  ;;  %v5152_v28 = vcombine.high %v5095_v59, %v5111_v8  ;;  %v12249_v22 = vld [vmem:[#allocation17_spill] sm:$0xff]  ;;  %v8208_v8 = vpop.permute.xlu1 %1112 }
 0x28b   :  { %12255 = vst [vmem:[#allocation70_spill] sm:$0xff] %v8208_v8  ;;  %v3557_v27 = vcombine.low %v8202_v3, %v8192_v31  ;;  %v8221_v17 = vrot.slane %v4624_v25, %v7272_v40  ;;  %v1808_v8 = vcombine.high %v12262_v9, %v12261_v48  ;;  %v12265_v48 = vld [vmem:[#allocation44_spill] sm:$0xff] }
 0x28c   :  { %5743 = vrot.lane.b32.xlu0 %v3556_v0, %s7070_s22  ;;  %v8148_v26 = vrot.slane %v5151_v21, %v7272_v40  ;;  %v2416_v0 = vcombine.high %v8034_v58, %v8023_v57  ;;  %v1383_v21 = vcombine.low %v12248_v35, %v12247_v37  ;;  %v12254_v57 = vld [vmem:[#allocation23_spill] sm:$0xff]  ;;  %v8226_v52 = vrot.slane %v5152_v28, %v7272_v40  ;;  %v12266_v28 = vld [vmem:[#allocation34_spill] sm:$0xff] }
 0x28d   :  { %v1431_v59 = vcombine.low %v12254_v57, %v12253_v39  ;;  %v12275_v35 = vld [vmem:[#allocation86_spill] sm:$0xff] }
 0x28e   :  { %12241 = vst [vmem:[#allocation220_spill] sm:$0xff] %v8148_v26  ;;  %v5184_v38 = vcombine.high %v8145_v60, %v8148_v26  ;;  %v8181_v58 = vrot.slane %v2416_v0, %v7272_v40  ;;  %v4592_v0 = vcombine.high %v8092_v10, %v8080_v13  ;;  %v5120_v26 = vcombine.high %v8128_v1, %v8120_v56  ;;  %v12256_v60 = vld [vmem:[#allocation132_spill] sm:$0xff] }
 0x28f   :  { %v12258_v13 = vcombine.low %v12256_v60, %v12257_v29  ;;  %v12259_v10 = vld [vmem:[#allocation64_spill] sm:$0xff]  ;;  %v8229_v56 = vrot.slane %v1383_v21, %v7245_v16  ;;  %v8244_v9 = vrot.slane %v1431_v59, %v7245_v16  ;;  %v1792_v21 = vcombine.high %v12266_v28, %v12265_v48  ;;  %v12271_v59 = vld [vmem:[#allocation74_spill] sm:$0xff] }
 0x290   :  { %5747 = vrot.lane.b32.xlu0 %v4644_v61, %s7070_s22  ;;  %5621 = vrot.lane.b32.xlu1 %v5184_v38, %s7067_s0  ;;  %v2469_v41 = vcombine.low %v8181_v58, %v8171_v63  ;;  %v12250_v61 = vld [vmem:[#allocation11_spill] sm:$0xff]  ;;  %v8238_v25 = vrot.slane %v4592_v0, %v7272_v40  ;;  %v12268_v0 = vld [vmem:[#allocation77_spill] sm:$0xff]  ;;  %v2487_v53 = vcombine.low %v12271_v59, %v12270_v19  ;;  %v12281_v19 = vld [vmem:[#allocation118_spill] sm:$0xff]  ;;  %s7095_s0 = smov 60  }
 0x291   :  { %v1399_v38 = vcombine.low %v12250_v61, %v12249_v22  ;;  %v8265_v28 = vrot.slane %v1808_v8, %v7245_v16  ;;  %v12293_v61 = vld [vmem:[#allocation147_spill] sm:$0xff] }
 0x292   :  { %v4645_v48 = vcombine.low %v8238_v25, %v8221_v17 }
 0x293   :  { %v8232_v1 = vrot.slane %v1399_v38, %v7245_v16  ;;  %v12267_v38 = vcombine.low %v7825_v15, %v7828_v30 }
 0x294   :  { %5767 = vrot.lane.b32.xlu0 %v1381_v24, %s7071_s23  ;;  %5641 = vrot.lane.b32.xlu1 %v12246_v20, %s7068_s20  ;;  %v12252_v24 = vld [vmem:[#allocation20_spill] sm:$0xff] }
 0x295   :  { %v1415_v20 = vcombine.low %v12252_v24, %v12251_v2  ;;  %v1447_v8 = vcombine.low %v8229_v56, %v8232_v1 }
 0x297   :  { %v8241_v47 = vrot.slane %v1415_v20, %v7245_v16  ;;  %v12269_v20 = vld [vmem:[#allocation67_spill] sm:$0xff] }
 0x298   :  { %5771 = vrot.lane.b32.xlu0 %v2469_v41, %s7071_s23  ;;  %5645 = vrot.lane.b32.xlu1 %v12258_v13, %s7068_s20  ;;  %v12260_v41 = vld [vmem:[#allocation56_spill] sm:$0xff] }
 0x299   :  { %v1840_v5 = vcombine.high %v12260_v41, %v12259_v10  ;;  %v12263_v13 = vld [vmem:[#allocation60_spill] sm:$0xff]  ;;  %v1479_v59 = vcombine.low %v8241_v47, %v8244_v9 }
 0x29a   :  { %v12264_v10 = vld [vmem:[#allocation52_spill] sm:$0xff] }
 0x29b   :  { %v1824_v41 = vcombine.high %v12264_v10, %v12263_v13  ;;  %v8253_v13 = vrot.slane %v5120_v26, %v7272_v40  ;;  %v2471_v10 = vcombine.low %v12269_v20, %v12268_v0  ;;  %v12274_v26 = vld [vmem:[#allocation92_spill] sm:$0xff] }
 0x29c   :  { %5775 = vrot.lane.b32.xlu0 %v3557_v27, %s7071_s23  ;;  %5649 = vrot.lane.b32.xlu1 %v12267_v38, %s7068_s20  ;;  %v8256_v27 = vrot.slane %v1840_v5, %v7245_v16  ;;  %v12273_v38 = vld [vmem:[#allocation83_spill] sm:$0xff]  ;;  %v2519_v37 = vcombine.low %v12275_v35, %v12274_v26  ;;  %v8271_v5 = vpop.permute.xlu1 %1123 }
 0x29d   :  { %v2503_v18 = vcombine.low %v12273_v38, %v12272_v51  ;;  %12276 = vst [vmem:[#allocation71_spill] sm:$0xff] %v8271_v5  ;;  %v5185_v20 = vcombine.low %v8253_v13, %v8226_v52  ;;  %v8276_v0 = vrot.slane %v1824_v41, %v7245_v16  ;;  %v8284_v38 = vrot.slane %v1792_v21, %v7245_v16  ;;  %v12280_v51 = vld [vmem:[#allocation126_spill] sm:$0xff] }
 0x29e   :  { %v8290_v35 = vrot.slane %v2471_v10, %v7245_v16  ;;  %v8293_v41 = vrot.slane %v2487_v53, %v7245_v16  ;;  %v2928_v57 = vcombine.high %v12281_v19, %v12280_v51  ;;  %v12282_v53 = vld [vmem:[#allocation122_spill] sm:$0xff]  ;;  %v2470_v51 = vcombine.high %v8181_v58, %v8171_v63  ;;  %v12289_v63 = vld [vmem:[#allocation129_spill] sm:$0xff] }
 0x29f   :  { %v1903_v5 = vcombine.low %v8276_v0, %v8256_v27  ;;  %v1871_v26 = vcombine.low %v8284_v38, %v8265_v28  ;;  %v8300_v21 = vrot.slane %v2503_v18, %v7245_v16  ;;  %v12283_v10 = vld [vmem:[#allocation114_spill] sm:$0xff]  ;;  %v8317_v18 = vrot.slane %v1447_v8, %v7272_v40 }
 0x2a0   :  { %5779 = vrot.lane.b32.xlu0 %v4645_v48, %s7071_s23  ;;  %5653 = vrot.lane.b32.xlu1 %v5185_v20, %s7068_s20  ;;  %12277 = vst [vmem:[#allocation132_spill] sm:$0xff] %v8290_v35  ;;  %v1382_v48 = vcombine.high %v8163_v44, %v8157_v49  ;;  %v8303_v20 = vrot.slane %v2519_v37, %v7245_v16  ;;  %v8310_v24 = vpop.permute.xlu1 %1131  ;;  %s7096_s20 = smov 62  }
 0x2a1   :  { %12278 = vst [vmem:[#allocation133_spill] sm:$0xff] %v8300_v21  ;;  %v2912_v39 = vcombine.high %v12283_v10, %v12282_v53  ;;  %12284 = vst [vmem:[#allocation56_spill] sm:$0xff] %v8310_v24  ;;  %v12285_v49 = vcombine.high %v12244_v50, %v12245_v46  ;;  %v2535_v44 = vcombine.low %v8290_v35, %v8293_v41  ;;  %v12286_v50 = vld [vmem:[#allocation110_spill] sm:$0xff]  ;;  %v12291_v24 = vld [vmem:[#allocation137_spill] sm:$0xff] }
 0x2a2   :  { %12279 = vst [vmem:[#allocation64_spill] sm:$0xff] %v8303_v20  ;;  %v8324_v19 = vrot.slane %v1479_v59, %v7272_v40  ;;  %v8327_v37 = vrot.slane %v1903_v5, %v7272_v40  ;;  %v12287_v46 = vld [vmem:[#allocation102_spill] sm:$0xff]  ;;  %v8334_v8 = vrot.slane %v2928_v57, %v7245_v16  ;;  %v8337_v10 = vrot.slane %v1871_v26, %v7272_v40  ;;  %v12290_v59 = vld [vmem:[#allocation144_spill] sm:$0xff] }
 0x2a3   :  { %v2896_v53 = vcombine.high %v12287_v46, %v12286_v50  ;;  %v3575_v2 = vcombine.low %v12291_v24, %v12290_v59  ;;  %v12292_v5 = vld [vmem:[#allocation154_spill] sm:$0xff]  ;;  %v12297_v57 = vld [vmem:[#allocation96_spill] sm:$0xff]  ;;  %v8351_v26 = vrot.slane %v2912_v39, %v7245_v16  ;;  %v3558_v24 = vcombine.high %v8202_v3, %v8192_v31 }
 0x2a4   :  { %5799 = vrot.lane.b32.xlu0 %v1382_v48, %s7072_s24  ;;  %5673 = vrot.lane.b32.xlu1 %v12285_v49, %s7069_s21  ;;  %v2567_v48 = vcombine.low %v8300_v21, %v8303_v20  ;;  %v12288_v49 = vld [vmem:[#allocation140_spill] sm:$0xff]  ;;  %v3591_v22 = vcombine.low %v12293_v61, %v12292_v5  ;;  %v12294_v35 = vld [vmem:[#allocation158_spill] sm:$0xff]  ;;  %v12295_v21 = vld [vmem:[#allocation151_spill] sm:$0xff]  ;;  %v1511_v61 = vcombine.low %v8317_v18, %v8324_v19 }
 0x2a5   :  { %v3559_v58 = vcombine.low %v12289_v63, %v12288_v49  ;;  %v3607_v20 = vcombine.low %v12295_v21, %v12294_v35  ;;  %v12296_v50 = vld [vmem:[#allocation106_spill] sm:$0xff]  ;;  %v12298_v63 = vcombine.high %v12256_v60, %v12257_v29  ;;  %v8364_v21 = vrot.slane %v2535_v44, %v7272_v40  ;;  %v12299_v60 = vld [vmem:[#allocation179_spill] sm:$0xff]  ;;  %v8390_v35 = vpop.permute.xlu0 %1241  ;;  %v12305_v5 = vld [vmem:[#allocation176_spill] sm:$0xff] }
 0x2a6   :  { %v2880_v46 = vcombine.high %v12297_v57, %v12296_v50  ;;  %v8367_v39 = vrot.slane %v2896_v53, %v7245_v16  ;;  %v2991_v50 = vcombine.low %v8351_v26, %v8334_v8  ;;  %v4016_v29 = vcombine.high %v12299_v60, %v7806_v12  ;;  %12301 = vst [vmem:[#allocation40_spill] sm:$0xff] %v8390_v35  ;;  %v12303_v60 = vld [vmem:[#allocation166_spill] sm:$0xff] }
 0x2a7   :  { %v8376_v31 = vrot.slane %v2567_v48, %v7272_v40  ;;  %v8379_v3 = vrot.slane %v3559_v58, %v7245_v16  ;;  %v8382_v44 = vrot.slane %v3575_v2, %v7245_v16  ;;  %v8385_v53 = vrot.slane %v3591_v22, %v7245_v16  ;;  %v12302_v48 = vld [vmem:[#allocation173_spill] sm:$0xff] }
 0x2a8   :  { %5803 = vrot.lane.b32.xlu0 %v2470_v51, %s7072_s24  ;;  %5677 = vrot.lane.b32.xlu1 %v12298_v63, %s7069_s21  ;;  %v1923_v51 = vcombine.low %v8337_v10, %v8327_v37  ;;  %v8373_v63 = vpop.permute.xlu1 %1142  ;;  %v8388_v57 = vrot.slane %v3607_v20, %v7245_v16  ;;  %v8394_v12 = vrot.slane %v2880_v46, %v7245_v16 }
 0x2a9   :  { %12300 = vst [vmem:[#allocation48_spill] sm:$0xff] %v8373_v63  ;;  %v3984_v58 = vcombine.high %v12303_v60, %v12302_v48  ;;  %v12304_v63 = vld [vmem:[#allocation183_spill] sm:$0xff]  ;;  %v4647_v22 = vcombine.low %v7888_v4, %v7922_v33  ;;  %v12306_v20 = vcombine.high %v7825_v15, %v7828_v30  ;;  %v4679_v46 = vcombine.low %v7981_v23, %v8104_v54  ;;  %v12308_v60 = vld [vmem:[#allocation161_spill] sm:$0xff] }
 0x2aa   :  { %v4000_v2 = vcombine.high %v12305_v5, %v12304_v63  ;;  %v4695_v48 = vcombine.low %v8050_v34, %v8132_v6  ;;  %v4646_v5 = vcombine.high %v8238_v25, %v8221_v17  ;;  %v12307_v63 = vld [vmem:[#allocation169_spill] sm:$0xff]  ;;  %v8417_v4 = vrot.slane %v4016_v29, %v7245_v16 }
 0x2ab   :  { %v3968_v35 = vcombine.high %v12308_v60, %v12307_v63  ;;  %v5104_v15 = vcombine.high %v8089_v36, %v8125_v62  ;;  %v5186_v30 = vcombine.high %v8253_v13, %v8226_v52  ;;  %v3623_v34 = vcombine.low %v8379_v3, %v8382_v44  ;;  %v8458_v63 = vpop.permute.xlu0 %5607 }
 0x2ac   :  { %5807 = vrot.lane.b32.xlu0 %v3558_v24, %s7072_s24  ;;  %5681 = vrot.lane.b32.xlu1 %v12306_v20, %s7069_s21  ;;  %v4663_v24 = vcombine.low %v7898_v45, %v7959_v43  ;;  %v2959_v20 = vcombine.low %v8394_v12, %v8367_v39  ;;  %v3655_v17 = vcombine.low %v8385_v53, %v8388_v57  ;;  %v8439_v52 = vpop.permute.xlu1 %1150 }
 0x2ad   :  { %v8431_v25 = vrot.slane %v2991_v50, %v7272_v40  ;;  %v8434_v29 = vrot.slane %v3984_v58, %v7245_v16  ;;  %v8437_v62 = vrot.slane %v4000_v2, %v7245_v16  ;;  %12309 = vst [vmem:[#allocation60_spill] sm:$0xff] %v8439_v52  ;;  %v5072_v36 = vcombine.high %v7956_v11, %v7991_v14 }
 0x2ae   :  { %v5088_v13 = vcombine.high %v8038_v42, %v8108_v32  ;;  %v8450_v50 = vrot.slane %v4663_v24, %v7245_v16  ;;  %v8453_v58 = vrot.slane %v4679_v46, %v7245_v16  ;;  %v8456_v2 = vrot.slane %v4695_v48, %v7245_v16  ;;  %12310 = vst [vmem:[#allocation52_spill] sm:$0xff] %v8458_v63 }
 0x2af   :  { %v8461_v11 = vrot.slane %v3968_v35, %v7245_v16  ;;  %v4079_v14 = vcombine.low %v8437_v62, %v8417_v4  ;;  %v5056_v42 = vcombine.high %v7932_v7, %v7970_v55  ;;  %v8468_v32 = vrot.slane %v5104_v15, %v7245_v16 }
 0x2b0   :  { %5811 = vrot.lane.b32.xlu0 %v4646_v5, %s7072_s24  ;;  %5685 = vrot.lane.b32.xlu1 %v5186_v30, %s7069_s21  ;;  %v8447_v5 = vrot.slane %v4647_v22, %v7245_v16  ;;  %v2599_v22 = vcombine.low %v8364_v21, %v8376_v31  ;;  %v8476_v35 = vrot.slane %v5072_v36, %v7245_v16  ;;  %v8492_v30 = vpop.permute.xlu1 %1161  ;;  %s7097_s21 = smov 64  }
 0x2b1   :  { %v4047_v24 = vcombine.low %v8461_v11, %v8434_v29  ;;  %v8479_v46 = vrot.slane %v5088_v13, %v7245_v16  ;;  %v2967_v7 = vrot.slane %v2959_v20, %v7272_v40  ;;  %v3631_v48 = vrot.slane %v3623_v34, %v7272_v40  ;;  %12311 = vst [vmem:[#allocation44_spill] sm:$0xff] %v8492_v30  ;;  %v8498_v13 = vpop.permute.xlu0 %5611 }
 0x2b2   :  { %v4711_v55 = vcombine.low %v8447_v5, %v8450_v50  ;;  %v3663_v60 = vrot.slane %v3655_v17, %v7272_v40  ;;  %v8490_v15 = vrot.slane %v5056_v42, %v7245_v16  ;;  %v4087_v36 = vrot.slane %v4079_v14, %v7272_v40  ;;  %12312 = vst [vmem:[#allocation34_spill] sm:$0xff] %v8498_v13 }
 0x2b3   :  { %v3011_v20 = vcombine.low %v2967_v7, %v8431_v25  ;;  %v4055_v17 = vrot.slane %v4047_v24, %v7272_v40 }
 0x2b4   :  { %5831 = vrot.lane.b32.xlu0 %v1511_v61, %s7073_s25  ;;  %5705 = vrot.lane.b32.xlu1 %v1923_v51, %s7064_s17  ;;  %v4743_v61 = vcombine.low %v8453_v58, %v8456_v2  ;;  %v5167_v51 = vcombine.low %v8479_v46, %v8468_v32  ;;  %v5135_v34 = vcombine.low %v8490_v15, %v8476_v35  ;;  %v8509_v14 = vpop.permute.xlu1 %1169 }
 0x2b5   :  { %v3687_v42 = vcombine.low %v3631_v48, %v3663_v60  ;;  %v4719_v63 = vrot.slane %v4711_v55, %v7272_v40  ;;  %v4099_v30 = vcombine.low %v4055_v17, %v4087_v36  ;;  %12313 = vst [vmem:[#allocation126_spill] sm:$0xff] %v8509_v14  ;;  %v8513_v13 = vpop.permute.xlu0 %5615  ;;  %v12356_v14 = vld [vmem:[#allocation105_spill] sm:$0xff] }
 0x2b6   :  { %v4751_v52 = vrot.slane %v4743_v61, %v7272_v40  ;;  %v5175_v6 = vrot.slane %v5167_v51, %v7272_v40  ;;  %12314 = vst [vmem:[#allocation118_spill] sm:$0xff] %v8513_v13  ;;  %v1512_v61 = vcombine.high %v8317_v18, %v8324_v19  ;;  %v1480_v19 = vcombine.high %v8241_v47, %v8244_v9  ;;  %v12322_v47 = vld [vmem:[#allocation133_spill] sm:$0xff] }
 0x2b8   :  { %5835 = vrot.lane.b32.xlu0 %v2599_v22, %s7073_s25  ;;  %5709 = vrot.lane.b32.xlu1 %v3011_v20, %s7064_s17  ;;  %v5143_v22 = vrot.slane %v5135_v34, %v7272_v40  ;;  %v4775_v20 = vcombine.low %v4719_v63, %v4751_v52  ;;  %v8521_v51 = vpop.permute.xlu1 %1180 }
 0x2b9   :  { %12316 = vst [vmem:[#allocation114_spill] sm:$0xff] %v8521_v51 }
 0x2ba   :  { %v5187_v24 = vcombine.low %v5143_v22, %v5175_v6 }
 0x2bc   :  { %5839 = vrot.lane.b32.xlu0 %v3687_v42, %s7073_s25  ;;  %5713 = vrot.lane.b32.xlu1 %v4099_v30, %s7064_s17  ;;  %v1924_v30 = vcombine.high %v8337_v10, %v8327_v37  ;;  %v2600_v42 = vcombine.high %v8364_v21, %v8376_v31  ;;  %v8533_v18 = vpop.permute.xlu1 %1188  ;;  %v3688_v10 = vcombine.high %v3631_v48, %v3663_v60 }
 0x2bd   :  { %12318 = vst [vmem:[#allocation102_spill] sm:$0xff] %v8533_v18  ;;  %v1448_v21 = vcombine.high %v8229_v56, %v8232_v1  ;;  %v1872_v31 = vcombine.high %v8284_v38, %v8265_v28  ;;  %v2992_v56 = vcombine.high %v8351_v26, %v8334_v8  ;;  %v5188_v28 = vcombine.high %v5143_v22, %v5175_v6 }
 0x2be   :  { %v3624_v26 = vcombine.high %v8379_v3, %v8382_v44  ;;  %v3656_v60 = vcombine.high %v8385_v53, %v8388_v57  ;;  %v12328_v44 = vld [vmem:[#allocation26_spill] sm:$0xff]  ;;  %v12329_v53 = vld [vmem:[#allocation20_spill] sm:$0xff] }
 0x2bf   :  { %v8593_v22 = vrot.slane %v2992_v56, %v7272_v40  ;;  %v1416_v57 = vcombine.high %v12329_v53, %v12328_v44 }
 0x2c0   :  { %5843 = vrot.lane.b32.xlu0 %v4775_v20, %s7073_s25  ;;  %5717 = vrot.lane.b32.xlu1 %v5187_v24, %s7064_s17  ;;  %v3012_v20 = vcombine.high %v2967_v7, %v8431_v25  ;;  %v1904_v24 = vcombine.high %v8276_v0, %v8256_v27  ;;  %v12320_v25 = vld [vmem:[#allocation132_spill] sm:$0xff]  ;;  %v4776_v27 = vcombine.high %v4719_v63, %v4751_v52  ;;  %v8559_v1 = vpop.permute.xlu1 %1199 }
 0x2c1   :  { %v2536_v7 = vcombine.high %v12320_v25, %v8293_v41  ;;  %v8555_v0 = vrot.slane %v1480_v19, %v7272_v40  ;;  %12324 = vst [vmem:[#allocation106_spill] sm:$0xff] %v8559_v1  ;;  %v8566_v41 = vrot.slane %v1448_v21, %v7272_v40  ;;  %v2960_v52 = vcombine.high %v8394_v12, %v8367_v39  ;;  %v12333_v25 = vld [vmem:[#allocation23_spill] sm:$0xff] }
 0x2c2   :  { %v8517_v55 = vpop.permute.xlu0 %5619  ;;  %v8562_v38 = vrot.slane %v1904_v24, %v7272_v40  ;;  %v8572_v63 = vrot.slane %v1872_v31, %v7272_v40  ;;  %v4080_v12 = vcombine.high %v8437_v62, %v8417_v4  ;;  %v4048_v19 = vcombine.high %v8461_v11, %v8434_v29  ;;  %v12332_v31 = vld [vmem:[#allocation29_spill] sm:$0xff] }
 0x2c3   :  { %12315 = vst [vmem:[#allocation122_spill] sm:$0xff] %v8517_v55  ;;  %v8575_v8 = vrot.slane %v2536_v7, %v7272_v40  ;;  %v1513_v39 = vcombine.low %v8566_v41, %v8555_v0  ;;  %v8608_v62 = vrot.slane %v2960_v52, %v7272_v40  ;;  %v4712_v24 = vcombine.high %v8447_v5, %v8450_v50  ;;  %v12339_v52 = vld [vmem:[#allocation51_spill] sm:$0xff]  ;;  %v12354_v55 = vld [vmem:[#allocation86_spill] sm:$0xff] }
 0x2c4   :  { %5863 = vrot.lane.b32.xlu0 %v1512_v61, %s7074_s26  ;;  %5737 = vrot.lane.b32.xlu1 %v1924_v30, %s7070_s22  ;;  %v4100_v61 = vcombine.high %v4055_v17, %v4087_v36  ;;  %v12321_v30 = vld [vmem:[#allocation64_spill] sm:$0xff]  ;;  %v1925_v17 = vcombine.low %v8572_v63, %v8562_v38  ;;  %v8617_v29 = vrot.slane %v3624_v26, %v7272_v40 }
 0x2c5   :  { %v2568_v9 = vcombine.high %v12322_v47, %v12321_v30  ;;  %v8620_v11 = vrot.slane %v3656_v60, %v7272_v40  ;;  %v1432_v7 = vcombine.high %v12333_v25, %v12332_v31  ;;  %v5168_v30 = vcombine.high %v8479_v46, %v8468_v32  ;;  %v12340_v60 = vld [vmem:[#allocation63_spill] sm:$0xff]  ;;  %v12342_v32 = vld [vmem:[#allocation14_spill] sm:$0xff] }
 0x2c6   :  { %v8527_v34 = vpop.permute.xlu0 %5639  ;;  %v3013_v5 = vcombine.low %v8608_v62, %v8593_v22  ;;  %v8629_v50 = vrot.slane %v4080_v12, %v7272_v40  ;;  %v12343_v46 = vld [vmem:[#allocation10_spill] sm:$0xff]  ;;  %v5136_v12 = vcombine.high %v8490_v15, %v8476_v35  ;;  %v8662_v35 = vrot.slane %v1416_v57, %v7245_v16 }
 0x2c7   :  { %12317 = vst [vmem:[#allocation110_spill] sm:$0xff] %v8527_v34  ;;  %v8578_v6 = vrot.slane %v2568_v9, %v7272_v40  ;;  %v12336_v9 = vld [vmem:[#allocation47_spill] sm:$0xff]  ;;  %v3689_v31 = vcombine.low %v8617_v29, %v8620_v11  ;;  %v8665_v15 = vrot.slane %v1432_v7, %v7245_v16 }
 0x2c8   :  { %5867 = vrot.lane.b32.xlu0 %v2600_v42, %s7074_s26  ;;  %5741 = vrot.lane.b32.xlu1 %v3012_v20, %s7070_s22  ;;  %v12326_v42 = vld [vmem:[#allocation17_spill] sm:$0xff]  ;;  %v12327_v20 = vld [vmem:[#allocation11_spill] sm:$0xff] }
 0x2c9   :  { %v1400_v3 = vcombine.high %v12327_v20, %v12326_v42  ;;  %v2601_v4 = vcombine.low %v8575_v8, %v8578_v6  ;;  %v1384_v42 = vcombine.high %v12343_v46, %v12342_v32  ;;  %v8646_v20 = vrot.slane %v4048_v19, %v7272_v40  ;;  %v12352_v34 = vld [vmem:[#allocation83_spill] sm:$0xff] }
 0x2ca   :  { %v8538_v37 = vpop.permute.xlu0 %5643  ;;  %v8689_v32 = vrot.slane %v5136_v12, %v7272_v40  ;;  %v1495_v46 = vcombine.low %v8662_v35, %v8665_v15 }
 0x2cb   :  { %12319 = vst [vmem:[#allocation140_spill] sm:$0xff] %v8538_v37  ;;  %v8649_v44 = vrot.slane %v1400_v3, %v7245_v16  ;;  %v4101_v3 = vcombine.low %v8646_v20, %v8629_v50  ;;  %v12351_v37 = vld [vmem:[#allocation89_spill] sm:$0xff] }
 0x2cc   :  { %5871 = vrot.lane.b32.xlu0 %v3688_v10, %s7074_s26  ;;  %5745 = vrot.lane.b32.xlu1 %v4100_v61, %s7070_s22  ;;  %v8602_v10 = vpop.permute.xlu1 %1207  ;;  %v4744_v61 = vcombine.high %v8453_v58, %v8456_v2  ;;  %v12334_v58 = vld [vmem:[#allocation43_spill] sm:$0xff]  ;;  %v12335_v2 = vld [vmem:[#allocation33_spill] sm:$0xff]  ;;  %v2504_v13 = vcombine.high %v12352_v34, %v12351_v37  ;;  %v1514_v34 = vcombine.high %v8566_v41, %v8555_v0 }
 0x2cd   :  { %12330 = vst [vmem:[#allocation179_spill] sm:$0xff] %v8602_v10  ;;  %v1927_v47 = vcombine.low %v12335_v2, %v12334_v58  ;;  %v12363_v37 = vld [vmem:[#allocation125_spill] sm:$0xff] }
 0x2ce   :  { %v8552_v48 = vpop.permute.xlu0 %5647  ;;  %v8659_v25 = vrot.slane %v4744_v61, %v7272_v40 }
 0x2cf   :  { %12323 = vst [vmem:[#allocation144_spill] sm:$0xff] %v8552_v48 }
 0x2d0   :  { %5875 = vrot.lane.b32.xlu0 %v4776_v27, %s7074_s26  ;;  %5749 = vrot.lane.b32.xlu1 %v5188_v28, %s7070_s22  ;;  %v12337_v27 = vld [vmem:[#allocation39_spill] sm:$0xff]  ;;  %v8667_v19 = vpop.permute.xlu1 %1218  ;;  %s7098_s22 = smov [#allocation5]  }
 0x2d1   :  { %v1943_v56 = vcombine.low %v12337_v27, %v12336_v9  ;;  %v12338_v28 = vld [vmem:[#allocation59_spill] sm:$0xff]  ;;  %12345 = vst [vmem:[#allocation183_spill] sm:$0xff] %v8667_v19  ;;  %v12380_v9 = vld [vmem:[#allocation190_spill] sm:$0xff] }
 0x2d2   :  { %v8584_v36 = vpop.permute.xlu0 %5651  ;;  %v1959_v26 = vcombine.low %v12339_v52, %v12338_v28  ;;  %v12359_v52 = vld [vmem:[#allocation101_spill] sm:$0xff] }
 0x2d3   :  { %12325 = vst [vmem:[#allocation96_spill] sm:$0xff] %v8584_v36  ;;  %v8678_v61 = vrot.slane %v1943_v56, %v7245_v16  ;;  %v12353_v36 = vld [vmem:[#allocation92_spill] sm:$0xff] }
 0x2d4   :  { %5895 = vrot.lane.b32.xlu0 %v1513_v39, %s7075_s27  ;;  %5769 = vrot.lane.b32.xlu1 %v1925_v17, %s7071_s23  ;;  %v12341_v39 = vld [vmem:[#allocation55_spill] sm:$0xff]  ;;  %v8681_v57 = vrot.slane %v1959_v26, %v7245_v16  ;;  %v2520_v10 = vcombine.high %v12354_v55, %v12353_v36  ;;  %v8717_v18 = vpop.permute.xlu1 %1226  ;;  %v12364_v55 = vld [vmem:[#allocation117_spill] sm:$0xff] }
 0x2d5   :  { %v1975_v17 = vcombine.low %v12341_v39, %v12340_v60  ;;  %12355 = vst [vmem:[#allocation169_spill] sm:$0xff] %v8717_v18  ;;  %v12357_v39 = vld [vmem:[#allocation95_spill] sm:$0xff]  ;;  %v3063_v36 = vcombine.low %v12364_v55, %v12363_v37  ;;  %v8739_v18 = vrot.slane %v1495_v46, %v7272_v40 }
 0x2d6   :  { %v8614_v21 = vpop.permute.xlu0 %5671  ;;  %v3015_v60 = vcombine.low %v12357_v39, %v12356_v14  ;;  %v12370_v37 = vld [vmem:[#allocation147_spill] sm:$0xff]  ;;  %v12376_v39 = vld [vmem:[#allocation170_spill] sm:$0xff]  ;;  %v12379_v14 = vld [vmem:[#allocation197_spill] sm:$0xff] }
 0x2d7   :  { %12331 = vst [vmem:[#allocation173_spill] sm:$0xff] %v8614_v21  ;;  %v8684_v7 = vrot.slane %v1975_v17, %v7245_v16  ;;  %v12350_v21 = vld [vmem:[#allocation74_spill] sm:$0xff] }
 0x2d8   :  { %5899 = vrot.lane.b32.xlu0 %v2601_v4, %s7075_s27  ;;  %5773 = vrot.lane.b32.xlu1 %v3013_v5, %s7071_s23  ;;  %v8656_v4 = vrot.slane %v4712_v24, %v7272_v40  ;;  %v8672_v5 = vrot.slane %v5168_v30, %v7272_v40  ;;  %v8675_v24 = vrot.slane %v1927_v47, %v7245_v16  ;;  %v8780_v55 = vpop.permute.xlu1 %1237 }
 0x2d9   :  { %v8692_v30 = vrot.slane %v1384_v42, %v7245_v16  ;;  %v2023_v42 = vcombine.low %v8681_v57, %v8684_v7  ;;  %v8761_v46 = vrot.slane %v3015_v60, %v7245_v16  ;;  %v12367_v60 = vld [vmem:[#allocation137_spill] sm:$0xff]  ;;  %12368 = vst [vmem:[#allocation64_spill] sm:$0xff] %v8780_v55 }
 0x2da   :  { %v8651_v53 = vpop.permute.xlu0 %5675  ;;  %v4777_v56 = vcombine.low %v8656_v4, %v8659_v25  ;;  %v5189_v26 = vcombine.low %v8689_v32, %v8672_v5  ;;  %v1991_v12 = vcombine.low %v8675_v24, %v8678_v61 }
 0x2db   :  { %12344 = vst [vmem:[#allocation166_spill] sm:$0xff] %v8651_v53  ;;  %v1463_v17 = vcombine.low %v8692_v30, %v8649_v44  ;;  %v12349_v53 = vld [vmem:[#allocation80_spill] sm:$0xff]  ;;  %v8745_v0 = vrot.slane %v2023_v42, %v7272_v40 }
 0x2dc   :  { %5903 = vrot.lane.b32.xlu0 %v3689_v31, %s7075_s27  ;;  %5777 = vrot.lane.b32.xlu1 %v4101_v3, %s7071_s23  ;;  %v12347_v31 = vld [vmem:[#allocation77_spill] sm:$0xff]  ;;  %v12348_v3 = vld [vmem:[#allocation67_spill] sm:$0xff]  ;;  %v2488_v48 = vcombine.high %v12350_v21, %v12349_v53  ;;  %v1926_v53 = vcombine.high %v8572_v63, %v8562_v38  ;;  %v8754_v63 = vrot.slane %v2504_v13, %v7245_v16 }
 0x2dd   :  { %v2602_v13 = vcombine.high %v8575_v8, %v8578_v6  ;;  %v12373_v6 = vld [vmem:[#allocation175_spill] sm:$0xff] }
 0x2de   :  { %v8694_v47 = vpop.permute.xlu0 %5679  ;;  %v8751_v38 = vrot.slane %v2488_v48, %v7245_v16  ;;  %v8774_v48 = vrot.slane %v3063_v36, %v7245_v16  ;;  %v12374_v36 = vld [vmem:[#allocation165_spill] sm:$0xff] }
 0x2df   :  { %12346 = vst [vmem:[#allocation176_spill] sm:$0xff] %v8694_v47  ;;  %v2472_v47 = vcombine.high %v12348_v3, %v12347_v31  ;;  %v12360_v31 = vld [vmem:[#allocation121_spill] sm:$0xff] }
 0x2e0   :  { %5907 = vrot.lane.b32.xlu0 %v4777_v56, %s7075_s27  ;;  %5781 = vrot.lane.b32.xlu1 %v5189_v26, %s7071_s23  ;;  %v12358_v56 = vld [vmem:[#allocation109_spill] sm:$0xff]  ;;  %v8736_v26 = vrot.slane %v1463_v17, %v7272_v40  ;;  %v8757_v17 = vrot.slane %v2520_v10, %v7245_v16  ;;  %s6965_s23 = sshll.u32 %s7098_s22, 4  ;;  %s6966_s23 = int_to_ptr.vmem [resolvable:$true] %s6965_s23 }
 0x2e1   :  { %v3031_v28 = vcombine.low %v12359_v52, %v12358_v56  ;;  %v12361_v3 = vld [vmem:[#allocation113_spill] sm:$0xff]  ;;  %v8748_v41 = vrot.slane %v2472_v47, %v7245_v16  ;;  %v4103_v52 = vcombine.low %v12374_v36, %v12373_v6  ;;  %v12375_v56 = vld [vmem:[#allocation180_spill] sm:$0xff]  ;;  %v12387_v36 = vld [vmem:[#allocation222_spill] sm:$0xff]  ;;  %p7041_p9 = scmp.lt.s32.totalorder %s6966_s23, %s6966_s23 }
 0x2e2   :  { %v3047_v27 = vcombine.low %v12361_v3, %v12360_v31  ;;  %v8726_v21 = vpop.permute.xlu0 %5683  ;;  %v12366_v10 = vld [vmem:[#allocation129_spill] sm:$0xff]  ;;  %v12371_v3 = vld [vmem:[#allocation158_spill] sm:$0xff]  ;;  %v12372_v31 = vld [vmem:[#allocation151_spill] sm:$0xff] }
 0x2e3   :  { %12362 = vst [vmem:[#allocation161_spill] sm:$0xff] %v8726_v21  ;;  %v8742_v21 = vrot.slane %v1991_v12, %v7272_v40  ;;  %v8764_v12 = vrot.slane %v3031_v28, %v7245_v16  ;;  %v12369_v28 = vld [vmem:[#allocation154_spill] sm:$0xff]  ;;  %v3608_v8 = vcombine.high %v12372_v31, %v12371_v3  ;;  %v2551_v3 = vcombine.low %v8748_v41, %v8751_v38 }
 0x2e4   :  { %5927 = vrot.lane.b32.xlu0 %v1514_v34, %s7076_s28  ;;  %5801 = vrot.lane.b32.xlu1 %v1926_v53, %s7072_s24  ;;  %v8767_v47 = vrot.slane %v3047_v27, %v7245_v16  ;;  %v3560_v34 = vcombine.high %v12366_v10, %v12288_v49  ;;  %v3576_v53 = vcombine.high %v12367_v60, %v12290_v59  ;;  %v12377_v59 = vld [vmem:[#allocation194_spill] sm:$0xff]  ;;  %v12378_v10 = vld [vmem:[#allocation185_spill] sm:$0xff] }
 0x2e5   :  { %v3014_v27 = vcombine.high %v8608_v62, %v8593_v22  ;;  %v4119_v49 = vcombine.low %v12376_v39, %v12375_v56  ;;  %v4135_v60 = vcombine.low %v12378_v10, %v12377_v59  ;;  %v4151_v22 = vcombine.low %v12380_v9, %v12379_v14  ;;  %v12386_v56 = vld [vmem:[#allocation48_spill] sm:$0xff] }
 0x2e6   :  { %v8769_v42 = vpop.permute.xlu0 %5703  ;;  %v1515_v62 = vcombine.low %v8736_v26, %v8739_v18  ;;  %v2055_v31 = vcombine.low %v8742_v21, %v8745_v0  ;;  %v3111_v9 = vcombine.low %v8767_v47, %v8774_v48  ;;  %v8815_v14 = vrot.slane %v3560_v34, %v7245_v16 }
 0x2e7   :  { %12365 = vst [vmem:[#allocation132_spill] sm:$0xff] %v8769_v42  ;;  %v3592_v42 = vcombine.high %v12370_v37, %v12369_v28  ;;  %v2583_v37 = vcombine.low %v8754_v63, %v8757_v17  ;;  %v8818_v10 = vrot.slane %v3576_v53, %v7245_v16  ;;  %v4102_v59 = vcombine.high %v8646_v20, %v8629_v50  ;;  %v12382_v50 = vld [vmem:[#allocation201_spill] sm:$0xff] }
 0x2e8   :  { %5931 = vrot.lane.b32.xlu0 %v2602_v13, %s7076_s28  ;;  %5805 = vrot.lane.b32.xlu1 %v3014_v27, %s7072_s24  ;;  %v3079_v13 = vcombine.low %v8761_v46, %v8764_v12  ;;  %v3690_v27 = vcombine.high %v8617_v29, %v8620_v11  ;;  %v8829_v29 = vrot.slane %v4103_v52, %v7245_v16 }
 0x2e9   :  { %v8823_v39 = vrot.slane %v3592_v42, %v7245_v16  ;;  %v8832_v11 = vrot.slane %v4119_v49, %v7245_v16  ;;  %v8836_v34 = vrot.slane %v4135_v60, %v7245_v16  ;;  %v8839_v53 = vrot.slane %v4151_v22, %v7245_v16  ;;  %v12384_v49 = vld [vmem:[#allocation218_spill] sm:$0xff] }
 0x2ea   :  { %v8808_v28 = vpop.permute.xlu0 %5707  ;;  %v4648_v20 = vcombine.high %v12382_v50, %v7922_v33  ;;  %v4664_v42 = vcombine.high %v7898_v45, %v7959_v43  ;;  %v4680_v52 = vcombine.high %v7981_v23, %v8104_v54  ;;  %v5191_v22 = vcombine.low %v12387_v36, %v12386_v56  ;;  %v12389_v50 = vld [vmem:[#allocation44_spill] sm:$0xff]  ;;  %v12390_v45 = vld [vmem:[#allocation71_spill] sm:$0xff] }
 0x2eb   :  { %12381 = vst [vmem:[#allocation133_spill] sm:$0xff] %v8808_v28  ;;  %v8826_v28 = vrot.slane %v3608_v8, %v7245_v16  ;;  %v8845_v8 = vpop.permute.xlu1 %1245  ;;  %v4778_v33 = vcombine.high %v8656_v4, %v8659_v25  ;;  %v5207_v43 = vcombine.low %v12390_v45, %v12389_v50  ;;  %v5239_v23 = vcombine.low %v8559_v1, %v8780_v55 }
 0x2ec   :  { %5935 = vrot.lane.b32.xlu0 %v3690_v27, %s7076_s28  ;;  %12383 = vst [vmem:[#allocation17_spill] sm:$0xff] %v8845_v8  ;;  %5809 = vrot.lane.b32.xlu1 %v4102_v59, %s7072_s24  ;;  %v12385_v27 = vld [vmem:[#allocation155_spill] sm:$0xff]  ;;  %v5223_v59 = vcombine.low %v8521_v51, %v8667_v19  ;;  %v5190_v54 = vcombine.high %v8689_v32, %v8672_v5 }
 0x2ed   :  { %v4696_v60 = vcombine.high %v12385_v27, %v12384_v49  ;;  %v2559_v49 = vrot.slane %v2551_v3, %v7272_v40  ;;  %v2591_v27 = vrot.slane %v2583_v37, %v7272_v40  ;;  %v3087_v4 = vrot.slane %v3079_v13, %v7272_v40 }
 0x2ee   :  { %v8854_v6 = vpop.permute.xlu0 %5711  ;;  %v3119_v25 = vrot.slane %v3111_v9, %v7272_v40  ;;  %v3671_v8 = vcombine.low %v8823_v39, %v8826_v28  ;;  %v4167_v1 = vcombine.low %v8829_v29, %v8832_v11  ;;  %v4199_v5 = vcombine.low %v8836_v34, %v8839_v53 }
 0x2ef   :  { %12388 = vst [vmem:[#allocation11_spill] sm:$0xff] %v8854_v6  ;;  %v3639_v6 = vcombine.low %v8815_v14, %v8818_v10  ;;  %v8881_v32 = vrot.slane %v4648_v20, %v7245_v16  ;;  %v8884_v3 = vrot.slane %v4664_v42, %v7245_v16  ;;  %v8887_v9 = vrot.slane %v4680_v52, %v7245_v16 }
 0x2f0   :  { %5939 = vrot.lane.b32.xlu0 %v4778_v33, %s7076_s28  ;;  %5813 = vrot.lane.b32.xlu1 %v5190_v54, %s7072_s24  ;;  %v8890_v37 = vrot.slane %v4696_v60, %v7245_v16  ;;  %v8895_v33 = vrot.slane %v5191_v22, %v7245_v16  ;;  %v8898_v55 = vrot.slane %v5207_v43, %v7245_v16  ;;  %v8906_v54 = vpop.permute.xlu1 %5609  ;;  %s7036_s24 = scalar_lea.vmem %s6966_s23, 1024 }
 0x2f1   :  { %v8901_v20 = vrot.slane %v5223_v59, %v7245_v16  ;;  %v8904_v42 = vrot.slane %v5239_v23, %v7245_v16  ;;  %12392 = vst [vmem:[#allocation20_spill] sm:$0xff] %v8906_v54  ;;  %v2603_v52 = vcombine.low %v2559_v49, %v2591_v27  ;;  %v3143_v60 = vcombine.low %v3087_v4, %v3119_v25  ;;  %p7037_p8 = scmp.ne.s32.totalorder %s6966_s23, %s7036_s24  ;;  %p7042_p10 = scmp.lt.s32.totalorder %s7036_s24, %s7036_s24 }
 0x2f2   :  { %v8892_v13 = vpop.permute.xlu0 %5715  ;;  %v4727_v22 = vcombine.low %v8881_v32, %v8884_v3  ;;  %v4759_v43 = vcombine.low %v8887_v9, %v8890_v37  ;;  %v3647_v23 = vrot.slane %v3639_v6, %v7272_v40  ;;  %v5255_v54 = vcombine.low %v8895_v33, %v8898_v55 }
 0x2f3   :  { %12391 = vst [vmem:[#allocation26_spill] sm:$0xff] %v8892_v13  ;;  %v3679_v13 = vrot.slane %v3671_v8, %v7272_v40  ;;  %v4207_v51 = vrot.slane %v4199_v5, %v7272_v40  ;;  %p7043_p11 = por %p7042_p10, %p7041_p9 }
 0x2f4   :  { %5959 = vrot.lane.b32.xlu0 %v1515_v62, %s7077_s29  ;;  %5833 = vrot.lane.b32.xlu1 %v2055_v31, %s7073_s25  ;;  %v5287_v62 = vcombine.low %v8901_v20, %v8904_v42  ;;  %v4175_v31 = vrot.slane %v4167_v1, %v7272_v40  ;;  %v8925_v19 = vpop.permute.xlu1 %5613  ;;  %v4735_v8 = vrot.slane %v4727_v22, %v7272_v40 }
 0x2f5   :  { %12394 = vst [vmem:[#allocation23_spill] sm:$0xff] %v8925_v19  ;;  %v3691_v6 = vcombine.low %v3647_v23, %v3679_v13  ;;  %v4767_v45 = vrot.slane %v4759_v43, %v7272_v40  ;;  %v5263_v36 = vrot.slane %v5255_v54, %v7272_v40  ;;  %v1516_v54 = vcombine.high %v8736_v26, %v8739_v18  ;;  %p7044_p12 = pnand %p7043_p11, %p7037_p8 }
 0x2f6   :  { %v8914_v59 = vpop.permute.xlu0 %5735  ;;  %v4231_v50 = vcombine.low %v4175_v31, %v4207_v51  ;;  %v5295_v1 = vrot.slane %v5287_v62, %v7272_v40  ;;  %v1496_v18 = vcombine.high %v8662_v35, %v8665_v15  ;;  %v2552_v35 = vcombine.high %v8748_v41, %v8751_v38 }
 0x2f7   :  { %12393 = vst [vmem:[#allocation29_spill] sm:$0xff] %v8914_v59  ;;  %v2584_v15 = vcombine.high %v8754_v63, %v8757_v17 }
 0x2f8   :  { %5963 = vrot.lane.b32.xlu0 %v2603_v52, %s7077_s29  ;;  %5837 = vrot.lane.b32.xlu1 %v3143_v60, %s7073_s25  ;;  %v4779_v52 = vcombine.low %v4735_v8, %v4767_v45  ;;  %v8938_v60 = vpop.permute.xlu1 %5617  ;;  %v5319_v19 = vcombine.low %v5263_v36, %v5295_v1 }
 0x2f9   :  { %12397 = vst [vmem:[#allocation14_spill] sm:$0xff] %v8938_v60  ;;  %v12433_v60 = vld [vmem:[#allocation94_spill] sm:$0xff] }
 0x2fa   :  { %v8928_v59 = vpop.permute.xlu0 %5739 }
 0x2fb   :  { %12395 = vst [vmem:[#allocation43_spill] sm:$0xff] %v8928_v59  ;;  %v12441_v59 = vld [vmem:[#allocation85_spill] sm:$0xff] }
 0x2fc   :  { %5967 = vrot.lane.b32.xlu0 %v3691_v6, %s7077_s29  ;;  %5841 = vrot.lane.b32.xlu1 %v4231_v50, %s7073_s25  ;;  %v2056_v50 = vcombine.high %v8742_v21, %v8745_v0  ;;  %v2604_v6 = vcombine.high %v2559_v49, %v2591_v27  ;;  %v3692_v21 = vcombine.high %v3647_v23, %v3679_v13 }
 0x2fd   :  { %v1992_v0 = vcombine.high %v8675_v24, %v8678_v61  ;;  %v4232_v27 = vcombine.high %v4175_v31, %v4207_v51  ;;  %v3080_v24 = vcombine.high %v8761_v46, %v8764_v12  ;;  %v3112_v61 = vcombine.high %v8767_v47, %v8774_v48 }
 0x2fe   :  { %v8936_v5 = vpop.permute.xlu0 %5743  ;;  %v9005_v12 = vrot.slane %v2552_v35, %v7272_v40  ;;  %v9008_v47 = vrot.slane %v2584_v15, %v7272_v40  ;;  %v3640_v48 = vcombine.high %v8815_v14, %v8818_v10  ;;  %v4168_v13 = vcombine.high %v8829_v29, %v8832_v11  ;;  %v12419_v35 = vld [vmem:[#allocation51_spill] sm:$0xff] }
 0x2ff   :  { %12396 = vst [vmem:[#allocation33_spill] sm:$0xff] %v8936_v5  ;;  %v8988_v41 = vrot.slane %v1992_v0, %v7272_v40  ;;  %v8999_v17 = vrot.slane %v3080_v24, %v7272_v40  ;;  %v9002_v46 = vrot.slane %v3112_v61, %v7272_v40  ;;  %v4200_v23 = vcombine.high %v8836_v34, %v8839_v53  ;;  %v12420_v24 = vld [vmem:[#allocation63_spill] sm:$0xff] }
 0x300   :  { %5971 = vrot.lane.b32.xlu0 %v4779_v52, %s7077_s29  ;;  %5845 = vrot.lane.b32.xlu1 %v5319_v19, %s7073_s25  ;;  %v3144_v19 = vcombine.high %v3087_v4, %v3119_v25  ;;  %v1464_v4 = vcombine.high %v8692_v30, %v8649_v44  ;;  %v8983_v44 = vrot.slane %v1496_v18, %v7272_v40  ;;  %v12413_v18 = vld [vmem:[#allocation13_spill] sm:$0xff]  ;;  %v12421_v61 = vld [vmem:[#allocation55_spill] sm:$0xff] }
 0x301   :  { %v5320_v30 = vcombine.high %v5263_v36, %v5295_v1  ;;  %v3672_v36 = vcombine.high %v8823_v39, %v8826_v28  ;;  %v3145_v14 = vcombine.low %v8999_v17, %v9002_v46  ;;  %v2605_v39 = vcombine.low %v9005_v12, %v9008_v47  ;;  %v12440_v5 = vld [vmem:[#allocation91_spill] sm:$0xff] }
 0x302   :  { %v8942_v22 = vpop.permute.xlu0 %5747  ;;  %v8946_v43 = vpop.permute.xlu1 %5621  ;;  %v8995_v63 = vrot.slane %v1464_v4, %v7272_v40  ;;  %v4728_v10 = vcombine.high %v8881_v32, %v8884_v3  ;;  %v4760_v28 = vcombine.high %v8887_v9, %v8890_v37  ;;  %v9039_v11 = vrot.slane %v3640_v48, %v7272_v40  ;;  %v12410_v9 = vld [vmem:[#allocation16_spill] sm:$0xff]  ;;  %v12418_v4 = vld [vmem:[#allocation59_spill] sm:$0xff] }
 0x303   :  { %12398 = vst [vmem:[#allocation10_spill] sm:$0xff] %v8942_v22  ;;  %12399 = vst [vmem:[#allocation77_spill] sm:$0xff] %v8946_v43  ;;  %v9042_v34 = vrot.slane %v3672_v36, %v7272_v40  ;;  %v5256_v53 = vcombine.high %v8895_v33, %v8898_v55  ;;  %v5288_v1 = vcombine.high %v8901_v20, %v8904_v42  ;;  %v12411_v37 = vld [vmem:[#allocation8_spill] sm:$0xff]  ;;  %v12415_v33 = vld [vmem:[#allocation25_spill] sm:$0xff] }
 0x304   :  { %5991 = vrot.lane.b32.xlu0 %v1516_v54, %s7078_s30  ;;  %5865 = vrot.lane.b32.xlu1 %v2056_v50, %s7074_s26  ;;  %v2024_v54 = vcombine.high %v8681_v57, %v8684_v7  ;;  %v4780_v57 = vcombine.high %v4735_v8, %v4767_v45  ;;  %v1517_v25 = vcombine.low %v8995_v63, %v8983_v44  ;;  %v12414_v55 = vld [vmem:[#allocation32_spill] sm:$0xff]  ;;  %v12416_v42 = vld [vmem:[#allocation47_spill] sm:$0xff]  ;;  %v12445_v22 = vld [vmem:[#allocation117_spill] sm:$0xff] }
 0x305   :  { %v9051_v32 = vrot.slane %v4168_v13, %v7272_v40  ;;  %v9054_v3 = vrot.slane %v4200_v23, %v7272_v40  ;;  %v1567_v0 = vcombine.low %v12415_v33, %v12414_v55  ;;  %v1928_v20 = vcombine.high %v12335_v2, %v12334_v58  ;;  %v12423_v2 = vld [vmem:[#allocation28_spill] sm:$0xff]  ;;  %v12436_v43 = vld [vmem:[#allocation95_spill] sm:$0xff] }
 0x306   :  { %v8952_v62 = vpop.permute.xlu0 %5767  ;;  %v8954_v52 = vpop.permute.xlu1 %5641  ;;  %v8991_v38 = vrot.slane %v2024_v54, %v7272_v40  ;;  %v12417_v54 = vld [vmem:[#allocation39_spill] sm:$0xff]  ;;  %v1960_v15 = vcombine.high %v12419_v35, %v12418_v4  ;;  %v3693_v48 = vcombine.low %v9039_v11, %v9042_v34  ;;  %v9077_v36 = vrot.slane %v4728_v10, %v7272_v40  ;;  %v12426_v4 = vld [vmem:[#allocation82_spill] sm:$0xff] }
 0x307   :  { %12400 = vst [vmem:[#allocation67_spill] sm:$0xff] %v8952_v62  ;;  %12401 = vst [vmem:[#allocation80_spill] sm:$0xff] %v8954_v52  ;;  %v9080_v58 = vrot.slane %v4760_v28, %v7272_v40  ;;  %v9099_v28 = vrot.slane %v1567_v0, %v7245_v16  ;;  %v12443_v62 = vld [vmem:[#allocation113_spill] sm:$0xff] }
 0x308   :  { %5995 = vrot.lane.b32.xlu0 %v2604_v6, %s7078_s30  ;;  %5869 = vrot.lane.b32.xlu1 %v3144_v19, %s7074_s26  ;;  %v2057_v8 = vcombine.low %v8988_v41, %v8991_v38  ;;  %v1519_v6 = vcombine.low %v12411_v37, %v12410_v9  ;;  %v12412_v19 = vld [vmem:[#allocation19_spill] sm:$0xff] }
 0x309   :  { %v4781_v0 = vcombine.low %v9077_v36, %v9080_v58 }
 0x30a   :  { %v8960_v26 = vpop.permute.xlu0 %5771  ;;  %v8966_v49 = vpop.permute.xlu1 %5645 }
 0x30b   :  { %12402 = vst [vmem:[#allocation74_spill] sm:$0xff] %v8960_v26  ;;  %12403 = vst [vmem:[#allocation89_spill] sm:$0xff] %v8966_v49 }
 0x30c   :  { %5999 = vrot.lane.b32.xlu0 %v3692_v21, %s7078_s30  ;;  %5873 = vrot.lane.b32.xlu1 %v4232_v27, %s7074_s26  ;;  %v1535_v21 = vcombine.low %v12413_v18, %v12412_v19  ;;  %v1944_v27 = vcombine.high %v12417_v54, %v12416_v42  ;;  %v9102_v42 = vrot.slane %v1928_v20, %v7245_v16 }
 0x30d   :  { %v9121_v20 = vrot.slane %v1519_v6, %v7245_v16 }
 0x30e   :  { %v8980_v51 = vpop.permute.xlu0 %5775  ;;  %v8985_v7 = vpop.permute.xlu1 %5649  ;;  %v9096_v10 = vrot.slane %v1535_v21, %v7245_v16  ;;  %v9105_v54 = vrot.slane %v1944_v27, %v7245_v16  ;;  %v12427_v21 = vld [vmem:[#allocation76_spill] sm:$0xff] }
 0x30f   :  { %12404 = vst [vmem:[#allocation83_spill] sm:$0xff] %v8980_v51  ;;  %12405 = vst [vmem:[#allocation92_spill] sm:$0xff] %v8985_v7  ;;  %v2623_v35 = vcombine.low %v12427_v21, %v12426_v4  ;;  %v12459_v21 = vld [vmem:[#allocation190_spill] sm:$0xff] }
 0x310   :  { %6003 = vrot.lane.b32.xlu0 %v4780_v57, %s7078_s30  ;;  %5877 = vrot.lane.b32.xlu1 %v5320_v30, %s7074_s26  ;;  %v1976_v57 = vcombine.high %v12421_v61, %v12420_v24 }
 0x311   :  { %v9143_v7 = vrot.slane %v2623_v35, %v7245_v16  ;;  %v2058_v35 = vcombine.high %v8988_v41, %v8991_v38 }
 0x312   :  { %v9014_v45 = vpop.permute.xlu0 %5779  ;;  %v9022_v31 = vpop.permute.xlu1 %5653 }
 0x313   :  { %12406 = vst [vmem:[#allocation86_spill] sm:$0xff] %v9014_v45  ;;  %12407 = vst [vmem:[#allocation129_spill] sm:$0xff] %v9022_v31  ;;  %v12435_v31 = vld [vmem:[#allocation105_spill] sm:$0xff] }
 0x314   :  { %6023 = vrot.lane.b32.xlu0 %v1517_v25, %s7079_s2  ;;  %5897 = vrot.lane.b32.xlu1 %v2057_v8, %s7075_s27  ;;  %v12424_v25 = vld [vmem:[#allocation22_spill] sm:$0xff]  ;;  %v4233_v8 = vcombine.low %v9051_v32, %v9054_v3  ;;  %v12444_v45 = vld [vmem:[#allocation125_spill] sm:$0xff] }
 0x315   :  { %v1551_v13 = vcombine.low %v12424_v25, %v12423_v2 }
 0x316   :  { %v9036_v29 = vpop.permute.xlu0 %5799  ;;  %v9048_v50 = vpop.permute.xlu1 %5673 }
 0x317   :  { %12408 = vst [vmem:[#allocation137_spill] sm:$0xff] %v9036_v29  ;;  %12409 = vst [vmem:[#allocation154_spill] sm:$0xff] %v9048_v50  ;;  %v9124_v27 = vrot.slane %v1551_v13, %v7245_v16  ;;  %v2007_v13 = vcombine.low %v9102_v42, %v9105_v54  ;;  %v12434_v50 = vld [vmem:[#allocation88_spill] sm:$0xff] }
 0x318   :  { %6027 = vrot.lane.b32.xlu0 %v2605_v39, %s7079_s2  ;;  %5901 = vrot.lane.b32.xlu1 %v3145_v14, %s7075_s27  ;;  %v9089_v14 = vrot.slane %v5256_v53, %v7272_v40  ;;  %v9092_v39 = vrot.slane %v5288_v1, %v7272_v40  ;;  %v9109_v53 = vrot.slane %v1960_v15, %v7245_v16 }
 0x319   :  { %v9112_v1 = vrot.slane %v1976_v57, %v7245_v16  ;;  %v12430_v57 = vld [vmem:[#allocation79_spill] sm:$0xff]  ;;  %v1615_v6 = vcombine.low %v9124_v27, %v9099_v28  ;;  %v2655_v52 = vcombine.low %v12434_v50, %v12433_v60  ;;  %v12473_v50 = vld [vmem:[#allocation114_spill] sm:$0xff]  ;;  %v12474_v60 = vld [vmem:[#allocation64_spill] sm:$0xff] }
 0x31a   :  { %v9072_v30 = vpop.permute.xlu0 %5803  ;;  %v9084_v23 = vpop.permute.xlu1 %5677  ;;  %v5321_v15 = vcombine.low %v9089_v14, %v9092_v39 }
 0x31b   :  { %12422 = vst [vmem:[#allocation147_spill] sm:$0xff] %v9072_v30  ;;  %12425 = vst [vmem:[#allocation158_spill] sm:$0xff] %v9084_v23  ;;  %v1583_v23 = vcombine.low %v9121_v20, %v9096_v10  ;;  %v12438_v30 = vld [vmem:[#allocation101_spill] sm:$0xff]  ;;  %v9174_v41 = vrot.slane %v1615_v6, %v7272_v40 }
 0x31c   :  { %6031 = vrot.lane.b32.xlu0 %v3693_v48, %s7079_s2  ;;  %5905 = vrot.lane.b32.xlu1 %v4233_v8, %s7075_s27  ;;  %v12431_v48 = vld [vmem:[#allocation73_spill] sm:$0xff] }
 0x31d   :  { %v2607_v8 = vcombine.low %v12431_v48, %v12430_v57  ;;  %v12456_v48 = vld [vmem:[#allocation194_spill] sm:$0xff] }
 0x31e   :  { %v9116_v24 = vpop.permute.xlu0 %5807  ;;  %v9126_v61 = vpop.permute.xlu1 %5681 }
 0x31f   :  { %12428 = vst [vmem:[#allocation151_spill] sm:$0xff] %v9116_v24  ;;  %12429 = vst [vmem:[#allocation201_spill] sm:$0xff] %v9126_v61  ;;  %v2039_v61 = vcombine.low %v9109_v53, %v9112_v1  ;;  %v12437_v24 = vld [vmem:[#allocation109_spill] sm:$0xff]  ;;  %v9160_v29 = vrot.slane %v2607_v8, %v7245_v16 }
 0x320   :  { %6035 = vrot.lane.b32.xlu0 %v4781_v0, %s7079_s2  ;;  %5909 = vrot.lane.b32.xlu1 %v5321_v15, %s7075_s27  ;;  %v1518_v0 = vcombine.high %v8995_v63, %v8983_v44  ;;  %v3016_v15 = vcombine.high %v12436_v43, %v12435_v31  ;;  %v3032_v51 = vcombine.high %v12438_v30, %v12437_v24  ;;  %v12442_v63 = vld [vmem:[#allocation121_spill] sm:$0xff] }
 0x321   :  { %v2639_v44 = vcombine.low %v12441_v59, %v12440_v5  ;;  %v3064_v43 = vcombine.high %v12445_v22, %v12444_v45  ;;  %v9171_v31 = vrot.slane %v1583_v23, %v7272_v40  ;;  %v2671_v38 = vcombine.low %v9160_v29, %v9143_v7  ;;  %v12471_v59 = vld [vmem:[#allocation71_spill] sm:$0xff] }
 0x322   :  { %v9145_v49 = vpop.permute.xlu0 %5811  ;;  %v9155_v26 = vpop.permute.xlu1 %5685  ;;  %v9183_v22 = vrot.slane %v2007_v13, %v7272_v40  ;;  %v9186_v45 = vrot.slane %v2039_v61, %v7272_v40  ;;  %v9189_v23 = vrot.slane %v2655_v52, %v7245_v16  ;;  %v9192_v24 = vrot.slane %v3016_v15, %v7245_v16  ;;  %v12448_v13 = vld [vmem:[#allocation157_spill] sm:$0xff]  ;;  %v12472_v5 = vld [vmem:[#allocation183_spill] sm:$0xff] }
 0x323   :  { %12432 = vst [vmem:[#allocation218_spill] sm:$0xff] %v9145_v49  ;;  %12439 = vst [vmem:[#allocation155_spill] sm:$0xff] %v9155_v26  ;;  %v3048_v49 = vcombine.high %v12443_v62, %v12442_v63  ;;  %v2606_v62 = vcombine.high %v9005_v12, %v9008_v47  ;;  %v9195_v8 = vrot.slane %v3032_v51, %v7245_v16  ;;  %v12450_v51 = vld [vmem:[#allocation159_spill] sm:$0xff]  ;;  %v12453_v26 = vld [vmem:[#allocation165_spill] sm:$0xff] }
 0x324   :  { %6055 = vrot.lane.b32.xlu0 %v1518_v0, %s7080_s3  ;;  %5929 = vrot.lane.b32.xlu1 %v2058_v35, %s7076_s28  ;;  %v3146_v12 = vcombine.high %v8999_v17, %v9002_v46  ;;  %v9202_v47 = vrot.slane %v2639_v44, %v7245_v16  ;;  %v9208_v52 = vrot.slane %v3064_v43, %v7245_v16  ;;  %v12449_v0 = vld [vmem:[#allocation150_spill] sm:$0xff]  ;;  %v12451_v35 = vld [vmem:[#allocation153_spill] sm:$0xff]  ;;  %v12454_v46 = vld [vmem:[#allocation180_spill] sm:$0xff] }
 0x325   :  { %v9205_v61 = vrot.slane %v3048_v49, %v7245_v16  ;;  %v3727_v15 = vcombine.low %v12449_v0, %v12448_v13  ;;  %v3743_v63 = vcombine.low %v12451_v35, %v12450_v51  ;;  %v12455_v44 = vld [vmem:[#allocation170_spill] sm:$0xff]  ;;  %v12457_v49 = vld [vmem:[#allocation185_spill] sm:$0xff]  ;;  %v2059_v13 = vcombine.low %v9183_v22, %v9186_v45 }
 0x326   :  { %v9178_v30 = vpop.permute.xlu0 %5831  ;;  %v9197_v6 = vpop.permute.xlu1 %5705  ;;  %v4136_v57 = vcombine.high %v12457_v49, %v12456_v48  ;;  %v12458_v43 = vld [vmem:[#allocation197_spill] sm:$0xff]  ;;  %v3095_v48 = vcombine.low %v9192_v24, %v9195_v8 }
 0x327   :  { %12446 = vst [vmem:[#allocation48_spill] sm:$0xff] %v9178_v30  ;;  %12447 = vst [vmem:[#allocation19_spill] sm:$0xff] %v9197_v6  ;;  %v12452_v6 = vld [vmem:[#allocation175_spill] sm:$0xff]  ;;  %v4120_v30 = vcombine.high %v12455_v44, %v12454_v46  ;;  %v4152_v4 = vcombine.high %v12459_v21, %v12458_v43  ;;  %v4234_v21 = vcombine.high %v9051_v32, %v9054_v3  ;;  %v12463_v44 = vld [vmem:[#allocation136_spill] sm:$0xff] }
 0x328   :  { %6059 = vrot.lane.b32.xlu0 %v2606_v62, %s7080_s3  ;;  %v4104_v17 = vcombine.high %v12453_v26, %v12452_v6  ;;  %5933 = vrot.lane.b32.xlu1 %v3146_v12, %s7076_s28  ;;  %v3694_v62 = vcombine.high %v9039_v11, %v9042_v34  ;;  %v1647_v26 = vcombine.low %v9171_v31, %v9174_v41  ;;  %v12462_v34 = vld [vmem:[#allocation143_spill] sm:$0xff]  ;;  %v12464_v43 = vld [vmem:[#allocation146_spill] sm:$0xff] }
 0x329   :  { %v2703_v6 = vcombine.low %v9202_v47, %v9189_v23  ;;  %v9241_v46 = vrot.slane %v2671_v38, %v7272_v40  ;;  %v3127_v11 = vcombine.low %v9205_v61, %v9208_v52  ;;  %v3695_v49 = vcombine.low %v12463_v44, %v12462_v34  ;;  %v12467_v34 = vld [vmem:[#allocation203_spill] sm:$0xff] }
 0x32a   :  { %v9224_v0 = vpop.permute.xlu0 %5835  ;;  %v9236_v12 = vpop.permute.xlu1 %5709  ;;  %v9250_v51 = vrot.slane %v3727_v15, %v7245_v16  ;;  %v9257_v32 = vrot.slane %v4104_v17, %v7245_v16  ;;  %v9260_v3 = vrot.slane %v4120_v30, %v7245_v16  ;;  %v9263_v38 = vrot.slane %v4136_v57, %v7245_v16  ;;  %v12466_v15 = vld [vmem:[#allocation206_spill] sm:$0xff]  ;;  %v12470_v17 = vld [vmem:[#allocation44_spill] sm:$0xff] }
 0x32b   :  { %12460 = vst [vmem:[#allocation13_spill] sm:$0xff] %v9224_v0  ;;  %12461 = vst [vmem:[#allocation32_spill] sm:$0xff] %v9236_v12  ;;  %v12465_v0 = vld [vmem:[#allocation139_spill] sm:$0xff]  ;;  %v9254_v12 = vrot.slane %v3743_v63, %v7245_v16  ;;  %v9267_v44 = vrot.slane %v4152_v4, %v7245_v16  ;;  %v12468_v63 = vld [vmem:[#allocation222_spill] sm:$0xff]  ;;  %v4782_v30 = vcombine.high %v9077_v36, %v9080_v58 }
 0x32c   :  { %v3711_v35 = vcombine.low %v12465_v0, %v12464_v43  ;;  %6063 = vrot.lane.b32.xlu0 %v3694_v62, %s7080_s3  ;;  %5937 = vrot.lane.b32.xlu1 %v4234_v21, %s7076_s28  ;;  %v4831_v62 = vcombine.low %v12467_v34, %v12466_v15  ;;  %v5192_v0 = vcombine.high %v12468_v63, %v12386_v56  ;;  %v12475_v4 = vld [vmem:[#allocation106_spill] sm:$0xff]  ;;  %v12479_v58 = vld [vmem:[#allocation204_spill] sm:$0xff] }
 0x32d   :  { %v5208_v57 = vcombine.high %v12471_v59, %v12470_v17  ;;  %v5224_v21 = vcombine.high %v12473_v50, %v12472_v5  ;;  %v5240_v37 = vcombine.high %v12475_v4, %v12474_v60  ;;  %v5322_v34 = vcombine.high %v9089_v14, %v9092_v39  ;;  %v12477_v63 = vld [vmem:[#allocation198_spill] sm:$0xff]  ;;  %v12480_v15 = vld [vmem:[#allocation200_spill] sm:$0xff]  ;;  %v12482_v17 = vld [vmem:[#allocation191_spill] sm:$0xff] }
 0x32e   :  { %v9273_v43 = vpop.permute.xlu0 %5839  ;;  %v9283_v9 = vpop.permute.xlu1 %5713  ;;  %v9288_v56 = vrot.slane %v3711_v35, %v7245_v16  ;;  %v4815_v59 = vcombine.low %v12480_v15, %v12479_v58  ;;  %v9296_v5 = vrot.slane %v2703_v6, %v7272_v40  ;;  %v9299_v60 = vrot.slane %v3695_v49, %v7245_v16  ;;  %v12481_v6 = vld [vmem:[#allocation196_spill] sm:$0xff] }
 0x32f   :  { %12469 = vst [vmem:[#allocation25_spill] sm:$0xff] %v9273_v43  ;;  %12476 = vst [vmem:[#allocation47_spill] sm:$0xff] %v9283_v9  ;;  %v12478_v43 = vld [vmem:[#allocation193_spill] sm:$0xff]  ;;  %v3791_v50 = vcombine.low %v9250_v51, %v9254_v12  ;;  %v3103_v14 = vrot.slane %v3095_v48, %v7272_v40  ;;  %v3135_v39 = vrot.slane %v3127_v11, %v7272_v40 }
 0x330   :  { %v4799_v36 = vcombine.low %v12478_v43, %v12477_v63  ;;  %6067 = vrot.lane.b32.xlu0 %v4782_v30, %s7080_s3  ;;  %5941 = vrot.lane.b32.xlu1 %v5322_v34, %s7076_s28  ;;  %v4183_v35 = vcombine.low %v9257_v32, %v9260_v3  ;;  %v4215_v30 = vcombine.low %v9263_v38, %v9267_v44 }
 0x331   :  { %v4783_v4 = vcombine.low %v12482_v17, %v12481_v6  ;;  %v9313_v49 = vrot.slane %v4831_v62, %v7245_v16  ;;  %v9318_v34 = vrot.slane %v5192_v0, %v7245_v16  ;;  %v9321_v48 = vrot.slane %v5208_v57, %v7245_v16 }
 0x332   :  { %v9315_v9 = vpop.permute.xlu0 %5843  ;;  %v9324_v11 = vrot.slane %v5224_v21, %v7245_v16  ;;  %v9327_v15 = vrot.slane %v5240_v37, %v7245_v16  ;;  %v9329_v58 = vpop.permute.xlu1 %5717  ;;  %v3759_v62 = vcombine.low %v9299_v60, %v9288_v56  ;;  %v9334_v17 = vrot.slane %v4799_v36, %v7245_v16 }
 0x333   :  { %12483 = vst [vmem:[#allocation39_spill] sm:$0xff] %v9315_v9  ;;  %12484 = vst [vmem:[#allocation59_spill] sm:$0xff] %v9329_v58  ;;  %v9337_v0 = vrot.slane %v4815_v59, %v7245_v16  ;;  %v2735_v37 = vcombine.low %v9241_v46, %v9296_v5  ;;  %v9344_v57 = vrot.slane %v4783_v4, %v7245_v16 }
 0x334   :  { %6087 = vrot.lane.b32.xlu0 %v1647_v26, %s7081_s4  ;;  %5961 = vrot.lane.b32.xlu1 %v2059_v13, %s7077_s29  ;;  %v3147_v36 = vcombine.low %v3103_v14, %v3135_v39  ;;  %v3799_v59 = vrot.slane %v3791_v50, %v7272_v40  ;;  %v5271_v9 = vcombine.low %v9318_v34, %v9321_v48 }
 0x335   :  { %v4879_v21 = vcombine.low %v9337_v0, %v9313_v49  ;;  %v5303_v13 = vcombine.low %v9324_v11, %v9327_v15  ;;  %v4191_v6 = vrot.slane %v4183_v35, %v7272_v40  ;;  %v4223_v4 = vrot.slane %v4215_v30, %v7272_v40 }
 0x336   :  { %v9348_v58 = vpop.permute.xlu0 %5863  ;;  %v9355_v26 = vpop.permute.xlu1 %5737  ;;  %v4847_v43 = vcombine.low %v9344_v57, %v9334_v17  ;;  %v5279_v35 = vrot.slane %v5271_v9, %v7272_v40  ;;  %v1648_v9 = vcombine.high %v9171_v31, %v9174_v41  ;;  %v1616_v31 = vcombine.high %v9124_v27, %v9099_v28 }
 0x337   :  { %12485 = vst [vmem:[#allocation51_spill] sm:$0xff] %v9348_v58  ;;  %12486 = vst [vmem:[#allocation63_spill] sm:$0xff] %v9355_v26  ;;  %v3767_v58 = vrot.slane %v3759_v62, %v7272_v40  ;;  %v4887_v16 = vrot.slane %v4879_v21, %v7272_v40  ;;  %v4235_v26 = vcombine.low %v4191_v6, %v4223_v4 }
 0x338   :  { %6091 = vrot.lane.b32.xlu0 %v2735_v37, %s7081_s4  ;;  %5965 = vrot.lane.b32.xlu1 %v3147_v36, %s7077_s29  ;;  %v5311_v30 = vrot.slane %v5303_v13, %v7272_v40  ;;  %v4855_v37 = vrot.slane %v4847_v43, %v7272_v40  ;;  %v2060_v43 = vcombine.high %v9183_v22, %v9186_v45 }
 0x339   :  { %v3823_v63 = vcombine.low %v3767_v58, %v3799_v59  ;;  %v3824_v22 = vcombine.high %v3767_v58, %v3799_v59  ;;  %v1584_v45 = vcombine.high %v9121_v20, %v9096_v10  ;;  %v9413_v28 = vrot.slane %v1616_v31, %v7272_v40 }
 0x33a   :  { %v9364_v50 = vpop.permute.xlu0 %5867  ;;  %v9367_v25 = vpop.permute.xlu1 %5741  ;;  %v4911_v36 = vcombine.low %v4855_v37, %v4887_v16  ;;  %v5323_v2 = vcombine.low %v5279_v35, %v5311_v30  ;;  %v2704_v27 = vcombine.high %v9202_v47, %v9189_v23  ;;  %v3096_v10 = vcombine.high %v9192_v24, %v9195_v8 }
 0x33b   :  { %12487 = vst [vmem:[#allocation55_spill] sm:$0xff] %v9364_v50  ;;  %12488 = vst [vmem:[#allocation105_spill] sm:$0xff] %v9367_v25  ;;  %v5324_v20 = vcombine.high %v5279_v35, %v5311_v30  ;;  %v9432_v23 = vrot.slane %v1584_v45, %v7272_v40  ;;  %v2672_v24 = vcombine.high %v9160_v29, %v9143_v7  ;;  %v12507_v45 = vld [vmem:[#allocation28_spill] sm:$0xff] }
 0x33c   :  { %6095 = vrot.lane.b32.xlu0 %v3823_v63, %s7081_s4  ;;  %5969 = vrot.lane.b32.xlu1 %v4235_v26, %s7077_s29  ;;  %v3792_v8 = vcombine.high %v9250_v51, %v9254_v12  ;;  %v9451_v7 = vrot.slane %v2704_v27, %v7272_v40  ;;  %v4184_v29 = vcombine.high %v9257_v32, %v9260_v3  ;;  %v12509_v27 = vld [vmem:[#allocation50_spill] sm:$0xff] }
 0x33d   :  { %v3760_v12 = vcombine.high %v9299_v60, %v9288_v56  ;;  %v4880_v32 = vcombine.high %v9337_v0, %v9313_v49  ;;  %v5272_v60 = vcombine.high %v9318_v34, %v9321_v48  ;;  %v5304_v35 = vcombine.high %v9324_v11, %v9327_v15 }
 0x33e   :  { %v9374_v62 = vpop.permute.xlu0 %5871  ;;  %v9376_v50 = vpop.permute.xlu1 %5745  ;;  %v9477_v56 = vrot.slane %v3792_v8, %v7272_v40  ;;  %v9486_v49 = vrot.slane %v4184_v29, %v7272_v40  ;;  %v1568_v15 = vcombine.high %v12415_v33, %v12414_v55  ;;  %v1536_v33 = vcombine.high %v12413_v18, %v12412_v19  ;;  %v12514_v8 = vld [vmem:[#allocation8_spill] sm:$0xff]  ;;  %v12515_v19 = vld [vmem:[#allocation30_spill] sm:$0xff] }
 0x33f   :  { %12489 = vst [vmem:[#allocation95_spill] sm:$0xff] %v9374_v62  ;;  %12490 = vst [vmem:[#allocation109_spill] sm:$0xff] %v9376_v50  ;;  %v9505_v11 = vrot.slane %v4880_v32, %v7272_v40  ;;  %v9517_v55 = vrot.slane %v5304_v35, %v7272_v40  ;;  %v12518_v32 = vld [vmem:[#allocation38_spill] sm:$0xff] }
 0x340   :  { %6099 = vrot.lane.b32.xlu0 %v4911_v36, %s7081_s4  ;;  %5973 = vrot.lane.b32.xlu1 %v5323_v2, %s7077_s29  ;;  %v2736_v2 = vcombine.high %v9241_v46, %v9296_v5  ;;  %v3148_v36 = vcombine.high %v3103_v14, %v3135_v39  ;;  %v2040_v46 = vcombine.high %v9109_v53, %v9112_v1 }
 0x341   :  { %v4236_v14 = vcombine.high %v4191_v6, %v4223_v4  ;;  %v4912_v53 = vcombine.high %v4855_v37, %v4887_v16  ;;  %v1649_v16 = vcombine.low %v9432_v23, %v9413_v28  ;;  %v4216_v6 = vcombine.high %v9263_v38, %v9267_v44 }
 0x342   :  { %v9380_v21 = vpop.permute.xlu0 %5875  ;;  %v9384_v63 = vpop.permute.xlu1 %5749  ;;  %v9429_v39 = vrot.slane %v2040_v46, %v7272_v40  ;;  %v9465_v4 = vrot.slane %v2672_v24, %v7272_v40  ;;  %v4848_v37 = vcombine.high %v9344_v57, %v9334_v17  ;;  %v12505_v17 = vld [vmem:[#allocation58_spill] sm:$0xff]  ;;  %v9535_v18 = vrot.slane %v1568_v15, %v12515_v19 }
 0x343   :  { %12491 = vst [vmem:[#allocation101_spill] sm:$0xff] %v9380_v21  ;;  %12492 = vst [vmem:[#allocation121_spill] sm:$0xff] %v9384_v63  ;;  %v9489_v0 = vrot.slane %v4216_v6, %v7272_v40  ;;  %v12535_v63 = vld [vmem:[#allocation73_spill] sm:$0xff] }
 0x344   :  { %6119 = vrot.lane.b32.xlu0 %v1648_v9, %s7082_s5  ;;  %5993 = vrot.lane.b32.xlu1 %v2060_v43, %s7078_s30  ;;  %v2008_v9 = vcombine.high %v9102_v42, %v9105_v54  ;;  %v3128_v42 = vcombine.high %v9205_v61, %v9208_v52  ;;  %v9445_v61 = vrot.slane %v3096_v10, %v7272_v40  ;;  %v12510_v10 = vld [vmem:[#allocation42_spill] sm:$0xff] }
 0x345   :  { %v2737_v38 = vcombine.low %v9465_v4, %v9451_v7  ;;  %v9495_v43 = vrot.slane %v3760_v12, %v7272_v40  ;;  %v4237_v31 = vcombine.low %v9486_v49, %v9489_v0  ;;  %v12517_v12 = vld [vmem:[#allocation46_spill] sm:$0xff] }
 0x346   :  { %v9390_v13 = vpop.permute.xlu0 %5895  ;;  %v9394_v26 = vpop.permute.xlu1 %5769  ;;  %v9426_v58 = vrot.slane %v2008_v9, %v7272_v40  ;;  %v9448_v52 = vrot.slane %v3128_v42, %v7272_v40  ;;  %v12508_v9 = vld [vmem:[#allocation22_spill] sm:$0xff]  ;;  %v2079_v42 = vcombine.low %v12510_v10, %v12509_v27 }
 0x347   :  { %12493 = vst [vmem:[#allocation113_spill] sm:$0xff] %v9390_v13  ;;  %12494 = vst [vmem:[#allocation125_spill] sm:$0xff] %v9394_v26  ;;  %v3825_v48 = vcombine.low %v9495_v43, %v9477_v56  ;;  %v1552_v46 = vcombine.high %v12508_v9, %v12507_v45  ;;  %v12532_v26 = vld [vmem:[#allocation112_spill] sm:$0xff]  ;;  %v12548_v13 = vld [vmem:[#allocation157_spill] sm:$0xff] }
 0x348   :  { %6123 = vrot.lane.b32.xlu0 %v2736_v2, %s7082_s5  ;;  %5997 = vrot.lane.b32.xlu1 %v3148_v36, %s7078_s30  ;;  %v2061_v51 = vcombine.low %v9426_v58, %v9429_v39  ;;  %v3149_v3 = vcombine.low %v9445_v61, %v9448_v52  ;;  %v12504_v2 = vld [vmem:[#allocation66_spill] sm:$0xff]  ;;  %v9560_v9 = vrot.slane %v2079_v42, %v12515_v19 }
 0x349   :  { %v2111_v57 = vcombine.low %v12505_v17, %v12504_v2  ;;  %v9554_v15 = vrot.slane %v1552_v46, %v12515_v19  ;;  %v1650_v42 = vcombine.high %v9432_v23, %v9413_v28  ;;  %v2062_v25 = vcombine.high %v9426_v58, %v9429_v39  ;;  %v12534_v39 = vld [vmem:[#allocation79_spill] sm:$0xff] }
 0x34a   :  { %v9400_v41 = vpop.permute.xlu0 %5899  ;;  %v9408_v5 = vpop.permute.xlu1 %5773 }
 0x34b   :  { %12495 = vst [vmem:[#allocation117_spill] sm:$0xff] %v9400_v41  ;;  %12496 = vst [vmem:[#allocation175_spill] sm:$0xff] %v9408_v5  ;;  %v1631_v46 = vcombine.low %v9554_v15, %v9535_v18 }
 0x34c   :  { %6127 = vrot.lane.b32.xlu0 %v3824_v22, %s7082_s5  ;;  %6001 = vrot.lane.b32.xlu1 %v4236_v14, %s7078_s30  ;;  %v9514_v22 = vrot.slane %v5272_v60, %v7272_v40  ;;  %v9525_v14 = vrot.slane %v4848_v37, %v7272_v40  ;;  %v9551_v37 = vrot.slane %v1536_v33, %v12515_v19 }
 0x34e   :  { %v9421_v54 = vpop.permute.xlu0 %5903  ;;  %v9423_v1 = vpop.permute.xlu1 %5777  ;;  %v5325_v35 = vcombine.low %v9514_v22, %v9517_v55 }
 0x34f   :  { %12497 = vst [vmem:[#allocation165_spill] sm:$0xff] %v9421_v54  ;;  %12498 = vst [vmem:[#allocation180_spill] sm:$0xff] %v9423_v1  ;;  %v12527_v1 = vld [vmem:[#allocation124_spill] sm:$0xff] }
 0x350   :  { %6131 = vrot.lane.b32.xlu0 %v4912_v53, %s7082_s5  ;;  %6005 = vrot.lane.b32.xlu1 %v5324_v20, %s7078_s30  ;;  %v12511_v53 = vld [vmem:[#allocation62_spill] sm:$0xff]  ;;  %v12537_v54 = vld [vmem:[#allocation108_spill] sm:$0xff] }
 0x351   :  { %v12512_v20 = vld [vmem:[#allocation54_spill] sm:$0xff] }
 0x352   :  { %v9442_v47 = vpop.permute.xlu0 %5907  ;;  %v9457_v59 = vpop.permute.xlu1 %5781  ;;  %v2095_v24 = vcombine.low %v12512_v20, %v12511_v53 }
 0x353   :  { %12499 = vst [vmem:[#allocation170_spill] sm:$0xff] %v9442_v47  ;;  %12500 = vst [vmem:[#allocation194_spill] sm:$0xff] %v9457_v59 }
 0x354   :  { %6151 = vrot.lane.b32.xlu0 %v1649_v16, %s7083_s6  ;;  %6025 = vrot.lane.b32.xlu1 %v2061_v51, %s7079_s2  ;;  %v12513_v16 = vld [vmem:[#allocation16_spill] sm:$0xff]  ;;  %v4913_v51 = vcombine.low %v9525_v14, %v9505_v11 }
 0x355   :  { %v1520_v29 = vcombine.high %v12514_v8, %v12513_v16  ;;  %v12522_v16 = vld [vmem:[#allocation128_spill] sm:$0xff] }
 0x356   :  { %v9470_v44 = vpop.permute.xlu0 %5927  ;;  %v9483_v30 = vpop.permute.xlu1 %5801  ;;  %v12523_v8 = vld [vmem:[#allocation120_spill] sm:$0xff] }
 0x357   :  { %12501 = vst [vmem:[#allocation185_spill] sm:$0xff] %v9470_v44  ;;  %12502 = vst [vmem:[#allocation197_spill] sm:$0xff] %v9483_v30  ;;  %v9569_v33 = vrot.slane %v1520_v29, %v12515_v19  ;;  %v12528_v29 = vld [vmem:[#allocation116_spill] sm:$0xff] }
 0x358   :  { %6155 = vrot.lane.b32.xlu0 %v2737_v38, %s7083_s6  ;;  %6029 = vrot.lane.b32.xlu1 %v3149_v3, %s7079_s2  ;;  %v2063_v3 = vcombine.low %v12518_v32, %v12517_v12  ;;  %v9544_v38 = vrot.slane %v2111_v57, %v12515_v19  ;;  %v9563_v57 = vrot.slane %v2095_v24, %v12515_v19  ;;  %v12531_v30 = vld [vmem:[#allocation76_spill] sm:$0xff] }
 0x359   :  { %v3183_v5 = vcombine.low %v12528_v29, %v12527_v1  ;;  %v12562_v29 = vld [vmem:[#allocation134_spill] sm:$0xff] }
 0x35a   :  { %v9500_v34 = vpop.permute.xlu0 %5931  ;;  %v9509_v36 = vpop.permute.xlu1 %5805  ;;  %v9580_v24 = vrot.slane %v2063_v3, %v12515_v19 }
 0x35b   :  { %12503 = vst [vmem:[#allocation190_spill] sm:$0xff] %v9500_v34  ;;  %12506 = vst [vmem:[#allocation222_spill] sm:$0xff] %v9509_v36  ;;  %v12538_v34 = vld [vmem:[#allocation100_spill] sm:$0xff]  ;;  %v9621_v41 = vrot.slane %v3183_v5, %v12515_v19 }
 0x35c   :  { %6159 = vrot.lane.b32.xlu0 %v3825_v48, %s7083_s6  ;;  %6033 = vrot.lane.b32.xlu1 %v4237_v31, %s7079_s2  ;;  %v12520_v48 = vld [vmem:[#allocation94_spill] sm:$0xff]  ;;  %v12521_v31 = vld [vmem:[#allocation88_spill] sm:$0xff]  ;;  %v2127_v3 = vcombine.low %v9580_v24, %v9560_v9 }
 0x35d   :  { %v2656_v45 = vcombine.high %v12521_v31, %v12520_v48  ;;  %v12524_v48 = vld [vmem:[#allocation91_spill] sm:$0xff]  ;;  %v12525_v31 = vld [vmem:[#allocation85_spill] sm:$0xff] }
 0x35e   :  { %v9537_v6 = vpop.permute.xlu0 %5935  ;;  %v9546_v60 = vpop.permute.xlu1 %5809 }
 0x35f   :  { %12516 = vst [vmem:[#allocation44_spill] sm:$0xff] %v9537_v6  ;;  %12519 = vst [vmem:[#allocation71_spill] sm:$0xff] %v9546_v60  ;;  %v3199_v60 = vcombine.low %v12523_v8, %v12522_v16  ;;  %v9595_v23 = vrot.slane %v2656_v45, %v12515_v19  ;;  %v9616_v6 = vrot.slane %v1631_v46, %v7272_v40 }
 0x360   :  { %6163 = vrot.lane.b32.xlu0 %v4913_v51, %s7083_s6  ;;  %6037 = vrot.lane.b32.xlu1 %v5325_v35, %s7079_s2  ;;  %v2640_v51 = vcombine.high %v12525_v31, %v12524_v48  ;;  %v2159_v35 = vcombine.low %v9563_v57, %v9544_v38  ;;  %v1599_v48 = vcombine.low %v9569_v33, %v9551_v37  ;;  %v12530_v31 = vld [vmem:[#allocation82_spill] sm:$0xff] }
 0x361   :  { %v2624_v28 = vcombine.high %v12531_v30, %v12530_v31  ;;  %v9603_v58 = vrot.slane %v3199_v60, %v12515_v19  ;;  %v2608_v30 = vcombine.high %v12535_v63, %v12534_v39  ;;  %v3151_v60 = vcombine.low %v12538_v34, %v12537_v54  ;;  %v12557_v54 = vld [vmem:[#allocation203_spill] sm:$0xff] }
 0x362   :  { %v9575_v36 = vpop.permute.xlu0 %5939  ;;  %v9586_v50 = vpop.permute.xlu1 %5813  ;;  %v9609_v45 = vrot.slane %v2640_v51, %v12515_v19  ;;  %v3150_v63 = vcombine.high %v9445_v61, %v9448_v52  ;;  %v9628_v51 = vrot.slane %v2159_v35, %v7272_v40  ;;  %v9646_v52 = vrot.slane %v2127_v3, %v7272_v40  ;;  %v12540_v35 = vld [vmem:[#allocation159_spill] sm:$0xff]  ;;  %v12544_v3 = vld [vmem:[#allocation181_spill] sm:$0xff] }
 0x363   :  { %12526 = vst [vmem:[#allocation183_spill] sm:$0xff] %v9575_v36  ;;  %12529 = vst [vmem:[#allocation114_spill] sm:$0xff] %v9586_v50  ;;  %v12533_v50 = vld [vmem:[#allocation104_spill] sm:$0xff]  ;;  %v9631_v39 = vrot.slane %v2624_v28, %v12515_v19  ;;  %v3247_v61 = vcombine.low %v9621_v41, %v9603_v58  ;;  %v9649_v46 = vrot.slane %v2608_v30, %v12515_v19  ;;  %v12541_v28 = vld [vmem:[#allocation153_spill] sm:$0xff] }
 0x364   :  { %6183 = vrot.lane.b32.xlu0 %v1650_v42, %s7084_s7  ;;  %v3167_v59 = vcombine.low %v12533_v50, %v12532_v26  ;;  %6057 = vrot.lane.b32.xlu1 %v2062_v25, %s7080_s3  ;;  %v2738_v42 = vcombine.high %v9465_v4, %v9451_v7  ;;  %v2719_v7 = vcombine.low %v9609_v45, %v9595_v23 }
 0x365   :  { %v9637_v4 = vrot.slane %v1599_v48, %v7272_v40  ;;  %v9660_v62 = vrot.slane %v3151_v60, %v12515_v19  ;;  %v4238_v30 = vcombine.high %v9486_v49, %v9489_v0  ;;  %v12549_v60 = vld [vmem:[#allocation150_spill] sm:$0xff] }
 0x366   :  { %v9611_v31 = vpop.permute.xlu0 %5959  ;;  %v9623_v25 = vpop.permute.xlu1 %5833  ;;  %v9640_v5 = vrot.slane %v3167_v59, %v12515_v19  ;;  %v3826_v59 = vcombine.high %v9495_v43, %v9477_v56  ;;  %v2687_v56 = vcombine.low %v9649_v46, %v9631_v39  ;;  %v12546_v43 = vld [vmem:[#allocation146_spill] sm:$0xff]  ;;  %v3728_v36 = vcombine.high %v12549_v60, %v12548_v13  ;;  %v12554_v13 = vld [vmem:[#allocation143_spill] sm:$0xff] }
 0x367   :  { %12536 = vst [vmem:[#allocation64_spill] sm:$0xff] %v9611_v31  ;;  %12539 = vst [vmem:[#allocation106_spill] sm:$0xff] %v9623_v25  ;;  %v1651_v48 = vcombine.low %v9637_v4, %v9616_v6  ;;  %v9678_v47 = vrot.slane %v2719_v7, %v7272_v40  ;;  %v12550_v0 = vld [vmem:[#allocation174_spill] sm:$0xff] }
 0x368   :  { %6187 = vrot.lane.b32.xlu0 %v2738_v42, %s7084_s7  ;;  %6061 = vrot.lane.b32.xlu1 %v3150_v63, %s7080_s3  ;;  %v3744_v42 = vcombine.high %v12541_v28, %v12540_v35  ;;  %v12543_v63 = vld [vmem:[#allocation187_spill] sm:$0xff]  ;;  %v2191_v35 = vcombine.low %v9646_v52, %v9628_v51  ;;  %v3215_v49 = vcombine.low %v9660_v62, %v9640_v5  ;;  %v12556_v60 = vld [vmem:[#allocation206_spill] sm:$0xff] }
 0x369   :  { %v4287_v31 = vcombine.low %v12544_v3, %v12543_v63  ;;  %v12547_v28 = vld [vmem:[#allocation139_spill] sm:$0xff]  ;;  %v12552_v3 = vld [vmem:[#allocation184_spill] sm:$0xff]  ;;  %v12553_v63 = vld [vmem:[#allocation178_spill] sm:$0xff]  ;;  %v4832_v50 = vcombine.high %v12557_v54, %v12556_v60  ;;  %v9716_v60 = vrot.slane %v3728_v36, %v12515_v19 }
 0x36a   :  { %v9653_v25 = vpop.permute.xlu0 %5963  ;;  %v9664_v44 = vpop.permute.xlu1 %5837  ;;  %v4271_v34 = vcombine.low %v12553_v63, %v12552_v3  ;;  %v9693_v7 = vrot.slane %v3744_v42, %v12515_v19  ;;  %v12559_v63 = vld [vmem:[#allocation171_spill] sm:$0xff]  ;;  %v12560_v3 = vld [vmem:[#allocation164_spill] sm:$0xff]  ;;  %v5326_v42 = vcombine.high %v9514_v22, %v9517_v55 }
 0x36b   :  { %12542 = vst [vmem:[#allocation66_spill] sm:$0xff] %v9653_v25  ;;  %12545 = vst [vmem:[#allocation58_spill] sm:$0xff] %v9664_v44  ;;  %v3712_v25 = vcombine.high %v12547_v28, %v12546_v43  ;;  %v12551_v44 = vld [vmem:[#allocation168_spill] sm:$0xff]  ;;  %v9688_v43 = vrot.slane %v3247_v61, %v7272_v40  ;;  %v9704_v61 = vrot.slane %v4287_v31, %v12515_v19  ;;  %v12568_v22 = vld [vmem:[#allocation215_spill] sm:$0xff] }
 0x36c   :  { %6191 = vrot.lane.b32.xlu0 %v3826_v59, %s7084_s7  ;;  %v4255_v21 = vcombine.low %v12551_v44, %v12550_v0  ;;  %6065 = vrot.lane.b32.xlu1 %v4238_v30, %s7080_s3  ;;  %v12555_v28 = vld [vmem:[#allocation136_spill] sm:$0xff]  ;;  %v4914_v44 = vcombine.high %v9525_v14, %v9505_v11  ;;  %v4239_v30 = vcombine.low %v12560_v3, %v12559_v63  ;;  %v12564_v11 = vld [vmem:[#allocation198_spill] sm:$0xff]  ;;  %v12565_v14 = vld [vmem:[#allocation193_spill] sm:$0xff] }
 0x36d   :  { %v3696_v59 = vcombine.high %v12555_v28, %v12554_v13  ;;  %v12561_v0 = vld [vmem:[#allocation40_spill] sm:$0xff]  ;;  %v9713_v54 = vrot.slane %v3712_v25, %v12515_v19  ;;  %v12569_v55 = vld [vmem:[#allocation211_spill] sm:$0xff] }
 0x36e   :  { %v9697_v26 = vpop.permute.xlu0 %5967  ;;  %v5375_v13 = vcombine.low %v12562_v29, %v12561_v0  ;;  %v9708_v28 = vpop.permute.xlu1 %5841  ;;  %v12566_v3 = vld [vmem:[#allocation204_spill] sm:$0xff]  ;;  %v9724_v29 = vrot.slane %v4255_v21, %v12515_v19  ;;  %v5343_v25 = vcombine.low %v12569_v55, %v12568_v22  ;;  %v12570_v0 = vld [vmem:[#allocation217_spill] sm:$0xff]  ;;  %v12573_v21 = vld [vmem:[#allocation191_spill] sm:$0xff]  ;;  %v9747_v55 = vrot.slane %v4239_v30, %v12515_v19 }
 0x36f   :  { %12558 = vst [vmem:[#allocation28_spill] sm:$0xff] %v9697_v26  ;;  %12563 = vst [vmem:[#allocation22_spill] sm:$0xff] %v9708_v28  ;;  %v4800_v26 = vcombine.high %v12565_v14, %v12564_v11  ;;  %v12567_v31 = vld [vmem:[#allocation200_spill] sm:$0xff]  ;;  %v9727_v28 = vrot.slane %v4271_v34, %v12515_v19  ;;  %v9735_v11 = vrot.slane %v3696_v59, %v12515_v19  ;;  %v12576_v59 = vld [vmem:[#allocation210_spill] sm:$0xff] }
 0x370   :  { %v4816_v63 = vcombine.high %v12567_v31, %v12566_v3  ;;  %6195 = vrot.lane.b32.xlu0 %v4914_v44, %s7084_s7  ;;  %v12571_v36 = vld [vmem:[#allocation148_spill] sm:$0xff]  ;;  %6069 = vrot.lane.b32.xlu1 %v5326_v42, %s7080_s3  ;;  %v3807_v44 = vcombine.low %v9716_v60, %v9693_v7  ;;  %v9742_v34 = vrot.slane %v4832_v50, %v12515_v19 }
 0x371   :  { %v5359_v1 = vcombine.low %v12571_v36, %v12570_v0  ;;  %v12572_v3 = vld [vmem:[#allocation196_spill] sm:$0xff]  ;;  %v4335_v42 = vcombine.low %v9727_v28, %v9704_v61  ;;  %v12575_v36 = vld [vmem:[#allocation213_spill] sm:$0xff]  ;;  %v9754_v22 = vrot.slane %v5375_v13, %v12515_v19  ;;  %v3775_v50 = vcombine.low %v9735_v11, %v9713_v54 }
 0x372   :  { %v4784_v14 = vcombine.high %v12573_v21, %v12572_v3  ;;  %v9744_v31 = vpop.permute.xlu0 %5971  ;;  %v5327_v0 = vcombine.low %v12576_v59, %v12575_v36  ;;  %v9756_v8 = vpop.permute.xlu1 %5845  ;;  %v9761_v3 = vrot.slane %v4800_v26, %v12515_v19  ;;  %v9764_v30 = vrot.slane %v4816_v63, %v12515_v19 }
 0x373   :  { %12574 = vst [vmem:[#allocation50_spill] sm:$0xff] %v9744_v31  ;;  %12577 = vst [vmem:[#allocation16_spill] sm:$0xff] %v9756_v8  ;;  %v2695_v21 = vrot.slane %v2687_v56, %v7272_v40  ;;  %v4303_v13 = vcombine.low %v9747_v55, %v9724_v29  ;;  %v9771_v31 = vrot.slane %v5343_v25, %v12515_v19 }
 0x374   :  { %6215 = vrot.lane.b32.xlu0 %v1651_v48, %s7085_s8  ;;  %v9774_v8 = vrot.slane %v5359_v1, %v12515_v19  ;;  %6089 = vrot.lane.b32.xlu1 %v2191_v35, %s7081_s4  ;;  %v3223_v26 = vrot.slane %v3215_v49, %v7272_v40  ;;  %v9779_v63 = vrot.slane %v4784_v14, %v12515_v19 }
 0x375   :  { %v4895_v48 = vcombine.low %v9764_v30, %v9742_v34  ;;  %v2739_v59 = vcombine.low %v2695_v21, %v9678_v47  ;;  %v3815_v25 = vrot.slane %v3807_v44, %v7272_v40  ;;  %v9788_v36 = vrot.slane %v5327_v0, %v12515_v19 }
 0x376   :  { %v9783_v56 = vpop.permute.xlu0 %5991  ;;  %v5423_v1 = vcombine.low %v9774_v8, %v9754_v22  ;;  %v9792_v35 = vpop.permute.xlu1 %5865  ;;  %v3279_v49 = vcombine.low %v3223_v26, %v9688_v43  ;;  %v4343_v14 = vrot.slane %v4335_v42, %v7272_v40  ;;  %v4863_v16 = vcombine.low %v9779_v63, %v9761_v3 }
 0x377   :  { %12578 = vst [vmem:[#allocation8_spill] sm:$0xff] %v9783_v56  ;;  %12579 = vst [vmem:[#allocation94_spill] sm:$0xff] %v9792_v35  ;;  %v3783_v56 = vrot.slane %v3775_v50, %v7272_v40  ;;  %v5391_v0 = vcombine.low %v9788_v36, %v9771_v31  ;;  %v4311_v44 = vrot.slane %v4303_v13, %v7272_v40 }
 0x378   :  { %6219 = vrot.lane.b32.xlu0 %v2739_v59, %s7085_s8  ;;  %6093 = vrot.lane.b32.xlu1 %v3279_v49, %s7081_s4  ;;  %v4903_v12 = vrot.slane %v4895_v48, %v7272_v40  ;;  %v5431_v53 = vrot.slane %v5423_v1, %v7272_v40  ;;  %v4871_v59 = vrot.slane %v4863_v16, %v7272_v40 }
 0x379   :  { %v3827_v35 = vcombine.low %v3783_v56, %v3815_v25  ;;  %v4367_v20 = vcombine.low %v4311_v44, %v4343_v14  ;;  %v5399_v50 = vrot.slane %v5391_v0, %v7272_v40  ;;  %v1652_v1 = vcombine.high %v9637_v4, %v9616_v6 }
 0x37a   :  { %v9804_v32 = vpop.permute.xlu0 %5995  ;;  %v9807_v42 = vpop.permute.xlu1 %5869  ;;  %v4915_v13 = vcombine.low %v4871_v59, %v4903_v12  ;;  %v2740_v0 = vcombine.high %v2695_v21, %v9678_v47  ;;  %v1632_v6 = vcombine.high %v9554_v15, %v9535_v18  ;;  %v3828_v4 = vcombine.high %v3783_v56, %v3815_v25  ;;  %v12594_v25 = vld [vmem:[#allocation15_spill] sm:$0xff] }
 0x37b   :  { %12580 = vst [vmem:[#allocation88_spill] sm:$0xff] %v9804_v32  ;;  %12581 = vst [vmem:[#allocation91_spill] sm:$0xff] %v9807_v42  ;;  %v5455_v10 = vcombine.low %v5399_v50, %v5431_v53  ;;  %v4368_v47 = vcombine.high %v4311_v44, %v4343_v14  ;;  %v1600_v21 = vcombine.high %v9569_v33, %v9551_v37  ;;  %v12595_v14 = vld [vmem:[#allocation9_spill] sm:$0xff] }
 0x37c   :  { %6223 = vrot.lane.b32.xlu0 %v3827_v35, %s7085_s8  ;;  %6097 = vrot.lane.b32.xlu1 %v4367_v20, %s7081_s4  ;;  %v2192_v20 = vcombine.high %v9646_v52, %v9628_v51  ;;  %v2160_v52 = vcombine.high %v9563_v57, %v9544_v38  ;;  %v2720_v18 = vcombine.high %v9609_v45, %v9595_v23 }
 0x37d   :  { %v9857_v38 = vrot.slane %v1632_v6, %v7272_v40  ;;  %v3248_v57 = vcombine.high %v9621_v41, %v9603_v58  ;;  %v5456_v33 = vcombine.high %v5399_v50, %v5431_v53  ;;  %v3808_v53 = vcombine.high %v9716_v60, %v9693_v7 }
 0x37e   :  { %v9814_v49 = vpop.permute.xlu0 %5999  ;;  %v9816_v32 = vpop.permute.xlu1 %5873  ;;  %v9864_v56 = vrot.slane %v2160_v52, %v7272_v40  ;;  %v9885_v45 = vrot.slane %v2720_v18, %v7272_v40  ;;  %v3776_v7 = vcombine.high %v9735_v11, %v9713_v54  ;;  %v1655_v44 = vcombine.low %v12595_v14, %v12594_v25 }
 0x37f   :  { %12582 = vst [vmem:[#allocation85_spill] sm:$0xff] %v9814_v49  ;;  %12583 = vst [vmem:[#allocation82_spill] sm:$0xff] %v9816_v32  ;;  %v4896_v54 = vcombine.high %v9764_v30, %v9742_v34  ;;  %v9917_v50 = vrot.slane %v3808_v53, %v7272_v40  ;;  %v12600_v30 = vld [vmem:[#allocation27_spill] sm:$0xff]  ;;  %v4864_v18 = vcombine.high %v9779_v63, %v9761_v3  ;;  %v12623_v49 = vld [vmem:[#allocation120_spill] sm:$0xff] }
 0x380   :  { %6227 = vrot.lane.b32.xlu0 %v4915_v13, %s7085_s8  ;;  %6101 = vrot.lane.b32.xlu1 %v5455_v10, %s7081_s4  ;;  %v3280_v13 = vcombine.high %v3223_v26, %v9688_v43  ;;  %v2128_v43 = vcombine.high %v9580_v24, %v9560_v9  ;;  %v4916_v26 = vcombine.high %v4871_v59, %v4903_v12  ;;  %v12618_v32 = vld [vmem:[#allocation87_spill] sm:$0xff] }
 0x381   :  { %v2688_v9 = vcombine.high %v9649_v46, %v9631_v39  ;;  %v9870_v24 = vrot.slane %v1600_v21, %v7272_v40  ;;  %v3216_v12 = vcombine.high %v9660_v62, %v9640_v5  ;;  %v4336_v39 = vcombine.high %v9727_v28, %v9704_v61  ;;  %v12603_v21 = vld [vmem:[#allocation24_spill] sm:$0xff] }
 0x382   :  { %v9820_v48 = vpop.permute.xlu0 %6003  ;;  %v9824_v16 = vpop.permute.xlu1 %5877  ;;  %v9876_v41 = vrot.slane %v2128_v43, %v7272_v40  ;;  %v9894_v46 = vrot.slane %v3248_v57, %v7272_v40  ;;  %v4304_v61 = vcombine.high %v9747_v55, %v9724_v29  ;;  %v12597_v29 = vld [vmem:[#allocation18_spill] sm:$0xff]  ;;  %v12598_v55 = vld [vmem:[#allocation12_spill] sm:$0xff] }
 0x383   :  { %12584 = vst [vmem:[#allocation76_spill] sm:$0xff] %v9820_v48  ;;  %12585 = vst [vmem:[#allocation79_spill] sm:$0xff] %v9824_v16  ;;  %v1653_v58 = vcombine.low %v9870_v24, %v9857_v38  ;;  %v9900_v60 = vrot.slane %v2688_v9, %v7272_v40  ;;  %v9906_v28 = vrot.slane %v3216_v12, %v7272_v40  ;;  %v12636_v48 = vld [vmem:[#allocation149_spill] sm:$0xff] }
 0x384   :  { %6247 = vrot.lane.b32.xlu0 %v1652_v1, %s7086_s9  ;;  %6121 = vrot.lane.b32.xlu1 %v2192_v20, %s7082_s5  ;;  %v2193_v5 = vcombine.low %v9876_v41, %v9864_v56  ;;  %v1671_v20 = vcombine.low %v12598_v55, %v12597_v29  ;;  %v9928_v34 = vrot.slane %v4336_v39, %v7272_v40 }
 0x385   :  { %v2741_v59 = vcombine.low %v9900_v60, %v9885_v45  ;;  %v3281_v6 = vcombine.low %v9906_v28, %v9894_v46  ;;  %v9946_v57 = vrot.slane %v4304_v61, %v7272_v40  ;;  %v9956_v9 = vrot.slane %v4896_v54, %v7272_v40  ;;  %v12610_v54 = vld [vmem:[#allocation38_spill] sm:$0xff] }
 0x386   :  { %v9830_v35 = vpop.permute.xlu0 %6023  ;;  %v9833_v10 = vpop.permute.xlu1 %5897 }
 0x387   :  { %12586 = vst [vmem:[#allocation73_spill] sm:$0xff] %v9830_v35  ;;  %12587 = vst [vmem:[#allocation159_spill] sm:$0xff] %v9833_v10  ;;  %v12632_v35 = vld [vmem:[#allocation135_spill] sm:$0xff] }
 0x388   :  { %6251 = vrot.lane.b32.xlu0 %v2740_v0, %s7086_s9  ;;  %6125 = vrot.lane.b32.xlu1 %v3280_v13, %s7082_s5  ;;  %v5424_v0 = vcombine.high %v9774_v8, %v9754_v22  ;;  %v9938_v8 = vrot.slane %v3776_v7, %v7272_v40  ;;  %v2112_v22 = vcombine.high %v12505_v17, %v12504_v2  ;;  %v12605_v2 = vld [vmem:[#allocation42_spill] sm:$0xff] }
 0x389   :  { %v2080_v17 = vcombine.high %v12605_v2, %v12509_v27  ;;  %v9980_v27 = vrot.slane %v4864_v18, %v7272_v40  ;;  %v12616_v18 = vld [vmem:[#allocation84_spill] sm:$0xff] }
 0x38a   :  { %v9840_v51 = vpop.permute.xlu0 %6027  ;;  %v9844_v1 = vpop.permute.xlu1 %5901  ;;  %v3829_v63 = vcombine.low %v9938_v8, %v9917_v50  ;;  %v9967_v39 = vrot.slane %v5424_v0, %v7272_v40  ;;  %v9985_v0 = vrot.slane %v2112_v22, %v12515_v19 }
 0x38b   :  { %12588 = vst [vmem:[#allocation153_spill] sm:$0xff] %v9840_v51  ;;  %12589 = vst [vmem:[#allocation146_spill] sm:$0xff] %v9844_v1  ;;  %v4917_v22 = vcombine.low %v9980_v27, %v9956_v9  ;;  %v10004_v1 = vrot.slane %v2080_v17, %v12515_v19 }
 0x38c   :  { %6255 = vrot.lane.b32.xlu0 %v3828_v4, %s7086_s9  ;;  %6129 = vrot.lane.b32.xlu1 %v4368_v47, %s7082_s5  ;;  %v12601_v4 = vld [vmem:[#allocation21_spill] sm:$0xff]  ;;  %v12602_v47 = vld [vmem:[#allocation31_spill] sm:$0xff] }
 0x38d   :  { %v1687_v52 = vcombine.low %v12601_v4, %v12600_v30  ;;  %v1703_v43 = vcombine.low %v12603_v21, %v12602_v47 }
 0x38e   :  { %v9854_v15 = vpop.permute.xlu0 %6031  ;;  %v9861_v37 = vpop.permute.xlu1 %5905 }
 0x38f   :  { %12590 = vst [vmem:[#allocation139_spill] sm:$0xff] %v9854_v15  ;;  %12591 = vst [vmem:[#allocation157_spill] sm:$0xff] %v9861_v37  ;;  %v9973_v7 = vrot.slane %v1687_v52, %v12515_v19  ;;  %v9976_v61 = vrot.slane %v1703_v43, %v12515_v19  ;;  %v12613_v43 = vld [vmem:[#allocation81_spill] sm:$0xff]  ;;  %v12622_v15 = vld [vmem:[#allocation128_spill] sm:$0xff] }
 0x390   :  { %6259 = vrot.lane.b32.xlu0 %v4916_v26, %s7086_s9  ;;  %6133 = vrot.lane.b32.xlu1 %v5456_v33, %s7082_s5  ;;  %v5392_v26 = vcombine.high %v9788_v36, %v9771_v31  ;;  %v9949_v33 = vrot.slane %v1655_v44, %v12515_v19  ;;  %v12606_v36 = vld [vmem:[#allocation62_spill] sm:$0xff] }
 0x391   :  { %v12607_v31 = vld [vmem:[#allocation54_spill] sm:$0xff]  ;;  %v1751_v10 = vcombine.low %v9973_v7, %v9976_v61 }
 0x392   :  { %v9880_v23 = vpop.permute.xlu0 %6035  ;;  %v9889_v62 = vpop.permute.xlu1 %5909  ;;  %v2096_v12 = vcombine.high %v12607_v31, %v12606_v36  ;;  %v12609_v44 = vld [vmem:[#allocation46_spill] sm:$0xff]  ;;  %v9991_v52 = vrot.slane %v5392_v26, %v7272_v40  ;;  %v12614_v36 = vld [vmem:[#allocation75_spill] sm:$0xff] }
 0x393   :  { %12592 = vst [vmem:[#allocation150_spill] sm:$0xff] %v9880_v23  ;;  %12593 = vst [vmem:[#allocation143_spill] sm:$0xff] %v9889_v62  ;;  %v12615_v31 = vld [vmem:[#allocation90_spill] sm:$0xff]  ;;  %v10056_v51 = vrot.slane %v1751_v10, %v7272_v40  ;;  %v12635_v23 = vld [vmem:[#allocation156_spill] sm:$0xff] }
 0x394   :  { %6279 = vrot.lane.b32.xlu0 %v1653_v58, %s7087_s10  ;;  %6153 = vrot.lane.b32.xlu1 %v2193_v5, %s7083_s6  ;;  %v4369_v58 = vcombine.low %v9946_v57, %v9928_v34  ;;  %v9970_v5 = vrot.slane %v1671_v20, %v12515_v19  ;;  %v12612_v20 = vld [vmem:[#allocation72_spill] sm:$0xff]  ;;  %v2775_v37 = vcombine.low %v12616_v18, %v12615_v31  ;;  %v12652_v18 = vld [vmem:[#allocation205_spill] sm:$0xff] }
 0x395   :  { %v10007_v26 = vrot.slane %v2096_v12, %v12515_v19  ;;  %v5457_v42 = vcombine.low %v9991_v52, %v9967_v39  ;;  %v1654_v12 = vcombine.high %v9870_v24, %v9857_v38  ;;  %v3200_v38 = vcombine.high %v12623_v49, %v12622_v15  ;;  %v12653_v31 = vld [vmem:[#allocation216_spill] sm:$0xff] }
 0x396   :  { %v9912_v11 = vpop.permute.xlu0 %6055  ;;  %v9923_v13 = vpop.permute.xlu1 %5929 }
 0x397   :  { %12596 = vst [vmem:[#allocation136_spill] sm:$0xff] %v9912_v11  ;;  %12599 = vst [vmem:[#allocation206_spill] sm:$0xff] %v9923_v13  ;;  %v1719_v13 = vcombine.low %v9949_v33, %v9970_v5  ;;  %v2175_v17 = vcombine.low %v10007_v26, %v9985_v0  ;;  %v10072_v10 = vrot.slane %v3200_v38, %v12515_v19  ;;  %v12638_v38 = vld [vmem:[#allocation152_spill] sm:$0xff] }
 0x398   :  { %6283 = vrot.lane.b32.xlu0 %v2741_v59, %s7087_s10  ;;  %6157 = vrot.lane.b32.xlu1 %v3281_v6, %s7083_s6  ;;  %v2064_v59 = vcombine.high %v12610_v54, %v12609_v44  ;;  %v12611_v6 = vld [vmem:[#allocation78_spill] sm:$0xff] }
 0x399   :  { %v2743_v2 = vcombine.low %v12612_v20, %v12611_v6 }
 0x39a   :  { %v9951_v3 = vpop.permute.xlu0 %6059  ;;  %v9962_v53 = vpop.permute.xlu1 %5933  ;;  %v10019_v62 = vrot.slane %v2064_v59, %v12515_v19 }
 0x39b   :  { %12604 = vst [vmem:[#allocation203_spill] sm:$0xff] %v9951_v3  ;;  %12608 = vst [vmem:[#allocation198_spill] sm:$0xff] %v9962_v53  ;;  %v12617_v53 = vld [vmem:[#allocation93_spill] sm:$0xff]  ;;  %v10053_v3 = vrot.slane %v1719_v13, %v7272_v40  ;;  %v12629_v13 = vld [vmem:[#allocation104_spill] sm:$0xff] }
 0x39c   :  { %6287 = vrot.lane.b32.xlu0 %v3829_v63, %s7087_s10  ;;  %6161 = vrot.lane.b32.xlu1 %v4369_v58, %s7083_s6  ;;  %v2759_v63 = vcombine.low %v12614_v36, %v12613_v43  ;;  %v2791_v44 = vcombine.low %v12618_v32, %v12617_v53  ;;  %v12640_v53 = vld [vmem:[#allocation100_spill] sm:$0xff]  ;;  %v12654_v36 = vld [vmem:[#allocation214_spill] sm:$0xff]  ;;  %v12655_v43 = vld [vmem:[#allocation221_spill] sm:$0xff] }
 0x39e   :  { %v9999_v54 = vpop.permute.xlu0 %6063  ;;  %v10009_v58 = vpop.permute.xlu1 %5937  ;;  %v10030_v16 = vrot.slane %v2759_v63, %v12515_v19  ;;  %v10036_v59 = vrot.slane %v2791_v44, %v12515_v19  ;;  %v12626_v63 = vld [vmem:[#allocation116_spill] sm:$0xff] }
 0x39f   :  { %12619 = vst [vmem:[#allocation193_spill] sm:$0xff] %v9999_v54  ;;  %12620 = vst [vmem:[#allocation204_spill] sm:$0xff] %v10009_v58  ;;  %v10027_v58 = vrot.slane %v2743_v2, %v12515_v19  ;;  %v2194_v2 = vcombine.high %v9876_v41, %v9864_v56  ;;  %v2742_v41 = vcombine.high %v9900_v60, %v9885_v45  ;;  %v12633_v60 = vld [vmem:[#allocation145_spill] sm:$0xff] }
 0x3a0   :  { %6291 = vrot.lane.b32.xlu0 %v4917_v22, %s7087_s10  ;;  %6165 = vrot.lane.b32.xlu1 %v5457_v42, %s7083_s6  ;;  %v10033_v22 = vrot.slane %v2775_v37, %v12515_v19  ;;  %v2143_v42 = vcombine.low %v10019_v62, %v10004_v1  ;;  %v12625_v37 = vld [vmem:[#allocation124_spill] sm:$0xff] }
 0x3a1   :  { %v3184_v44 = vcombine.high %v12626_v63, %v12625_v37  ;;  %v2807_v49 = vcombine.low %v10027_v58, %v10030_v16 }
 0x3a2   :  { %v10038_v54 = vpop.permute.xlu0 %6067  ;;  %v10044_v24 = vpop.permute.xlu1 %5941  ;;  %v2839_v15 = vcombine.low %v10033_v22, %v10036_v59  ;;  %v10079_v11 = vrot.slane %v2143_v42, %v7272_v40  ;;  %v1783_v42 = vcombine.low %v10053_v3, %v10056_v51 }
 0x3a3   :  { %12621 = vst [vmem:[#allocation200_spill] sm:$0xff] %v10038_v54  ;;  %12624 = vst [vmem:[#allocation196_spill] sm:$0xff] %v10044_v24  ;;  %v3282_v24 = vcombine.high %v9906_v28, %v9894_v46  ;;  %v10093_v28 = vrot.slane %v3184_v44, %v12515_v19 }
 0x3a4   :  { %6311 = vrot.lane.b32.xlu0 %v1654_v12, %s7088_s11  ;;  %6185 = vrot.lane.b32.xlu1 %v2194_v2, %s7084_s7  ;;  %v10067_v12 = vrot.slane %v2175_v17, %v7272_v40  ;;  %v12628_v2 = vld [vmem:[#allocation112_spill] sm:$0xff]  ;;  %v12634_v17 = vld [vmem:[#allocation138_spill] sm:$0xff] }
 0x3a5   :  { %v3168_v37 = vcombine.high %v12629_v13, %v12628_v2  ;;  %v3847_v54 = vcombine.low %v12634_v17, %v12633_v60  ;;  %v3863_v2 = vcombine.low %v12636_v48, %v12635_v23  ;;  %v12637_v13 = vld [vmem:[#allocation160_spill] sm:$0xff]  ;;  %v3830_v48 = vcombine.high %v9938_v8, %v9917_v50 }
 0x3a6   :  { %v10062_v56 = vpop.permute.xlu0 %6087  ;;  %v10074_v63 = vpop.permute.xlu1 %5961  ;;  %v3879_v32 = vcombine.low %v12638_v38, %v12637_v13  ;;  %v2195_v38 = vcombine.low %v10079_v11, %v10067_v12  ;;  %v4370_v50 = vcombine.high %v9946_v57, %v9928_v34  ;;  %v12647_v57 = vld [vmem:[#allocation184_spill] sm:$0xff] }
 0x3a7   :  { %12627 = vst [vmem:[#allocation191_spill] sm:$0xff] %v10062_v56  ;;  %12630 = vst [vmem:[#allocation15_spill] sm:$0xff] %v10074_v63  ;;  %v12631_v56 = vld [vmem:[#allocation142_spill] sm:$0xff]  ;;  %v12639_v63 = vld [vmem:[#allocation108_spill] sm:$0xff]  ;;  %v10111_v44 = vrot.slane %v3168_v37, %v12515_v19 }
 0x3a8   :  { %v3831_v45 = vcombine.low %v12632_v35, %v12631_v56  ;;  %6315 = vrot.lane.b32.xlu0 %v2742_v41, %s7088_s11  ;;  %v3152_v46 = vcombine.high %v12640_v53, %v12639_v63  ;;  %6189 = vrot.lane.b32.xlu1 %v3282_v24, %s7084_s7  ;;  %v10105_v41 = vrot.slane %v2807_v49, %v7272_v40  ;;  %v12642_v63 = vld [vmem:[#allocation187_spill] sm:$0xff]  ;;  %v12649_v35 = vld [vmem:[#allocation209_spill] sm:$0xff] }
 0x3a9   :  { %v10108_v53 = vrot.slane %v2839_v15, %v7272_v40  ;;  %v3263_v24 = vcombine.low %v10093_v28, %v10072_v10  ;;  %v10125_v49 = vrot.slane %v3847_v54, %v12515_v19  ;;  %v10128_v15 = vrot.slane %v3863_v2, %v12515_v19  ;;  %v12650_v54 = vld [vmem:[#allocation202_spill] sm:$0xff]  ;;  %v12651_v2 = vld [vmem:[#allocation212_spill] sm:$0xff] }
 0x3aa   :  { %v10098_v17 = vpop.permute.xlu0 %6091  ;;  %v10117_v23 = vpop.permute.xlu1 %5965  ;;  %v10122_v8 = vrot.slane %v3831_v45, %v12515_v19  ;;  %v10131_v37 = vrot.slane %v3879_v32, %v12515_v19  ;;  %v12648_v45 = vld [vmem:[#allocation178_spill] sm:$0xff]  ;;  %v4919_v56 = vcombine.low %v12650_v54, %v12649_v35  ;;  %v4935_v32 = vcombine.low %v12652_v18, %v12651_v2 }
 0x3ab   :  { %12641 = vst [vmem:[#allocation9_spill] sm:$0xff] %v10098_v17  ;;  %v12643_v17 = vld [vmem:[#allocation181_spill] sm:$0xff]  ;;  %12644 = vst [vmem:[#allocation18_spill] sm:$0xff] %v10117_v23  ;;  %v12646_v23 = vld [vmem:[#allocation168_spill] sm:$0xff]  ;;  %v4272_v60 = vcombine.high %v12648_v45, %v12647_v57 }
 0x3ac   :  { %v4288_v13 = vcombine.high %v12643_v17, %v12642_v63  ;;  %6319 = vrot.lane.b32.xlu0 %v3830_v48, %s7088_s11  ;;  %v10135_v17 = vrot.slane %v3152_v46, %v12515_v19  ;;  %v12645_v63 = vld [vmem:[#allocation174_spill] sm:$0xff]  ;;  %6193 = vrot.lane.b32.xlu1 %v4370_v50, %s7084_s7  ;;  %v4951_v48 = vcombine.low %v12654_v36, %v12653_v31  ;;  %v12656_v46 = vld [vmem:[#allocation141_spill] sm:$0xff]  ;;  %v12659_v57 = vld [vmem:[#allocation164_spill] sm:$0xff] }
 0x3ad   :  { %v4256_v34 = vcombine.high %v12646_v23, %v12645_v63  ;;  %v4967_v20 = vcombine.low %v12656_v46, %v12655_v43  ;;  %v4918_v23 = vcombine.high %v9980_v27, %v9956_v9  ;;  %v12658_v63 = vld [vmem:[#allocation171_spill] sm:$0xff]  ;;  %v12660_v50 = vld [vmem:[#allocation40_spill] sm:$0xff]  ;;  %v12661_v35 = vld [vmem:[#allocation134_spill] sm:$0xff]  ;;  %v5458_v36 = vcombine.high %v9991_v52, %v9967_v39 }
 0x3ae   :  { %v10150_v6 = vpop.permute.xlu0 %6095  ;;  %v4240_v45 = vcombine.high %v12659_v57, %v12658_v63  ;;  %v10157_v54 = vrot.slane %v4288_v13, %v12515_v19  ;;  %v5376_v18 = vcombine.high %v12661_v35, %v12660_v50  ;;  %v10161_v2 = vpop.permute.xlu1 %5969  ;;  %v3895_v9 = vcombine.low %v10122_v8, %v10125_v49  ;;  %v12663_v39 = vld [vmem:[#allocation215_spill] sm:$0xff]  ;;  %v12665_v50 = vld [vmem:[#allocation217_spill] sm:$0xff] }
 0x3af   :  { %12657 = vst [vmem:[#allocation12_spill] sm:$0xff] %v10150_v6  ;;  %12662 = vst [vmem:[#allocation27_spill] sm:$0xff] %v10161_v2  ;;  %v3231_v6 = vcombine.low %v10135_v17, %v10111_v44  ;;  %v3927_v27 = vcombine.low %v10128_v15, %v10131_v37  ;;  %v10173_v13 = vrot.slane %v3263_v24, %v7272_v40  ;;  %v12664_v52 = vld [vmem:[#allocation211_spill] sm:$0xff]  ;;  %v12666_v2 = vld [vmem:[#allocation148_spill] sm:$0xff] }
 0x3b0   :  { %6323 = vrot.lane.b32.xlu0 %v4918_v23, %s7088_s11  ;;  %v10176_v35 = vrot.slane %v4256_v34, %v12515_v19  ;;  %v10179_v63 = vrot.slane %v4272_v60, %v12515_v19  ;;  %v5344_v57 = vcombine.high %v12664_v52, %v12663_v39  ;;  %v5360_v46 = vcombine.high %v12666_v2, %v12665_v50  ;;  %v12669_v2 = vld [vmem:[#allocation213_spill] sm:$0xff] }
 0x3b1   :  { %6197 = vrot.lane.b32.xlu1 %v5458_v36, %s7084_s7  ;;  %v10187_v43 = vrot.slane %v4919_v56, %v12515_v19  ;;  %v10190_v24 = vrot.slane %v4935_v32, %v12515_v19  ;;  %v10193_v34 = vrot.slane %v4951_v48, %v12515_v19  ;;  %v10196_v60 = vrot.slane %v4967_v20, %v12515_v19  ;;  %v12670_v56 = vld [vmem:[#allocation210_spill] sm:$0xff] }
 0x3b2   :  { %v10198_v23 = vpop.permute.xlu0 %6099  ;;  %v10201_v39 = vrot.slane %v4240_v45, %v12515_v19  ;;  %v4351_v36 = vcombine.low %v10179_v63, %v10157_v54  ;;  %v5328_v52 = vcombine.high %v12670_v56, %v12669_v2  ;;  %v10208_v32 = vrot.slane %v5376_v18, %v12515_v19  ;;  %v10210_v50 = vpop.permute.xlu1 %5973 }
 0x3b3   :  { %12667 = vst [vmem:[#allocation21_spill] sm:$0xff] %v10187_v43  ;;  %12668 = vst [vmem:[#allocation31_spill] sm:$0xff] %v10198_v23  ;;  %v2871_v20 = vcombine.low %v10105_v41, %v10108_v53  ;;  %v10218_v45 = vrot.slane %v5344_v57, %v12515_v19  ;;  %v10221_v23 = vrot.slane %v5360_v46, %v12515_v19 }
 0x3b4   :  { %12671 = vst [vmem:[#allocation24_spill] sm:$0xff] %v10210_v50  ;;  %6343 = vrot.lane.b32.xlu0 %v1783_v42, %s7089_s12  ;;  %v4319_v48 = vcombine.low %v10201_v39, %v10176_v35  ;;  %v3239_v18 = vrot.slane %v3231_v6, %v7272_v40  ;;  %v4983_v2 = vcombine.low %v10187_v43, %v10190_v24 }
 0x3b5   :  { %12672 = vst [vmem:[#allocation42_spill] sm:$0xff] %v10221_v23  ;;  %6217 = vrot.lane.b32.xlu1 %v2195_v38, %s7085_s8  ;;  %v5015_v42 = vcombine.low %v10193_v34, %v10196_v60  ;;  %v10232_v50 = vrot.slane %v3895_v9, %v7272_v40  ;;  %v3935_v57 = vrot.slane %v3927_v27, %v7272_v40 }
 0x3b6   :  { %v10229_v56 = vpop.permute.xlu0 %6119  ;;  %v10236_v46 = vrot.slane %v5328_v52, %v12515_v19  ;;  %v5439_v38 = vcombine.low %v10221_v23, %v10208_v32  ;;  %v10240_v6 = vpop.permute.xlu1 %5993  ;;  %v3283_v31 = vcombine.low %v3239_v18, %v10173_v13  ;;  %v10244_v43 = vrot.slane %v4351_v36, %v7272_v40 }
 0x3b7   :  { %12673 = vst [vmem:[#allocation62_spill] sm:$0xff] %v10229_v56  ;;  %12675 = vst [vmem:[#allocation46_spill] sm:$0xff] %v10240_v6  ;;  %v4327_v27 = vrot.slane %v4319_v48, %v7272_v40  ;;  %v3959_v56 = vcombine.low %v10232_v50, %v3935_v57  ;;  %v10255_v6 = vrot.slane %v4983_v2, %v7272_v40 }
 0x3b8   :  { %12674 = vst [vmem:[#allocation54_spill] sm:$0xff] %v10236_v46  ;;  %6347 = vrot.lane.b32.xlu0 %v2871_v20, %s7089_s12  ;;  %v5407_v9 = vcombine.low %v10236_v46, %v10218_v45  ;;  %v10258_v23 = vrot.slane %v5015_v42, %v7272_v40  ;;  %v10264_v46 = vrot.slane %v5439_v38, %v7272_v40 }
 0x3b9   :  { %6221 = vrot.lane.b32.xlu1 %v3283_v31, %s7085_s8  ;;  %v4371_v20 = vcombine.low %v4327_v27, %v10244_v43  ;;  %v1672_v38 = vcombine.high %v12598_v55, %v12597_v29  ;;  %v12683_v55 = vld [vmem:[#allocation37_spill] sm:$0xff] }
 0x3ba   :  { %v10251_v52 = vpop.permute.xlu0 %6123  ;;  %v10260_v36 = vpop.permute.xlu1 %5997  ;;  %v10269_v31 = vrot.slane %v5407_v9, %v7272_v40  ;;  %v5047_v2 = vcombine.low %v10255_v6, %v10258_v23 }
 0x3bb   :  { %12676 = vst [vmem:[#allocation38_spill] sm:$0xff] %v10260_v36  ;;  %v10302_v29 = vrot.slane %v1672_v38, %v12515_v19 }
 0x3bc   :  { %6351 = vrot.lane.b32.xlu0 %v3959_v56, %s7089_s12  ;;  %v5459_v36 = vcombine.low %v10269_v31, %v10264_v46  ;;  %v1656_v56 = vcombine.high %v12595_v14, %v12594_v25  ;;  %v1704_v25 = vcombine.high %v12603_v21, %v12602_v47  ;;  %v2872_v47 = vcombine.high %v10105_v41, %v10108_v53 }
 0x3bd   :  { %6225 = vrot.lane.b32.xlu1 %v4371_v20, %s7085_s8  ;;  %v1784_v20 = vcombine.high %v10053_v3, %v10056_v51  ;;  %12681 = vst [vmem:[#allocation112_spill] sm:$0xff] %v10302_v29  ;;  %v12682_v51 = vld [vmem:[#allocation45_spill] sm:$0xff] }
 0x3be   :  { %v10271_v48 = vpop.permute.xlu0 %6127  ;;  %v10275_v42 = vpop.permute.xlu1 %6001  ;;  %v10299_v14 = vrot.slane %v1656_v56, %v12515_v19  ;;  %v12684_v3 = vld [vmem:[#allocation49_spill] sm:$0xff]  ;;  %v1720_v56 = vcombine.high %v9949_v33, %v9970_v5  ;;  %v10322_v38 = vrot.slane %v1704_v25, %v12515_v19 }
 0x3bf   :  { %12677 = vst [vmem:[#allocation128_spill] sm:$0xff] %v10271_v48  ;;  %12678 = vst [vmem:[#allocation120_spill] sm:$0xff] %v10275_v42  ;;  %v2196_v42 = vcombine.high %v10079_v11, %v10067_v12  ;;  %v2199_v11 = vcombine.low %v12683_v55, %v12682_v51  ;;  %v12685_v12 = vld [vmem:[#allocation41_spill] sm:$0xff]  ;;  %v12731_v55 = vld [vmem:[#allocation167_spill] sm:$0xff] }
 0x3c0   :  { %6355 = vrot.lane.b32.xlu0 %v5047_v2, %s7089_s12  ;;  %v1688_v2 = vcombine.high %v12601_v4, %v12600_v30  ;;  %12680 = vst [vmem:[#allocation116_spill] sm:$0xff] %v10299_v14  ;;  %v2215_v30 = vcombine.low %v12685_v12, %v12684_v3  ;;  %12688 = vst [vmem:[#allocation100_spill] sm:$0xff] %v10322_v38  ;;  %v1735_v41 = vcombine.low %v10299_v14, %v10302_v29  ;;  %v12691_v5 = vld [vmem:[#allocation61_spill] sm:$0xff] }
 0x3c1   :  { %6229 = vrot.lane.b32.xlu1 %v5459_v36, %s7085_s8  ;;  %v3284_v36 = vcombine.high %v3239_v18, %v10173_v13  ;;  %v10331_v53 = vrot.slane %v2199_v11, %v12515_v19  ;;  %v12692_v13 = vld [vmem:[#allocation53_spill] sm:$0xff]  ;;  %v4372_v11 = vcombine.high %v4327_v27, %v10244_v43  ;;  %v2840_v43 = vcombine.high %v10033_v22, %v10036_v59 }
 0x3c2   :  { %v10285_v9 = vpop.permute.xlu0 %6131  ;;  %v10289_v48 = vpop.permute.xlu1 %6005  ;;  %v10334_v33 = vrot.slane %v2215_v30, %v12515_v19  ;;  %v2231_v18 = vcombine.low %v12692_v13, %v12691_v5  ;;  %v12695_v25 = vld [vmem:[#allocation57_spill] sm:$0xff]  ;;  %v5460_v22 = vcombine.high %v10269_v31, %v10264_v46  ;;  %v12728_v5 = vld [vmem:[#allocation160_spill] sm:$0xff] }
 0x3c3   :  { %12679 = vst [vmem:[#allocation124_spill] sm:$0xff] %v10289_v48  ;;  %12689 = vst [vmem:[#allocation187_spill] sm:$0xff] %v10331_v53  ;;  %v10352_v48 = vrot.slane %v1720_v56, %v7272_v40  ;;  %v12730_v3 = vld [vmem:[#allocation177_spill] sm:$0xff] }
 0x3c4   :  { %6375 = vrot.lane.b32.xlu0 %v1784_v20, %s7090_s13  ;;  %v1752_v20 = vcombine.high %v9973_v7, %v9976_v61  ;;  %12690 = vst [vmem:[#allocation181_spill] sm:$0xff] %v10334_v33  ;;  %v3960_v7 = vcombine.high %v10232_v50, %v3935_v57  ;;  %v12694_v61 = vld [vmem:[#allocation65_spill] sm:$0xff]  ;;  %v2144_v57 = vcombine.high %v10019_v62, %v10004_v1 }
 0x3c5   :  { %6249 = vrot.lane.b32.xlu1 %v2196_v42, %s7086_s9  ;;  %v10319_v42 = vrot.slane %v1688_v2, %v12515_v19  ;;  %v10367_v27 = vrot.slane %v2231_v18, %v12515_v19  ;;  %v10374_v1 = vrot.slane %v1735_v41, %v7272_v40  ;;  %v3264_v62 = vcombine.high %v10093_v28, %v10072_v10  ;;  %v12699_v18 = vld [vmem:[#allocation78_spill] sm:$0xff]  ;;  %v12702_v41 = vld [vmem:[#allocation75_spill] sm:$0xff]  ;;  %v12755_v29 = vld [vmem:[#allocation17_spill] sm:$0xff] }
 0x3c6   :  { %v10309_v4 = vpop.permute.xlu0 %6151  ;;  %v10313_v21 = vpop.permute.xlu1 %6025  ;;  %v10355_v50 = vrot.slane %v1752_v20, %v7272_v40  ;;  %v5048_v20 = vcombine.high %v10255_v6, %v10258_v23  ;;  %v12701_v6 = vld [vmem:[#allocation81_spill] sm:$0xff]  ;;  %v3232_v28 = vcombine.high %v10135_v17, %v10111_v44  ;;  %v10402_v46 = vrot.slane %v2144_v57, %v7272_v40  ;;  %v12709_v57 = vld [vmem:[#allocation99_spill] sm:$0xff] }
 0x3c7   :  { %12686 = vst [vmem:[#allocation104_spill] sm:$0xff] %v10313_v21  ;;  %12687 = vst [vmem:[#allocation108_spill] sm:$0xff] %v10319_v42  ;;  %v2176_v21 = vcombine.high %v10007_v26, %v9985_v0  ;;  %v1767_v30 = vcombine.low %v10319_v42, %v10322_v38  ;;  %v2808_v0 = vcombine.high %v10027_v58, %v10030_v16  ;;  %v12737_v42 = vld [vmem:[#allocation192_spill] sm:$0xff] }
 0x3c8   :  { %6379 = vrot.lane.b32.xlu0 %v2872_v47, %s7090_s13  ;;  %v2247_v47 = vcombine.low %v12695_v25, %v12694_v61  ;;  %v2263_v26 = vcombine.low %v10331_v53, %v10334_v33  ;;  %v12726_v61 = vld [vmem:[#allocation156_spill] sm:$0xff]  ;;  %v12736_v33 = vld [vmem:[#allocation199_spill] sm:$0xff] }
 0x3c9   :  { %6253 = vrot.lane.b32.xlu1 %v3284_v36, %s7086_s9  ;;  %v10386_v59 = vrot.slane %v2176_v21, %v7272_v40  ;;  %v10396_v10 = vrot.slane %v1767_v30, %v7272_v40  ;;  %v10405_v31 = vrot.slane %v2808_v0, %v7272_v40  ;;  %v10408_v21 = vrot.slane %v2840_v43, %v7272_v40 }
 0x3ca   :  { %v10338_v2 = vpop.permute.xlu0 %6155  ;;  %v10345_v36 = vpop.permute.xlu1 %6029  ;;  %v10377_v16 = vrot.slane %v2247_v47, %v12515_v19  ;;  %v1785_v47 = vcombine.low %v10352_v48, %v10355_v50  ;;  %v3928_v30 = vcombine.high %v10128_v15, %v10131_v37  ;;  %v10419_v17 = vrot.slane %v2263_v26, %v7272_v40  ;;  %v12704_v26 = vld [vmem:[#allocation90_spill] sm:$0xff] }
 0x3cb   :  { %12693 = vst [vmem:[#allocation174_spill] sm:$0xff] %v10338_v2  ;;  %12696 = vst [vmem:[#allocation168_spill] sm:$0xff] %v10345_v36  ;;  %v4352_v0 = vcombine.high %v10179_v63, %v10157_v54  ;;  %v12708_v63 = vld [vmem:[#allocation107_spill] sm:$0xff] }
 0x3cc   :  { %6383 = vrot.lane.b32.xlu0 %v3960_v7, %s7090_s13  ;;  %v12700_v7 = vld [vmem:[#allocation72_spill] sm:$0xff]  ;;  %v3287_v44 = vcombine.low %v12709_v57, %v12708_v63  ;;  %v12724_v63 = vld [vmem:[#allocation145_spill] sm:$0xff] }
 0x3cd   :  { %6257 = vrot.lane.b32.xlu1 %v4372_v11, %s7086_s9  ;;  %v2744_v23 = vcombine.high %v12700_v7, %v12699_v18  ;;  %v2760_v11 = vcombine.high %v12702_v41, %v12701_v6  ;;  %v12706_v6 = vld [vmem:[#allocation93_spill] sm:$0xff]  ;;  %v12707_v41 = vld [vmem:[#allocation87_spill] sm:$0xff] }
 0x3ce   :  { %v10369_v56 = vpop.permute.xlu0 %6159  ;;  %v10381_v58 = vpop.permute.xlu1 %6033  ;;  %v2792_v54 = vcombine.high %v12707_v41, %v12706_v6 }
 0x3cf   :  { %12697 = vst [vmem:[#allocation184_spill] sm:$0xff] %v10369_v56  ;;  %12698 = vst [vmem:[#allocation178_spill] sm:$0xff] %v10381_v58  ;;  %v10433_v15 = vrot.slane %v2744_v23, %v12515_v19  ;;  %v10436_v37 = vrot.slane %v2760_v11, %v12515_v19  ;;  %v10449_v23 = vrot.slane %v3232_v28, %v7272_v40  ;;  %v12712_v28 = vld [vmem:[#allocation103_spill] sm:$0xff]  ;;  %v12713_v58 = vld [vmem:[#allocation42_spill] sm:$0xff] }
 0x3d0   :  { %6387 = vrot.lane.b32.xlu0 %v5048_v20, %s7090_s13  ;;  %v3896_v20 = vcombine.high %v10122_v8, %v10125_v49  ;;  %v2197_v8 = vcombine.low %v10402_v46, %v10386_v59  ;;  %v10430_v49 = vrot.slane %v3264_v62, %v7272_v40  ;;  %v4320_v62 = vcombine.high %v10201_v39, %v10176_v35  ;;  %v12711_v39 = vld [vmem:[#allocation111_spill] sm:$0xff] }
 0x3d1   :  { %6261 = vrot.lane.b32.xlu1 %v5460_v22, %s7086_s9  ;;  %v12705_v22 = vld [vmem:[#allocation84_spill] sm:$0xff]  ;;  %v2873_v11 = vcombine.low %v10405_v31, %v10408_v21  ;;  %v10463_v35 = vrot.slane %v3928_v30, %v7272_v40  ;;  %v5440_v36 = vcombine.high %v12713_v58, %v10208_v32  ;;  %v10482_v30 = vrot.slane %v2792_v54, %v12515_v19  ;;  %v12718_v54 = vld [vmem:[#allocation127_spill] sm:$0xff] }
 0x3d2   :  { %v10414_v18 = vpop.permute.xlu0 %6163  ;;  %v10425_v43 = vpop.permute.xlu1 %6037  ;;  %v2776_v7 = vcombine.high %v12705_v22, %v12704_v26  ;;  %v12710_v26 = vld [vmem:[#allocation21_spill] sm:$0xff]  ;;  %v10460_v41 = vrot.slane %v3896_v20, %v7272_v40  ;;  %v10488_v58 = vrot.slane %v3287_v44, %v12515_v19  ;;  %v12734_v56 = vld [vmem:[#allocation195_spill] sm:$0xff] }
 0x3d3   :  { %12703 = vst [vmem:[#allocation171_spill] sm:$0xff] %v10425_v43  ;;  %v4984_v22 = vcombine.high %v12710_v26, %v10190_v24  ;;  %v3285_v24 = vcombine.low %v10449_v23, %v10430_v49  ;;  %v12715_v26 = vld [vmem:[#allocation123_spill] sm:$0xff] }
 0x3d4   :  { %6407 = vrot.lane.b32.xlu0 %v1785_v47, %s7091_s14  ;;  %v5016_v47 = vcombine.high %v10193_v34, %v10196_v60  ;;  %v10474_v34 = vrot.slane %v4352_v0, %v7272_v40  ;;  %v10479_v20 = vrot.slane %v2776_v7, %v12515_v19  ;;  %v12716_v0 = vld [vmem:[#allocation115_spill] sm:$0xff]  ;;  %v10496_v7 = vrot.slane %v4320_v62, %v7272_v40 }
 0x3d5   :  { %6281 = vrot.lane.b32.xlu1 %v2197_v8, %s7087_s10  ;;  %v3303_v8 = vcombine.low %v12712_v28, %v12711_v39  ;;  %v12717_v28 = vld [vmem:[#allocation54_spill] sm:$0xff]  ;;  %v12719_v39 = vld [vmem:[#allocation119_spill] sm:$0xff]  ;;  %v3961_v44 = vcombine.low %v10460_v41, %v10463_v35  ;;  %v10505_v32 = vrot.slane %v4984_v22, %v7272_v40 }
 0x3d6   :  { %v10457_v6 = vpop.permute.xlu0 %6183  ;;  %v10469_v43 = vpop.permute.xlu1 %6057  ;;  %v5408_v60 = vcombine.high %v12717_v28, %v10218_v45  ;;  %v12721_v28 = vld [vmem:[#allocation142_spill] sm:$0xff]  ;;  %v12722_v62 = vld [vmem:[#allocation135_spill] sm:$0xff] }
 0x3d7   :  { %12714 = vst [vmem:[#allocation164_spill] sm:$0xff] %v10469_v43  ;;  %v3319_v43 = vcombine.low %v12716_v0, %v12715_v26  ;;  %v10508_v0 = vrot.slane %v5016_v47, %v7272_v40  ;;  %v10511_v45 = vrot.slane %v3303_v8, %v12515_v19  ;;  %v12725_v22 = vld [vmem:[#allocation138_spill] sm:$0xff]  ;;  %v12727_v47 = vld [vmem:[#allocation149_spill] sm:$0xff]  ;;  %v12729_v8 = vld [vmem:[#allocation152_spill] sm:$0xff] }
 0x3d8   :  { %6411 = vrot.lane.b32.xlu0 %v2873_v11, %s7091_s14  ;;  %v3335_v11 = vcombine.low %v12719_v39, %v12718_v54  ;;  %v4373_v39 = vcombine.low %v10496_v7, %v10474_v34  ;;  %v10520_v54 = vrot.slane %v5440_v36, %v7272_v40  ;;  %v3848_v25 = vcombine.high %v12725_v22, %v12724_v63  ;;  %v12735_v36 = vld [vmem:[#allocation186_spill] sm:$0xff] }
 0x3d9   :  { %6285 = vrot.lane.b32.xlu1 %v3285_v24, %s7087_s10  ;;  %v3832_v24 = vcombine.high %v12722_v62, %v12721_v28  ;;  %v3864_v13 = vcombine.high %v12727_v47, %v12726_v61  ;;  %v3880_v12 = vcombine.high %v12729_v8, %v12728_v5  ;;  %v4375_v28 = vcombine.low %v12731_v55, %v12730_v3  ;;  %v12732_v62 = vld [vmem:[#allocation182_spill] sm:$0xff]  ;;  %v12745_v55 = vld [vmem:[#allocation221_spill] sm:$0xff] }
 0x3da   :  { %v10500_v57 = vpop.permute.xlu0 %6187  ;;  %v10515_v26 = vpop.permute.xlu1 %6061  ;;  %v4407_v53 = vcombine.low %v12735_v36, %v12734_v56  ;;  %v4423_v63 = vcombine.low %v12737_v42, %v12736_v33  ;;  %v10539_v61 = vrot.slane %v5408_v60, %v7272_v40  ;;  %v10542_v5 = vrot.slane %v3319_v43, %v12515_v19  ;;  %v12739_v47 = vld [vmem:[#allocation202_spill] sm:$0xff]  ;;  %v12741_v42 = vld [vmem:[#allocation212_spill] sm:$0xff]  ;;  %v12742_v33 = vld [vmem:[#allocation205_spill] sm:$0xff] }
 0x3db   :  { %12720 = vst [vmem:[#allocation40_spill] sm:$0xff] %v10500_v57  ;;  %12723 = vst [vmem:[#allocation134_spill] sm:$0xff] %v10515_v26  ;;  %v12733_v26 = vld [vmem:[#allocation172_spill] sm:$0xff]  ;;  %v10545_v22 = vrot.slane %v3335_v11, %v12515_v19  ;;  %v5049_v36 = vcombine.low %v10505_v32, %v10508_v0  ;;  %v12744_v60 = vld [vmem:[#allocation214_spill] sm:$0xff] }
 0x3dc   :  { %6415 = vrot.lane.b32.xlu0 %v3961_v44, %s7091_s14  ;;  %v4391_v51 = vcombine.low %v12733_v26, %v12732_v62  ;;  %v12738_v44 = vld [vmem:[#allocation209_spill] sm:$0xff]  ;;  %v12743_v56 = vld [vmem:[#allocation216_spill] sm:$0xff]  ;;  %v5461_v11 = vcombine.low %v10539_v61, %v10520_v54 }
 0x3dd   :  { %6289 = vrot.lane.b32.xlu1 %v4373_v39, %s7087_s10  ;;  %v4920_v8 = vcombine.high %v12739_v47, %v12738_v44  ;;  %v4936_v39 = vcombine.high %v12742_v33, %v12741_v42  ;;  %v4952_v62 = vcombine.high %v12744_v60, %v12743_v56  ;;  %v12746_v43 = vld [vmem:[#allocation141_spill] sm:$0xff]  ;;  %v10564_v44 = vrot.slane %v3832_v24, %v12515_v19  ;;  %v12750_v24 = vld [vmem:[#allocation70_spill] sm:$0xff] }
 0x3de   :  { %v10549_v26 = vpop.permute.xlu0 %6191  ;;  %v4968_v3 = vcombine.high %v12746_v43, %v12745_v55  ;;  %v10559_v38 = vpop.permute.xlu1 %6065  ;;  %v10567_v47 = vrot.slane %v3848_v25, %v12515_v19  ;;  %v10573_v42 = vrot.slane %v3880_v12, %v12515_v19  ;;  %v10577_v55 = vrot.slane %v4375_v28, %v12515_v19  ;;  %v12751_v60 = vld [vmem:[#allocation126_spill] sm:$0xff]  ;;  %v12752_v43 = vld [vmem:[#allocation56_spill] sm:$0xff] }
 0x3df   :  { %12740 = vst [vmem:[#allocation215_spill] sm:$0xff] %v10549_v26  ;;  %12747 = vst [vmem:[#allocation211_spill] sm:$0xff] %v10559_v38  ;;  %v10570_v26 = vrot.slane %v3864_v13, %v12515_v19  ;;  %v10580_v33 = vrot.slane %v4391_v51, %v12515_v19  ;;  %v10583_v56 = vrot.slane %v4407_v53, %v12515_v19  ;;  %v12749_v13 = vld [vmem:[#allocation60_spill] sm:$0xff]  ;;  %v12753_v38 = vld [vmem:[#allocation169_spill] sm:$0xff] }
 0x3e0   :  { %6419 = vrot.lane.b32.xlu0 %v5049_v36, %s7091_s14  ;;  %v10586_v25 = vrot.slane %v4423_v63, %v12515_v19  ;;  %v5463_v12 = vcombine.low %v12750_v24, %v12749_v13  ;;  %v5479_v36 = vcombine.low %v12752_v43, %v12751_v60  ;;  %v12754_v28 = vld [vmem:[#allocation102_spill] sm:$0xff]  ;;  %v12756_v51 = vld [vmem:[#allocation179_spill] sm:$0xff]  ;;  %v10600_v53 = vrot.slane %v4920_v8, %v12515_v19 }
 0x3e1   :  { %12748 = vst [vmem:[#allocation217_spill] sm:$0xff] %v10583_v56  ;;  %6293 = vrot.lane.b32.xlu1 %v5461_v11, %s7087_s10  ;;  %v5495_v14 = vcombine.low %v12754_v28, %v12753_v38  ;;  %v5511_v57 = vcombine.low %v12756_v51, %v12755_v29  ;;  %v10603_v63 = vrot.slane %v4936_v39, %v12515_v19 }
 0x3e2   :  { %v10597_v2 = vpop.permute.xlu0 %6195  ;;  %12757 = vst [vmem:[#allocation148_spill] sm:$0xff] %v10600_v53  ;;  %v10606_v11 = vrot.slane %v4952_v62, %v12515_v19  ;;  %v10609_v24 = vrot.slane %v4968_v3, %v12515_v19  ;;  %v10611_v43 = vpop.permute.xlu1 %6069  ;;  %v2855_v28 = vcombine.low %v10479_v20, %v10482_v30  ;;  %v3351_v51 = vcombine.low %v10488_v58, %v10511_v45 }
 0x3e3   :  { %12758 = vst [vmem:[#allocation213_spill] sm:$0xff] %v10603_v63  ;;  %12761 = vst [vmem:[#allocation72_spill] sm:$0xff] %v10611_v43  ;;  %v3383_v8 = vcombine.low %v10542_v5, %v10545_v22  ;;  %v12762_v62 = vcombine.high %v10352_v48, %v10355_v50  ;;  %v2874_v3 = vcombine.high %v10405_v31, %v10408_v21 }
 0x3e4   :  { %12759 = vst [vmem:[#allocation210_spill] sm:$0xff] %v10606_v11  ;;  %12760 = vst [vmem:[#allocation78_spill] sm:$0xff] %v10609_v24  ;;  %v3911_v39 = vcombine.low %v10564_v44, %v10567_v47  ;;  %v3943_v43 = vcombine.low %v10570_v26, %v10573_v42  ;;  %v4439_v29 = vcombine.low %v10577_v55, %v10580_v33 }
 0x3e5   :  { %6439 = vrot.lane.b32.xlu0 %v12762_v62, %s7092_s15  ;;  %v4471_v38 = vcombine.low %v10583_v56, %v10586_v25  ;;  %v12763_v48 = vcombine.high %v10402_v46, %v10386_v59  ;;  %v10638_v50 = vrot.slane %v5463_v12, %v12515_v19  ;;  %v10641_v31 = vrot.slane %v5479_v36, %v12515_v19 }
 0x3e6   :  { %v10644_v21 = vrot.slane %v5495_v14, %v12515_v19  ;;  %v10647_v62 = vrot.slane %v5511_v57, %v12515_v19  ;;  %v10649_v60 = vpop.permute.xlu0 %6215  ;;  %v4999_v13 = vcombine.low %v10600_v53, %v10603_v63  ;;  %v5031_v59 = vcombine.low %v10606_v11, %v10609_v24  ;;  %v10655_v46 = vpop.permute.xlu1 %6089  ;;  %v12779_v11 = vld [vmem:[#allocation35_spill] sm:$0xff]  ;;  %v12781_v53 = vld [vmem:[#allocation96_spill] sm:$0xff]  ;;  %v12788_v63 = vld [vmem:[#allocation162_spill] sm:$0xff] }
 0x3e7   :  { %6313 = vrot.lane.b32.xlu1 %v12763_v48, %s7088_s11  ;;  %12764 = vst [vmem:[#allocation81_spill] sm:$0xff] %v10638_v50  ;;  %12765 = vst [vmem:[#allocation75_spill] sm:$0xff] %v10641_v31  ;;  %v3286_v12 = vcombine.high %v10449_v23, %v10430_v49  ;;  %v12769_v14 = vcombine.low %v10367_v27, %v10377_v16  ;;  %v10667_v57 = vrot.slane %v3351_v51, %v7272_v40 }
 0x3e8   :  { %12766 = vst [vmem:[#allocation90_spill] sm:$0xff] %v10644_v21  ;;  %12767 = vst [vmem:[#allocation84_spill] sm:$0xff] %v10647_v62  ;;  %v10670_v48 = vrot.slane %v3383_v8, %v7272_v40  ;;  %v10679_v49 = vrot.slane %v2855_v28, %v7272_v40  ;;  %v10683_v23 = vrot.slane %v4439_v29, %v7272_v40 }
 0x3e9   :  { %12768 = vst [vmem:[#allocation93_spill] sm:$0xff] %v10655_v46  ;;  %v10663_v36 = vrot.slane %v12769_v14, %v7272_v40  ;;  %6443 = vrot.lane.b32.xlu0 %v2874_v3, %s7092_s15  ;;  %v12770_v46 = vcombine.low %v10433_v15, %v10436_v37  ;;  %v10686_v51 = vrot.slane %v4471_v38, %v7272_v40 }
 0x3ea   :  { %v10689_v8 = vrot.slane %v3911_v39, %v7272_v40  ;;  %v10692_v3 = vrot.slane %v3943_v43, %v7272_v40  ;;  %v5559_v28 = vcombine.low %v10644_v21, %v10647_v62  ;;  %v10698_v14 = vpop.permute.xlu0 %6219  ;;  %v3962_v29 = vcombine.high %v10460_v41, %v10463_v35 }
 0x3eb   :  { %v10676_v19 = vrot.slane %v12770_v46, %v7272_v40  ;;  %6317 = vrot.lane.b32.xlu1 %v3286_v12, %s7088_s11  ;;  %v5527_v46 = vcombine.low %v10638_v50, %v10641_v31  ;;  %v1787_v38 = vcombine.low %v10374_v1, %v10396_v10  ;;  %v10704_v12 = vpop.permute.xlu1 %6093  ;;  %v4374_v43 = vcombine.high %v10496_v7, %v10474_v34  ;;  %v12772_v34 = vld [vmem:[#allocation122_spill] sm:$0xff] }
 0x3ec   :  { %12771 = vst [vmem:[#allocation87_spill] sm:$0xff] %v10704_v12  ;;  %v10709_v39 = vrot.slane %v4999_v13, %v7272_v40  ;;  %v10712_v50 = vrot.slane %v5031_v59, %v7272_v40  ;;  %v2327_v41 = vcombine.low %v10419_v17, %v10663_v36  ;;  %v5050_v21 = vcombine.high %v10505_v32, %v10508_v0  ;;  %v12774_v12 = vld [vmem:[#allocation208_spill] sm:$0xff]  ;;  %v12786_v32 = vld [vmem:[#allocation118_spill] sm:$0xff] }
 0x3ed   :  { %6447 = vrot.lane.b32.xlu0 %v3962_v29, %s7092_s15  ;;  %v10735_v35 = vrot.slane %v5527_v46, %v7272_v40  ;;  %v10738_v7 = vrot.slane %v5559_v28, %v7272_v40  ;;  %v5462_v31 = vcombine.high %v10539_v61, %v10520_v54  ;;  %v12777_v0 = vld [vmem:[#allocation52_spill] sm:$0xff] }
 0x3ee   :  { %v10730_v29 = vpop.permute.xlu0 %6223  ;;  %v12778_v46 = vld [vmem:[#allocation36_spill] sm:$0xff] }
 0x3ef   :  { %6321 = vrot.lane.b32.xlu1 %v4374_v43, %s7088_s11  ;;  %v12773_v43 = vld [vmem:[#allocation207_spill] sm:$0xff]  ;;  %v10745_v59 = vpop.permute.xlu1 %6097  ;;  %v12780_v28 = vcombine.low %v12778_v46, %v12779_v11 }
 0x3f0   :  { %v12775_v62 = vcombine.low %v12773_v43, %v12774_v12  ;;  %12776 = vst [vmem:[#allocation21_spill] sm:$0xff] %v10745_v59  ;;  %v12784_v43 = vld [vmem:[#allocation97_spill] sm:$0xff]  ;;  %v12787_v59 = vld [vmem:[#allocation163_spill] sm:$0xff] }
 0x3f1   :  { %v6592_v24 = vsel %vm6591_vm0, %v12780_v28, %v12777_v0  ;;  %6451 = vrot.lane.b32.xlu0 %v5050_v21, %s7092_s15  ;;  %v12789_v56 = vcombine.low %v12787_v59, %v12788_v63  ;;  %v12790_v0 = vld [vmem:[#allocation161_spill] sm:$0xff]  ;;  %v12813_v28 = vld [vmem:[#allocation170_spill] sm:$0xff] }
 0x3f2   :  { %v6598_v13 = vsel %vm6591_vm0, %v12775_v62, %v12772_v34  ;;  %v12782_v62 = vld [vmem:[#allocation34_spill] sm:$0xff] }
 0x3f3   :  { %v6607_v12 = vsel %vm6600_vm1, %v6598_v13, %v12781_v53  ;;  %v12783_v34 = vld [vmem:[#allocation98_spill] sm:$0xff]  ;;  %v6596_v11 = vsel %vm6591_vm0, %v12789_v56, %v12786_v32  ;;  %6325 = vrot.lane.b32.xlu1 %v5462_v31, %s7088_s11  ;;  %v10774_v13 = vpop.permute.xlu0 %6227  ;;  %v12793_v56 = vld [vmem:[#allocation140_spill] sm:$0xff]  ;;  %v10784_v31 = vpop.permute.xlu1 %6101 }
 0x3f4   :  { %v12785_v54 = vcombine.low %v12783_v34, %v12784_v43  ;;  %v6616_v46 = vsel %vm6609_vm2, %v6607_v12, %v12790_v0  ;;  %v12791_v53 = vld [vmem:[#allocation26_spill] sm:$0xff]  ;;  %12795 = vst [vmem:[#allocation42_spill] sm:$0xff] %v10784_v31  ;;  %v12796_v34 = vld [vmem:[#allocation144_spill] sm:$0xff] }
 0x3f5   :  { %v6625_v21 = vsel %vm6618_vm3, %v6616_v46, %v12791_v53  ;;  %v12794_v32 = vld [vmem:[#allocation10_spill] sm:$0xff]  ;;  %v6605_v43 = vsel %vm6600_vm1, %v6596_v11, %v12796_v34  ;;  %6471 = vrot.lane.b32.xlu0 %v1787_v38, %s7093_s18 }
 0x3f6   :  { %v6594_v61 = vsel %vm6591_vm0, %v12785_v54, %v12782_v62  ;;  %v12792_v62 = vld [vmem:[#allocation110_spill] sm:$0xff]  ;;  %v6634_v12 = vsel %vm12010_vm4, %v6625_v21, %v12794_v32  ;;  %v12797_v54 = vld [vmem:[#allocation173_spill] sm:$0xff]  ;;  %v12800_v21 = vld [vmem:[#allocation176_spill] sm:$0xff] }
 0x3f7   :  { %v6601_v63 = vsel %vm6600_vm1, %v6592_v24, %v12792_v62  ;;  %v6603_v59 = vsel %vm6600_vm1, %v6594_v61, %v12793_v56  ;;  %v12798_v46 = vld [vmem:[#allocation86_spill] sm:$0xff]  ;;  %v6614_v62 = vsel %vm6609_vm2, %v6605_v43, %v12800_v21  ;;  %v12801_v56 = vld [vmem:[#allocation132_spill] sm:$0xff]  ;;  %6345 = vrot.lane.b32.xlu1 %v2327_v41, %s7089_s12  ;;  %v12806_v43 = vld [vmem:[#allocation11_spill] sm:$0xff] }
 0x3f8   :  { %v6610_v0 = vsel %vm6609_vm2, %v6601_v63, %v12797_v54  ;;  %v6643_v53 = vsel %vm12009_vm5, %v6634_v12, %v12798_v46  ;;  %v12799_v24 = vld [vmem:[#allocation166_spill] sm:$0xff]  ;;  %v12803_v63 = vld [vmem:[#allocation133_spill] sm:$0xff]  ;;  %v12805_v46 = vld [vmem:[#allocation39_spill] sm:$0xff] }
 0x3f9   :  { %v6612_v61 = vsel %vm6609_vm2, %v6603_v59, %v12799_v24  ;;  %v6619_v32 = vsel %vm6618_vm3, %v6610_v0, %v12801_v56  ;;  %v12802_v11 = vld [vmem:[#allocation218_spill] sm:$0xff]  ;;  %v12804_v54 = vld [vmem:[#allocation29_spill] sm:$0xff]  ;;  %v10808_v24 = vpop.permute.xlu0 %6247  ;;  %v6623_v0 = vsel %vm6618_vm3, %v6614_v62, %v12806_v43  ;;  %v12807_v21 = vld [vmem:[#allocation67_spill] sm:$0xff] }
 0x3fa   :  { %v6652_v34 = vsel %vm12006_vm6, %v6643_v53, %v12802_v11  ;;  %v6621_v12 = vsel %vm6618_vm3, %v6612_v61, %v12803_v63  ;;  %v6628_v38 = vsel %vm12010_vm4, %v6619_v32, %v12804_v54  ;;  %v12808_v56 = vld [vmem:[#allocation101_spill] sm:$0xff]  ;;  %v10816_v61 = vpop.permute.xlu1 %6121  ;;  %v12810_v11 = vld [vmem:[#allocation43_spill] sm:$0xff]  ;;  %v12828_v31 = vld [vmem:[#allocation150_spill] sm:$0xff] }
 0x3fb   :  { %v6661_v59 = vsel %vm12007_vm7, %v6652_v34, %v12805_v46  ;;  %v6637_v53 = vsel %vm12009_vm5, %v6628_v38, %v12807_v21  ;;  %12809 = vst [vmem:[#allocation54_spill] sm:$0xff] %v10816_v61  ;;  %v6630_v32 = vsel %vm12010_vm4, %v6621_v12, %v12810_v11  ;;  %v12811_v63 = vld [vmem:[#allocation33_spill] sm:$0xff]  ;;  %v12814_v38 = vcombine.low %v10676_v19, %v10679_v49  ;;  %v12816_v21 = vld [vmem:[#allocation48_spill] sm:$0xff]  ;;  %v12820_v11 = vld [vmem:[#allocation51_spill] sm:$0xff] }
 0x3fc   :  { %v6670_v41 = vsel %vm12008_vm8, %v6661_v59, %v12808_v56  ;;  %v6632_v34 = vsel %vm12010_vm4, %v6623_v0, %v12811_v63  ;;  %v12812_v54 = vld [vmem:[#allocation137_spill] sm:$0xff]  ;;  %v12815_v59 = vld [vmem:[#allocation74_spill] sm:$0xff]  ;;  %v12817_v56 = vld [vmem:[#allocation183_spill] sm:$0xff]  ;;  %vm12012_vm4 = vcmask 343040  }
 0x3fd   :  { %v6646_v46 = vsel %vm12006_vm6, %v6637_v53, %v12812_v54  ;;  %v6679_v62 = vsel %vm12011_vm9, %v6670_v41, %v12813_v28  ;;  %6475 = vrot.lane.b32.xlu0 %v12814_v38, %s7093_s18  ;;  %v6639_v43 = vsel %vm12009_vm5, %v6630_v32, %v12815_v59  ;;  %v12818_v53 = vcombine.low %v10667_v57, %v10670_v48  ;;  %v12819_v28 = vld [vmem:[#allocation83_spill] sm:$0xff]  ;;  %v12821_v54 = vld [vmem:[#allocation50_spill] sm:$0xff]  ;;  %v12825_v61 = vld [vmem:[#allocation76_spill] sm:$0xff] }
 0x3fe   :  { %v6655_v12 = vsel %vm12007_vm7, %v6646_v46, %v12816_v21  ;;  %v6688_v0 = vsel %vm6681_vm10, %v6679_v62, %v12817_v56  ;;  %v6641_v41 = vsel %vm12009_vm5, %v6632_v34, %v12819_v28  ;;  %v10846_v46 = vpop.permute.xlu0 %6251  ;;  %v12822_v38 = vld [vmem:[#allocation147_spill] sm:$0xff]  ;;  %v12824_v56 = vld [vmem:[#allocation113_spill] sm:$0xff]  ;;  %v10856_v28 = vpop.permute.xlu1 %6125  ;;  %vm12015_vm5 = vcmask 326656  }
 0x3ff   :  { %6349 = vrot.lane.b32.xlu1 %v12818_v53, %s7089_s12  ;;  %v6664_v63 = vsel %vm12008_vm8, %v6655_v12, %v12820_v11  ;;  %v6697_v32 = vsel %vm6690_vm11, %v6688_v0, %v12821_v54  ;;  %v6648_v62 = vsel %vm12006_vm6, %v6639_v43, %v12822_v38  ;;  %v12823_v59 = vld [vmem:[#allocation151_spill] sm:$0xff]  ;;  %v12826_v12 = vld [vmem:[#allocation13_spill] sm:$0xff] }
 0x400   :  { %v6650_v21 = vsel %vm12006_vm6, %v6641_v41, %v12823_v59  ;;  %v6673_v53 = vsel %vm12011_vm9, %v6664_v63, %v12824_v56  ;;  %v6706_v34 = vsel %vm6699_vm12, %v6697_v32, %v12825_v61  ;;  %v6657_v0 = vsel %vm12007_vm7, %v6648_v62, %v12826_v12  ;;  %v12827_v11 = vld [vmem:[#allocation185_spill] sm:$0xff]  ;;  %v12831_v32 = vld [vmem:[#allocation64_spill] sm:$0xff]  ;;  %v12834_v56 = vld [vmem:[#allocation55_spill] sm:$0xff] }
 0x401   :  { %v6682_v54 = vsel %vm6681_vm10, %v6673_v53, %v12827_v11  ;;  %v6715_v43 = vsel %vm6708_vm13, %v6706_v34, %v12828_v31  ;;  %v12829_v41 = vcombine.low %v10689_v8, %v10692_v3  ;;  %v12830_v63 = vld [vmem:[#allocation25_spill] sm:$0xff]  ;;  %v12832_v59 = vld [vmem:[#allocation200_spill] sm:$0xff]  ;;  %vm6735_vm6 = vcmask 277504   ;;  %v12835_v34 = vld [vmem:[#allocation95_spill] sm:$0xff] }
 0x402   :  { %v6659_v61 = vsel %vm12007_vm7, %v6650_v21, %v12830_v63  ;;  %v6691_v38 = vsel %vm6690_vm11, %v6682_v54, %v12831_v32  ;;  %v6724_v62 = vsel %vm6717_vm14, %v6715_v43, %v12832_v59  ;;  %v12833_v31 = vcombine.low %v10683_v23, %v10686_v51  ;;  %v12836_v11 = vld [vmem:[#allocation8_spill] sm:$0xff]  ;;  %v10886_v63 = vpop.permute.xlu0 %6255  ;;  %v12838_v43 = vld [vmem:[#allocation117_spill] sm:$0xff] }
 0x403   :  { %6479 = vrot.lane.b32.xlu0 %v12829_v41, %s7093_s18  ;;  %v6666_v53 = vsel %vm12008_vm8, %v6657_v0, %v12834_v56  ;;  %v6668_v12 = vsel %vm12008_vm8, %v6659_v61, %v12835_v34  ;;  %v6700_v21 = vsel %vm6699_vm12, %v6691_v38, %v12836_v11  ;;  %v12837_v41 = vld [vmem:[#allocation31_spill] sm:$0xff]  ;;  %v12839_v59 = vld [vmem:[#allocation73_spill] sm:$0xff]  ;;  %vm6744_vm7 = vcmask 293888   ;;  %v10894_v56 = vpop.permute.xlu1 %6129  ;;  %v12840_v61 = vld [vmem:[#allocation190_spill] sm:$0xff] }
 0x404   :  { %6353 = vrot.lane.b32.xlu1 %v12833_v31, %s7089_s12  ;;  %v6733_v54 = vsel %vm6726_vm15, %v6724_v62, %v12837_v41  ;;  %v6675_v32 = vsel %vm12011_vm9, %v6666_v53, %v12838_v43  ;;  %v6709_v31 = vsel %vm6708_vm13, %v6700_v21, %v12839_v59  ;;  %v12841_v34 = vld [vmem:[#allocation136_spill] sm:$0xff]  ;;  %vm12016_vm8 = vcmask 310272   ;;  %v12843_v21 = vld [vmem:[#allocation66_spill] sm:$0xff]  ;;  %v12844_v41 = vld [vmem:[#allocation191_spill] sm:$0xff] }
 0x405   :  { %v6742_v0 = vsel %vm6735_vm6, %v6733_v54, %v10285_v9  ;;  %v6684_v38 = vsel %vm6681_vm10, %v6675_v32, %v12840_v61  ;;  %v6718_v62 = vsel %vm6717_vm14, %v6709_v31, %v12841_v34  ;;  %v12842_v53 = vcombine.low %v10709_v39, %v10712_v50  ;;  %v12846_v32 = vld [vmem:[#allocation88_spill] sm:$0xff]  ;;  %v12847_v31 = vld [vmem:[#allocation62_spill] sm:$0xff]  ;;  %v12848_v34 = vld [vmem:[#allocation165_spill] sm:$0xff] }
 0x406   :  { %v6751_v11 = vsel %vm6744_vm7, %v6742_v0, %v10414_v18  ;;  %v6693_v9 = vsel %vm6690_vm11, %v6684_v38, %v12843_v21  ;;  %v6727_v54 = vsel %vm6726_vm15, %v6718_v62, %v12844_v41  ;;  %v12845_v18 = vcombine.low %v10735_v35, %v10738_v7  ;;  %v6260_v38 = vpop.permute.xlu0 %6259  ;;  %v12849_v62 = vld [vmem:[#allocation153_spill] sm:$0xff]  ;;  %v12850_v41 = vld [vmem:[#allocation44_spill] sm:$0xff] }
 0x407   :  { %6483 = vrot.lane.b32.xlu0 %v12842_v53, %s7093_s18  ;;  %v6760_v43 = vsel %vm12016_vm8, %v6751_v11, %v10597_v2  ;;  %v6702_v59 = vsel %vm6699_vm12, %v6693_v9, %v12846_v32  ;;  %v6736_v0 = vsel %vm6735_vm6, %v6727_v54, %v12847_v31  ;;  %v6677_v2 = vsel %vm12011_vm9, %v6668_v12, %v12848_v34  ;;  %v10928_v21 = vpop.permute.xlu1 %6133 }
 0x408   :  { %6357 = vrot.lane.b32.xlu1 %v12845_v18, %s7089_s12  ;;  %v6769_v61 = vsel %vm12015_vm5, %v6760_v43, %v10774_v13  ;;  %v6711_v11 = vsel %vm6708_vm13, %v6702_v59, %v12849_v62  ;;  %v6745_v53 = vsel %vm6744_vm7, %v6736_v0, %v10309_v4  ;;  %v6686_v54 = vsel %vm6681_vm10, %v6677_v2, %v12850_v41  ;;  %v12851_v13 = vld [vmem:[#allocation203_spill] sm:$0xff]  ;;  %v12853_v4 = vld [vmem:[#allocation28_spill] sm:$0xff]  ;;  %v12854_v59 = vld [vmem:[#allocation9_spill] sm:$0xff] }
 0x409   :  { %v10931_v9 = vsel %vm12012_vm4, %v6769_v61, %v6260_v38  ;;  %v6720_v43 = vsel %vm6717_vm14, %v6711_v11, %v12851_v13  ;;  %v6754_v12 = vsel %vm12016_vm8, %v6745_v53, %v10457_v6  ;;  %v12852_v18 = vcombine.high %v10374_v1, %v10396_v10  ;;  %v12856_v61 = vld [vmem:[#allocation85_spill] sm:$0xff]  ;;  %v12857_v62 = vld [vmem:[#allocation139_spill] sm:$0xff]  ;;  %v12858_v11 = vld [vmem:[#allocation174_spill] sm:$0xff] }
 0x40a   :  { %vm12013_vm9 = vcmask 359424   ;;  %v6695_v32 = vsel %vm6690_vm11, %v6686_v54, %v12853_v4  ;;  %v6729_v31 = vsel %vm6726_vm15, %v6720_v43, %v12854_v59  ;;  %v6763_v0 = vsel %vm12015_vm5, %v6754_v12, %v10649_v60  ;;  %v6280_v34 = vpop.permute.xlu0 %6279  ;;  %v12859_v41 = vld [vmem:[#allocation193_spill] sm:$0xff]  ;;  %v12860_v54 = vld [vmem:[#allocation40_spill] sm:$0xff] }
 0x40b   :  { %6503 = vrot.lane.b32.xlu0 %v12852_v18, %s7094_s19  ;;  %v12855_v6 = vcombine.high %v10419_v17, %v10663_v36  ;;  %v6704_v38 = vsel %vm6699_vm12, %v6695_v32, %v12856_v61  ;;  %v6738_v1 = vsel %vm6735_vm6, %v6729_v31, %v10251_v52  ;;  %v6772_v10 = vsel %vm12012_vm4, %v6763_v0, %v10808_v24  ;;  %v10965_v36 = vpop.permute.xlu1 %6153  ;;  %v12862_v13 = vld [vmem:[#allocation116_spill] sm:$0xff]  ;;  %v12867_v31 = vld [vmem:[#allocation187_spill] sm:$0xff] }
 0x40c   :  { %v2876_v2 = vcombine.high %v10676_v19, %v10679_v49  ;;  %v6713_v60 = vsel %vm6708_vm13, %v6704_v38, %v12857_v62  ;;  %v6747_v17 = vsel %vm6744_vm7, %v6738_v1, %v12858_v11  ;;  %v10968_v53 = vsel %vm12013_vm9, %v6772_v10, %v6280_v34  ;;  %v12861_v49 = vld [vmem:[#allocation112_spill] sm:$0xff] }
 0x40d   :  { %6377 = vrot.lane.b32.xlu1 %v12855_v6, %s7090_s13  ;;  %v3416_v52 = vcombine.high %v10667_v57, %v10670_v48  ;;  %v6722_v24 = vsel %vm6717_vm14, %v6713_v60, %v12859_v41  ;;  %v6756_v19 = vsel %vm12016_vm8, %v6747_v17, %v12860_v54  ;;  %v1736_v43 = vcombine.high %v12862_v13, %v12861_v49  ;;  %v12863_v12 = vld [vmem:[#allocation100_spill] sm:$0xff]  ;;  %v12866_v48 = vld [vmem:[#allocation181_spill] sm:$0xff]  ;;  %v12870_v17 = vld [vmem:[#allocation215_spill] sm:$0xff] }
 0x40e   :  { %v12864_v18 = vld [vmem:[#allocation108_spill] sm:$0xff]  ;;  %v6765_v57 = vsel %vm12015_vm5, %v6756_v19, %v10698_v14  ;;  %v2264_v0 = vcombine.high %v12867_v31, %v12866_v48  ;;  %v6284_v1 = vpop.permute.xlu0 %6283  ;;  %v3964_v10 = vcombine.high %v10689_v8, %v10692_v3  ;;  %v2296_v34 = vcombine.high %v10367_v27, %v10377_v16  ;;  %v12877_v48 = vld [vmem:[#allocation81_spill] sm:$0xff] }
 0x40f   :  { %6507 = vrot.lane.b32.xlu0 %v2876_v2, %s7094_s19  ;;  %v1768_v4 = vcombine.high %v12864_v18, %v12863_v12  ;;  %v12865_v32 = vld [vmem:[#allocation12_spill] sm:$0xff]  ;;  %v6774_v38 = vsel %vm12012_vm4, %v6765_v57, %v10846_v46  ;;  %v10998_v62 = vpop.permute.xlu1 %6157  ;;  %v4504_v11 = vcombine.high %v10683_v23, %v10686_v51  ;;  %v2824_v46 = vcombine.high %v10433_v15, %v10436_v37  ;;  %v12875_v12 = vld [vmem:[#allocation210_spill] sm:$0xff]  ;;  %v12876_v57 = vld [vmem:[#allocation75_spill] sm:$0xff] }
 0x410   :  { %v6731_v59 = vsel %vm6726_vm15, %v6722_v24, %v12865_v32  ;;  %v12868_v6 = vld [vmem:[#allocation128_spill] sm:$0xff]  ;;  %v6783_v60 = vsel %vm12013_vm9, %v6774_v38, %v6284_v1  ;;  %v2856_v27 = vcombine.high %v10479_v20, %v10482_v30  ;;  %v3352_v16 = vcombine.high %v10488_v58, %v10511_v45 }
 0x411   :  { %6381 = vrot.lane.b32.xlu1 %v3416_v52, %s7090_s13  ;;  %v6740_v61 = vsel %vm6735_vm6, %v6731_v59, %v12868_v6  ;;  %v12869_v2 = vld [vmem:[#allocation184_spill] sm:$0xff]  ;;  %v3384_v8 = vcombine.high %v10542_v5, %v10545_v22  ;;  %v5052_v51 = vcombine.high %v10709_v39, %v10712_v50  ;;  %v11022_v20 = vrot.slane %v1736_v43, %v7272_v40  ;;  %v12874_v43 = vld [vmem:[#allocation78_spill] sm:$0xff] }
 0x412   :  { %v6749_v14 = vsel %vm6744_vm7, %v6740_v61, %v12869_v2  ;;  %v6288_v37 = vpop.permute.xlu0 %6287  ;;  %v11025_v30 = vrot.slane %v1768_v4, %v7272_v40  ;;  %v5592_v5 = vcombine.high %v10735_v35, %v10738_v7  ;;  %v11033_v22 = vrot.slane %v2264_v0, %v7272_v40  ;;  %v12878_v0 = vld [vmem:[#allocation84_spill] sm:$0xff]  ;;  %v12879_v6 = vld [vmem:[#allocation90_spill] sm:$0xff]  ;;  %v12881_v2 = vld [vmem:[#allocation37_spill] sm:$0xff] }
 0x413   :  { %v6758_v52 = vsel %vm12016_vm8, %v6749_v14, %v12870_v17  ;;  %6511 = vrot.lane.b32.xlu0 %v3964_v10, %s7094_s19  ;;  %v11027_v58 = vpop.permute.xlu1 %6161  ;;  %v11036_v3 = vrot.slane %v2296_v34, %v7272_v40  ;;  %v11040_v50 = vrot.slane %v2824_v46, %v7272_v40  ;;  %v3912_v39 = vcombine.high %v10564_v44, %v10567_v47  ;;  %v12871_v47 = vld [vmem:[#allocation217_spill] sm:$0xff] }
 0x414   :  { %v6767_v23 = vsel %vm12015_vm5, %v6758_v52, %v10730_v29  ;;  %v11046_v29 = vrot.slane %v3352_v16, %v7272_v40  ;;  %v11049_v35 = vrot.slane %v3384_v8, %v7272_v40  ;;  %v11052_v7 = vrot.slane %v2856_v27, %v7272_v40  ;;  %v12880_v34 = vld [vmem:[#allocation45_spill] sm:$0xff] }
 0x415   :  { %6385 = vrot.lane.b32.xlu1 %v4504_v11, %s7090_s13  ;;  %v6776_v15 = vsel %vm12012_vm4, %v6767_v23, %v10886_v63  ;;  %v3944_v63 = vcombine.high %v10570_v26, %v10573_v42  ;;  %v4440_v41 = vcombine.high %v10577_v55, %v10580_v33  ;;  %v1789_v44 = vcombine.low %v11022_v20, %v11025_v30  ;;  %v12872_v33 = vld [vmem:[#allocation213_spill] sm:$0xff] }
 0x416   :  { %v6785_v45 = vsel %vm12013_vm9, %v6776_v15, %v6288_v37  ;;  %v6292_v24 = vpop.permute.xlu0 %6291  ;;  %v4472_v54 = vcombine.high %v12871_v47, %v10586_v25  ;;  %v2329_v13 = vcombine.low %v11033_v22, %v11036_v3  ;;  %vm12014_vm4 = vcmask 375808   ;;  %v12873_v25 = vld [vmem:[#allocation148_spill] sm:$0xff]  ;;  %v12882_v11 = vld [vmem:[#allocation49_spill] sm:$0xff] }
 0x417   :  { %6515 = vrot.lane.b32.xlu0 %v5052_v51, %s7094_s19  ;;  %v11062_v19 = vpop.permute.xlu1 %6165  ;;  %v6787_v49 = vsel %vm12013_vm9, %v10931_v9, %v6292_v24  ;;  %v3417_v26 = vcombine.low %v11046_v29, %v11049_v35  ;;  %v2877_v42 = vcombine.low %v11040_v50, %v11052_v7  ;;  %v11075_v55 = vrot.slane %v3912_v39, %v7272_v40  ;;  %v12883_v46 = vld [vmem:[#allocation41_spill] sm:$0xff] }
 0x418   :  { %v5000_v9 = vcombine.high %v12873_v25, %v12872_v33  ;;  %v5032_v18 = vcombine.high %v12875_v12, %v12874_v43  ;;  %v11082_v32 = vrot.slane %v4440_v41, %v7272_v40  ;;  %v11085_v59 = vrot.slane %v3944_v63, %v7272_v40  ;;  %v12885_v24 = vld [vmem:[#allocation61_spill] sm:$0xff] }
 0x419   :  { %6389 = vrot.lane.b32.xlu1 %v5592_v5, %s7090_s13  ;;  %v5528_v31 = vcombine.high %v12877_v48, %v12876_v57  ;;  %v5560_v61 = vcombine.high %v12879_v6, %v12878_v0  ;;  %v11096_v10 = vrot.slane %v4472_v54, %v7272_v40  ;;  %v2200_v14 = vcombine.high %v12881_v2, %v12880_v34  ;;  %v12884_v5 = vld [vmem:[#allocation30_spill] sm:$0xff]  ;;  %v12887_v33 = vld [vmem:[#allocation65_spill] sm:$0xff]  ;;  %v12891_v6 = vld [vmem:[#allocation111_spill] sm:$0xff] }
 0x41a   :  { %v6312_v4 = vpop.permute.xlu0 %6311  ;;  %v2216_v17 = vcombine.high %v12883_v46, %v12882_v11  ;;  %v3965_v27 = vcombine.low %v11075_v55, %v11085_v59  ;;  %v11107_v16 = vrot.slane %v5000_v9, %v7272_v40  ;;  %v12888_v25 = vld [vmem:[#allocation57_spill] sm:$0xff]  ;;  %v1790_v12 = vcombine.high %v11022_v20, %v11025_v30  ;;  %v12893_v2 = vld [vmem:[#allocation123_spill] sm:$0xff] }
 0x41b   :  { %6535 = vrot.lane.b32.xlu0 %v1789_v44, %s7095_s0  ;;  %v11091_v38 = vpop.permute.xlu1 %6185  ;;  %v6790_v1 = vsel %vm12014_vm4, %v10968_v53, %v6312_v4  ;;  %v11110_v53 = vrot.slane %v5032_v18, %v7272_v40  ;;  %v4505_v15 = vcombine.low %v11082_v32, %v11096_v10  ;;  %v11120_v37 = vrot.slane %v5528_v31, %v7272_v40  ;;  %v12886_v44 = vld [vmem:[#allocation53_spill] sm:$0xff]  ;;  %v12889_v18 = vld [vmem:[#allocation107_spill] sm:$0xff] }
 0x41c   :  { %v11123_v51 = vrot.slane %v5560_v61, %v7272_v40  ;;  %v11128_v39 = vrot.slane %v2200_v14, %v12884_v5  ;;  %v11131_v63 = vrot.slane %v2216_v17, %v12884_v5  ;;  %v2232_v47 = vcombine.high %v12886_v44, %v12885_v24  ;;  %v12890_v4 = vld [vmem:[#allocation99_spill] sm:$0xff]  ;;  %v12897_v17 = vld [vmem:[#allocation177_spill] sm:$0xff]  ;;  %v12904_v44 = vld [vmem:[#allocation192_spill] sm:$0xff] }
 0x41d   :  { %6409 = vrot.lane.b32.xlu1 %v2329_v13, %s7091_s14  ;;  %v5053_v41 = vcombine.low %v11107_v16, %v11110_v53  ;;  %v2248_v9 = vcombine.high %v12888_v25, %v12887_v33  ;;  %v3288_v57 = vcombine.high %v12890_v4, %v12889_v18  ;;  %v2330_v0 = vcombine.high %v11033_v22, %v11036_v3  ;;  %v12892_v61 = vld [vmem:[#allocation103_spill] sm:$0xff]  ;;  %v12902_v3 = vld [vmem:[#allocation186_spill] sm:$0xff]  ;;  %v12905_v33 = vld [vmem:[#allocation60_spill] sm:$0xff] }
 0x41e   :  { %v6316_v52 = vpop.permute.xlu0 %6315  ;;  %v3304_v34 = vcombine.high %v12892_v61, %v12891_v6  ;;  %v12894_v14 = vld [vmem:[#allocation115_spill] sm:$0xff]  ;;  %vm12019_vm9 = vcmask 392192   ;;  %v12906_v25 = vld [vmem:[#allocation70_spill] sm:$0xff]  ;;  %v12908_v18 = vld [vmem:[#allocation56_spill] sm:$0xff]  ;;  %v2878_v61 = vcombine.high %v11040_v50, %v11052_v7  ;;  %vm6807_vm5 = vcmask 408576  }
 0x41f   :  { %6539 = vrot.lane.b32.xlu0 %v2877_v42, %s7095_s0  ;;  %v11112_v8 = vpop.permute.xlu1 %6189  ;;  %v11115_v23 = vsel %vm12014_vm4, %v6783_v60, %v6316_v52  ;;  %v2279_v42 = vcombine.low %v11128_v39, %v11131_v63  ;;  %v3320_v20 = vcombine.high %v12894_v14, %v12893_v2  ;;  %v12895_v30 = vld [vmem:[#allocation127_spill] sm:$0xff]  ;;  %v12909_v2 = vld [vmem:[#allocation169_spill] sm:$0xff]  ;;  %v12910_v14 = vld [vmem:[#allocation102_spill] sm:$0xff]  ;;  %vm12932_vm8 = vcmask 97280  }
 0x420   :  { %v12896_v11 = vld [vmem:[#allocation119_spill] sm:$0xff] }
 0x421   :  { %6413 = vrot.lane.b32.xlu1 %v3417_v26, %s7091_s14  ;;  %v5593_v26 = vcombine.low %v11120_v37, %v11123_v51  ;;  %v3336_v46 = vcombine.high %v12896_v11, %v12895_v30  ;;  %v12898_v52 = vld [vmem:[#allocation167_spill] sm:$0xff]  ;;  %v5496_v30 = vcombine.high %v12910_v14, %v12909_v2  ;;  %v12911_v11 = vld [vmem:[#allocation17_spill] sm:$0xff]  ;;  %v11207_v50 = vrot.slane %v3320_v20, %v12884_v5 }
 0x422   :  { %v6320_v60 = vpop.permute.xlu0 %6319  ;;  %v12901_v22 = vld [vmem:[#allocation195_spill] sm:$0xff] }
 0x423   :  { %6543 = vrot.lane.b32.xlu0 %v3965_v27, %s7095_s0  ;;  %v11137_v54 = vpop.permute.xlu1 %6193  ;;  %v11140_v13 = vsel %vm12014_vm4, %v6785_v45, %v6320_v60  ;;  %v11153_v45 = vrot.slane %v2232_v47, %v12884_v5  ;;  %v12899_v27 = vld [vmem:[#allocation182_spill] sm:$0xff]  ;;  %v12903_v24 = vld [vmem:[#allocation199_spill] sm:$0xff]  ;;  %v11210_v7 = vrot.slane %v3336_v46, %v12884_v5 }
 0x424   :  { %v4424_v47 = vcombine.high %v12904_v44, %v12903_v24 }
 0x425   :  { %6417 = vrot.lane.b32.xlu1 %v4505_v15, %s7091_s14  ;;  %v12900_v15 = vld [vmem:[#allocation172_spill] sm:$0xff] }
 0x426   :  { %v6324_v43 = vpop.permute.xlu0 %6323  ;;  %v4392_v60 = vcombine.high %v12900_v15, %v12899_v27  ;;  %v3418_v27 = vcombine.high %v11046_v29, %v11049_v35  ;;  %v11201_v15 = vrot.slane %v3288_v57, %v12884_v5  ;;  %v11223_v35 = vrot.slane %v4424_v47, %v12884_v5 }
 0x427   :  { %6547 = vrot.lane.b32.xlu0 %v5053_v41, %s7095_s0  ;;  %v11157_v48 = vpop.permute.xlu1 %6197  ;;  %v11160_v31 = vsel %vm12014_vm4, %v6787_v49, %v6324_v43  ;;  %v4376_v49 = vcombine.high %v12898_v52, %v12897_v17  ;;  %v4408_v41 = vcombine.high %v12902_v3, %v12901_v22  ;;  %v5464_v43 = vcombine.high %v12906_v25, %v12905_v33  ;;  %v12912_v17 = vld [vmem:[#allocation179_spill] sm:$0xff] }
 0x428   :  { %v5512_v52 = vcombine.high %v12912_v17, %v12911_v11  ;;  %v11204_v22 = vrot.slane %v3304_v34, %v12884_v5  ;;  %v11217_v3 = vrot.slane %v4392_v60, %v12884_v5  ;;  %v11237_v60 = vrot.slane %v5496_v30, %v12884_v5  ;;  %v12920_v30 = vld [vmem:[#allocation129_spill] sm:$0xff]  ;;  %v12921_v17 = vld [vmem:[#allocation155_spill] sm:$0xff] }
 0x429   :  { %6421 = vrot.lane.b32.xlu1 %v5593_v26, %s7091_s14  ;;  %v11181_v26 = vrot.slane %v2248_v9, %v12884_v5  ;;  %v11220_v29 = vrot.slane %v4408_v41, %v12884_v5  ;;  %v11229_v34 = vrot.slane %v5464_v43, %v12884_v5  ;;  %v4506_v47 = vcombine.high %v11082_v32, %v11096_v10 }
 0x42a   :  { %v6344_v6 = vpop.permute.xlu0 %6343  ;;  %12914 = vst [vmem:[#allocation135_spill] sm:$0xff] %v11237_v60  ;;  %v11240_v41 = vrot.slane %v5512_v52, %v12884_v5  ;;  %v3367_v33 = vcombine.low %v11201_v15, %v11204_v22  ;;  %v5054_v10 = vcombine.high %v11107_v16, %v11110_v53  ;;  %v11265_v25 = vrot.slane %v2279_v42, %v7272_v40  ;;  %v12917_v16 = vld [vmem:[#allocation219_spill] sm:$0xff]  ;;  %v12918_v53 = vld [vmem:[#allocation220_spill] sm:$0xff] }
 0x42b   :  { %6567 = vrot.lane.b32.xlu0 %v1790_v12, %s7096_s20  ;;  %v12907_v12 = vld [vmem:[#allocation126_spill] sm:$0xff]  ;;  %v11196_v9 = vsel %vm12019_vm9, %v6790_v1, %v6344_v6  ;;  %v11214_v1 = vrot.slane %v4376_v49, %v12884_v5  ;;  %v2311_v57 = vcombine.low %v11153_v45, %v11181_v26  ;;  %12913 = vst [vmem:[#allocation142_spill] sm:$0xff] %v11229_v34  ;;  %vm12929_vm4 = vcmask 80896  }
 0x42c   :  { %v5480_v4 = vcombine.high %v12908_v18, %v12907_v12  ;;  %v3966_v49 = vcombine.high %v11075_v55, %v11085_v59  ;;  %12915 = vst [vmem:[#allocation145_spill] sm:$0xff] %v11240_v41  ;;  %v3399_v55 = vcombine.low %v11207_v50, %v11210_v7  ;;  %v5575_v12 = vcombine.low %v11237_v60, %v11240_v41  ;;  %v12946_v41 = vld [vmem:[#allocation16_spill] sm:$0xff] }
 0x42d   :  { %6441 = vrot.lane.b32.xlu1 %v2330_v0, %s7092_s15  ;;  %v11193_v0 = vpop.permute.xlu1 %6217  ;;  %v4455_v59 = vcombine.low %v11214_v1, %v11217_v3  ;;  %v11268_v43 = vrot.slane %v2311_v57, %v7272_v40  ;;  %v5594_v6 = vcombine.high %v11120_v37, %v11123_v51  ;;  %v12919_v42 = vcombine.low %v12917_v16, %v12918_v53  ;;  %v12928_v53 = vld [vmem:[#allocation121_spill] sm:$0xff] }
 0x42e   :  { %v11232_v20 = vrot.slane %v5480_v4, %v12884_v5  ;;  %v6348_v46 = vpop.permute.xlu0 %6347  ;;  %v4487_v5 = vcombine.low %v11220_v29, %v11223_v35  ;;  %v11287_v14 = vrot.slane %v3367_v33, %v7272_v40  ;;  %v12924_v33 = vld [vmem:[#allocation69_spill] sm:$0xff] }
 0x42f   :  { %6571 = vrot.lane.b32.xlu0 %v2878_v61, %s7096_s20  ;;  %v11246_v44 = vsel %vm12019_vm9, %v11115_v23, %v6348_v46  ;;  %v12916_v61 = vld [vmem:[#allocation77_spill] sm:$0xff]  ;;  %v11296_v37 = vrot.slane %v4455_v59, %v7272_v40  ;;  %v2331_v57 = vcombine.low %v11265_v25, %v11268_v43 }
 0x430   :  { %v5543_v23 = vcombine.low %v11229_v34, %v11232_v20  ;;  %v6599_v2 = vsel %vm6591_vm0, %v12919_v42, %v12916_v61  ;;  %v11299_v51 = vrot.slane %v4487_v5, %v7272_v40  ;;  %v11322_v61 = vrot.slane %v5575_v12, %v7272_v40  ;;  %v12957_v34 = vld [vmem:[#allocation143_spill] sm:$0xff] }
 0x431   :  { %6445 = vrot.lane.b32.xlu1 %v3418_v27, %s7092_s15  ;;  %v11242_v24 = vpop.permute.xlu1 %6221  ;;  %v6608_v11 = vsel %vm6600_vm1, %v6599_v2, %v12920_v30  ;;  %v12930_v30 = vld [vmem:[#allocation154_spill] sm:$0xff]  ;;  %v12944_v2 = vld [vmem:[#allocation63_spill] sm:$0xff] }
 0x432   :  { %v6352_v32 = vpop.permute.xlu0 %6351  ;;  %v6617_v52 = vsel %vm6609_vm2, %v6608_v11, %v12921_v17  ;;  %v11306_v46 = vrot.slane %v5543_v23, %v7272_v40  ;;  %v12927_v23 = vld [vmem:[#allocation80_spill] sm:$0xff]  ;;  %v12931_v17 = vld [vmem:[#allocation194_spill] sm:$0xff] }
 0x433   :  { %6575 = vrot.lane.b32.xlu0 %v3966_v49, %s7096_s20  ;;  %v11276_v4 = vsel %vm12019_vm9, %v11140_v13, %v6352_v32  ;;  %v11293_v13 = vrot.slane %v3399_v55, %v7272_v40  ;;  %v12922_v49 = vld [vmem:[#allocation20_spill] sm:$0xff]  ;;  %v12926_v32 = vld [vmem:[#allocation59_spill] sm:$0xff] }
 0x434   :  { %v6626_v5 = vsel %vm6618_vm3, %v6617_v52, %v12926_v32  ;;  %v4507_v52 = vcombine.low %v11296_v37, %v11299_v51  ;;  %v12938_v32 = vld [vmem:[#allocation188_spill] sm:$0xff] }
 0x435   :  { %6449 = vrot.lane.b32.xlu1 %v4506_v47, %s7092_s15  ;;  %v11272_v18 = vpop.permute.xlu1 %6225  ;;  %v12923_v47 = vld [vmem:[#allocation68_spill] sm:$0xff]  ;;  %v6635_v42 = vsel %vm12929_vm4, %v6626_v5, %v12928_v53  ;;  %v3419_v12 = vcombine.low %v11287_v14, %v11293_v13  ;;  %v12939_v5 = vld [vmem:[#allocation189_spill] sm:$0xff]  ;;  %v12941_v53 = vld [vmem:[#allocation19_spill] sm:$0xff]  ;;  %vm12943_vm4 = vcmask 113664  }
 0x436   :  { %v6356_v27 = vpop.permute.xlu0 %6355  ;;  %v12925_v55 = vcombine.low %v12923_v47, %v12924_v33  ;;  %v12935_v47 = vld [vmem:[#allocation131_spill] sm:$0xff] }
 0x437   :  { %6579 = vrot.lane.b32.xlu0 %v5054_v10, %s7096_s20 }
 0x438   :  { %v6593_v59 = vsel %vm6591_vm0, %v12925_v55, %v12922_v49  ;;  %v12934_v49 = vld [vmem:[#allocation130_spill] sm:$0xff] }
 0x439   :  { %6453 = vrot.lane.b32.xlu1 %v5594_v6, %s7092_s15  ;;  %v11315_v10 = vpop.permute.xlu1 %6229  ;;  %v11319_v6 = vsel %vm12019_vm9, %v11160_v31, %v6356_v27  ;;  %v6602_v16 = vsel %vm6600_vm1, %v6593_v59, %v12927_v23  ;;  %v6644_v31 = vsel %vm12932_vm8, %v6635_v42, %v12931_v17  ;;  %v12933_v27 = vld [vmem:[#allocation23_spill] sm:$0xff]  ;;  %v12936_v33 = vcombine.low %v12934_v49, %v12935_v47  ;;  %v12937_v59 = vld [vmem:[#allocation14_spill] sm:$0xff] }
 0x43a   :  { %v6611_v11 = vsel %vm6609_vm2, %v6602_v16, %v12930_v30  ;;  %v12940_v23 = vcombine.low %v12938_v32, %v12939_v5  ;;  %v12942_v42 = vld [vmem:[#allocation114_spill] sm:$0xff]  ;;  %v6376_v17 = vpop.permute.xlu0 %6375  ;;  %vm12945_vm8 = vcmask 80896   ;;  %vm12947_vm9 = vcmask 130048   ;;  %v12950_v5 = vld [vmem:[#allocation125_spill] sm:$0xff] }
 0x43b   :  { %v6595_v55 = vsel %vm6591_vm0, %v12936_v33, %v12933_v27  ;;  %v6653_v30 = vsel %vm12943_vm4, %v6644_v31, %v12942_v42  ;;  %v11361_v47 = vsel %vm6807_vm5, %v11196_v9, %v6376_v17  ;;  %v5595_v33 = vcombine.low %v11306_v46, %v11322_v61  ;;  %v12949_v31 = vld [vmem:[#allocation92_spill] sm:$0xff]  ;;  %v12955_v9 = vld [vmem:[#allocation201_spill] sm:$0xff] }
 0x43c   :  { %v6597_v16 = vsel %vm6591_vm0, %v12940_v23, %v12937_v59  ;;  %v6662_v49 = vsel %vm12947_vm9, %v6653_v30, %v12946_v41  ;;  %vm12951_vm0 = vcmask 97280   ;;  %v12952_v23 = vld [vmem:[#allocation79_spill] sm:$0xff]  ;;  %vm12953_vm9 = vcmask 146432   ;;  %v12956_v30 = vld [vmem:[#allocation197_spill] sm:$0xff] }
 0x43d   :  { %6473 = vrot.lane.b32.xlu1 %v2331_v57, %s7093_s18  ;;  %v6620_v57 = vsel %vm6618_vm3, %v6611_v11, %v12941_v53  ;;  %v11357_v27 = vpop.permute.xlu1 %6249  ;;  %v12948_v11 = vld [vmem:[#allocation89_spill] sm:$0xff]  ;;  %v6606_v32 = vsel %vm6600_vm1, %v6597_v16, %v12949_v31  ;;  %v6671_v41 = vsel %vm12953_vm9, %v6662_v49, %v12952_v23  ;;  %v12954_v53 = vld [vmem:[#allocation158_spill] sm:$0xff]  ;;  %v12959_v16 = vld [vmem:[#allocation32_spill] sm:$0xff] }
 0x43e   :  { %v6629_v60 = vsel %vm12945_vm8, %v6620_v57, %v12944_v2  ;;  %v6604_v59 = vsel %vm6600_vm1, %v6595_v55, %v12948_v11  ;;  %v6615_v42 = vsel %vm6609_vm2, %v6606_v32, %v12955_v9  ;;  %vm12958_vm8 = vcmask 162816   ;;  %v12960_v11 = vld [vmem:[#allocation47_spill] sm:$0xff]  ;;  %v12961_v31 = vld [vmem:[#allocation106_spill] sm:$0xff]  ;;  %v6380_v23 = vpop.permute.xlu0 %6379 }
 0x43f   :  { %v6638_v2 = vsel %vm12951_vm0, %v6629_v60, %v12950_v5  ;;  %v6613_v57 = vsel %vm6609_vm2, %v6604_v59, %v12954_v53  ;;  %v6680_v55 = vsel %vm12958_vm8, %v6671_v41, %v12957_v34  ;;  %v6624_v49 = vsel %vm6618_vm3, %v6615_v42, %v12960_v11  ;;  %v12963_v5 = vld [vmem:[#allocation196_spill] sm:$0xff]  ;;  %v12964_v53 = vld [vmem:[#allocation105_spill] sm:$0xff]  ;;  %v12966_v9 = vld [vmem:[#allocation94_spill] sm:$0xff] }
 0x440   :  { %v6647_v17 = vsel %vm12943_vm4, %v6638_v2, %v12956_v30  ;;  %v6622_v60 = vsel %vm6618_vm3, %v6613_v57, %v12959_v16  ;;  %vm12962_vm1 = vcmask 130048   ;;  %v6689_v32 = vsel %vm6681_vm10, %v6680_v55, %v12963_v5  ;;  %vm12967_vm0 = vmmov %vm12953_vm9  ;;  %v12969_v30 = vld [vmem:[#allocation109_spill] sm:$0xff]  ;;  %v12971_v55 = vld [vmem:[#allocation175_spill] sm:$0xff] }
 0x441   :  { %6477 = vrot.lane.b32.xlu1 %v3419_v12, %s7093_s18  ;;  %v6656_v59 = vsel %vm12962_vm1, %v6647_v17, %v12961_v31  ;;  %vm12965_vm2 = vcmask 80896   ;;  %v12968_v12 = vld [vmem:[#allocation24_spill] sm:$0xff]  ;;  %v11396_v57 = vpop.permute.xlu1 %6253  ;;  %v11400_v42 = vsel %vm6807_vm5, %v11246_v44, %v6380_v23  ;;  %vm12972_vm9 = vcmask 97280   ;;  %v12973_v11 = vld [vmem:[#allocation159_spill] sm:$0xff]  ;;  %vm12974_vm4 = vmmov %vm12958_vm8 }
 0x442   :  { %v6631_v2 = vsel %vm12965_vm2, %v6622_v60, %v12964_v53  ;;  %v6665_v34 = vsel %vm12967_vm0, %v6656_v59, %v12966_v9  ;;  %v6698_v41 = vsel %vm6690_vm11, %v6689_v32, %v12968_v12  ;;  %vm12970_vm3 = vmmov %vm12965_vm2  ;;  %v12975_v31 = vld [vmem:[#allocation124_spill] sm:$0xff]  ;;  %v12978_v53 = vld [vmem:[#allocation222_spill] sm:$0xff]  ;;  %vm12979_vm1 = vcmask 113664  }
 0x443   :  { %v6633_v17 = vsel %vm12970_vm3, %v6624_v49, %v12969_v30  ;;  %v6640_v16 = vsel %vm12972_vm9, %v6631_v2, %v12971_v55  ;;  %v6674_v60 = vsel %vm12974_vm4, %v6665_v34, %v12973_v11  ;;  %v6707_v59 = vsel %vm6699_vm12, %v6698_v41, %v12975_v31  ;;  %v12976_v5 = vld [vmem:[#allocation180_spill] sm:$0xff]  ;;  %vm12977_vm8 = vmmov %vm12972_vm9  ;;  %v12980_v44 = vld [vmem:[#allocation206_spill] sm:$0xff]  ;;  %v6384_v31 = vpop.permute.xlu0 %6383 }
 0x444   :  { %v6642_v32 = vsel %vm12977_vm8, %v6633_v17, %v12976_v5  ;;  %v6649_v9 = vsel %vm12979_vm1, %v6640_v16, %v12978_v53  ;;  %v6683_v23 = vsel %vm6681_vm10, %v6674_v60, %v12980_v44  ;;  %v12981_v12 = vld [vmem:[#allocation171_spill] sm:$0xff]  ;;  %vm12983_vm2 = vmmov %vm12979_vm1  ;;  %v12984_v30 = vld [vmem:[#allocation58_spill] sm:$0xff]  ;;  %vm12985_vm0 = vcmask 130048  }
 0x445   :  { %v6716_v49 = vsel %vm6708_vm13, %v6707_v59, %v12981_v12  ;;  %6481 = vrot.lane.b32.xlu1 %v4507_v52, %s7093_s18  ;;  %v12982_v2 = vld [vmem:[#allocation71_spill] sm:$0xff]  ;;  %v6658_v41 = vsel %vm12985_vm0, %v6649_v9, %v12984_v30  ;;  %v12987_v11 = vld [vmem:[#allocation72_spill] sm:$0xff]  ;;  %vm12989_vm3 = vcmask 146432   ;;  %v12990_v53 = vld [vmem:[#allocation46_spill] sm:$0xff]  ;;  %v11437_v9 = vsel %vm6807_vm5, %v11276_v4, %v6384_v31 }
 0x446   :  { %v6651_v34 = vsel %vm12983_vm2, %v6642_v32, %v12982_v2  ;;  %v12986_v55 = vld [vmem:[#allocation15_spill] sm:$0xff]  ;;  %v6725_v16 = vsel %vm6717_vm14, %v6716_v49, %v12987_v11  ;;  %v12991_v52 = vld [vmem:[#allocation42_spill] sm:$0xff]  ;;  %v11433_v32 = vpop.permute.xlu1 %6257  ;;  %vm12993_vm9 = vmmov %vm12985_vm0  ;;  %vm13004_vm2 = vcmask 310272   ;;  %vm13007_vm0 = vcmask 326656  }
 0x447   :  { %v6692_v17 = vsel %vm6690_vm11, %v6683_v23, %v12986_v55  ;;  %v12988_v5 = vld [vmem:[#allocation91_spill] sm:$0xff]  ;;  %v6734_v44 = vsel %vm6726_vm15, %v6725_v16, %v12991_v52  ;;  %v12992_v23 = vld [vmem:[#allocation22_spill] sm:$0xff]  ;;  %v12995_v30 = vld [vmem:[#allocation104_spill] sm:$0xff] }
 0x448   :  { %v6667_v60 = vsel %vm12989_vm3, %v6658_v41, %v12988_v5  ;;  %v6701_v59 = vsel %vm6699_vm12, %v6692_v17, %v12990_v53  ;;  %v6660_v12 = vsel %vm12993_vm9, %v6651_v34, %v12992_v23  ;;  %v12994_v49 = vld [vmem:[#allocation146_spill] sm:$0xff]  ;;  %v6743_v55 = vsel %vm6735_vm6, %v6734_v44, %v10928_v21  ;;  %vm12997_vm8 = vmmov %vm12989_vm3  ;;  %v12999_v4 = vld [vmem:[#allocation164_spill] sm:$0xff] }
 0x449   :  { %v6676_v2 = vsel %vm12974_vm4, %v6667_v60, %v12994_v49  ;;  %v6710_v41 = vsel %vm6708_vm13, %v6701_v59, %v12995_v30  ;;  %v12996_v17 = vld [vmem:[#allocation82_spill] sm:$0xff]  ;;  %v6752_v34 = vsel %vm6744_vm7, %v6743_v55, %v11062_v19  ;;  %6485 = vrot.lane.b32.xlu1 %v5595_v33, %s7093_s18  ;;  %v13000_v60 = vld [vmem:[#allocation157_spill] sm:$0xff]  ;;  %vm13001_vm1 = vmmov %vm12974_vm4  ;;  %vm13009_vm3 = vcmask 343040  }
 0x44a   :  { %v6669_v11 = vsel %vm12997_vm8, %v6660_v12, %v12996_v17  ;;  %v12998_v16 = vld [vmem:[#allocation198_spill] sm:$0xff]  ;;  %v6719_v31 = vsel %vm6717_vm14, %v6710_v41, %v12999_v4  ;;  %v13003_v52 = vld [vmem:[#allocation93_spill] sm:$0xff]  ;;  %v6761_v23 = vsel %vm13004_vm2, %v6752_v34, %v11157_v48  ;;  %v6388_v12 = vpop.permute.xlu0 %6387  ;;  %v6262_v41 = vpop.permute.xlu1 %6261  ;;  %v13008_v17 = vld [vmem:[#allocation168_spill] sm:$0xff]  ;;  %vm6816_vm9 = vcmask 424960  }
 0x44b   :  { %v6685_v5 = vsel %vm6681_vm10, %v6676_v2, %v12998_v16  ;;  %v6678_v53 = vsel %vm13001_vm1, %v6669_v11, %v13000_v60  ;;  %v13002_v59 = vld [vmem:[#allocation18_spill] sm:$0xff]  ;;  %v6728_v44 = vsel %vm6726_vm15, %v6719_v31, %v13003_v52  ;;  %v6770_v33 = vsel %vm13007_vm0, %v6761_v23, %v11315_v10  ;;  %vm13012_vm4 = vmmov %vm13004_vm2  ;;  %v13014_v60 = vld [vmem:[#allocation27_spill] sm:$0xff] }
 0x44c   :  { %v6694_v21 = vsel %vm6690_vm11, %v6685_v5, %v13002_v59  ;;  %v13005_v49 = vld [vmem:[#allocation38_spill] sm:$0xff]  ;;  %v6814_v55 = vsel %vm6807_vm5, %v11319_v6, %v6388_v12  ;;  %v6779_v16 = vsel %vm13009_vm3, %v6770_v33, %v6262_v41  ;;  %v13010_v5 = vld [vmem:[#allocation204_spill] sm:$0xff]  ;;  %v13013_v6 = vcombine.high %v11265_v25, %v11268_v43  ;;  %v13015_v59 = vld [vmem:[#allocation87_spill] sm:$0xff] }
 0x44d   :  { %v6703_v2 = vsel %vm6699_vm12, %v6694_v21, %v13005_v49  ;;  %v13006_v30 = vld [vmem:[#allocation54_spill] sm:$0xff]  ;;  %v6687_v4 = vsel %vm6681_vm10, %v6678_v53, %v13010_v5  ;;  %vm13016_vm8 = vmmov %vm13007_vm0  ;;  %v13017_v23 = vld [vmem:[#allocation120_spill] sm:$0xff] }
 0x44e   :  { %v6737_v19 = vsel %vm6735_vm6, %v6728_v44, %v13006_v30  ;;  %v6712_v11 = vsel %vm6708_vm13, %v6703_v2, %v13008_v17  ;;  %v13011_v31 = vld [vmem:[#allocation134_spill] sm:$0xff]  ;;  %6505 = vrot.lane.b32.xlu1 %v13013_v6, %s7094_s19  ;;  %v6408_v52 = vpop.permute.xlu0 %6407  ;;  %v3420_v44 = vcombine.high %v11287_v14, %v11293_v13  ;;  %vm13018_vm10 = vmmov %vm13009_vm3  ;;  %v6282_v12 = vpop.permute.xlu1 %6281  ;;  %v13021_v30 = vld [vmem:[#allocation211_spill] sm:$0xff] }
 0x44f   :  { %v6746_v48 = vsel %vm6744_vm7, %v6737_v19, %v10965_v36  ;;  %v6721_v34 = vsel %vm6717_vm14, %v6712_v11, %v13011_v31  ;;  %v6696_v36 = vsel %vm6690_vm11, %v6687_v4, %v13014_v60  ;;  %v11503_v49 = vsel %vm6816_vm9, %v11361_v47, %v6408_v52  ;;  %v13019_v2 = vld [vmem:[#allocation178_spill] sm:$0xff]  ;;  %v13023_v33 = vld [vmem:[#allocation21_spill] sm:$0xff] }
 0x450   :  { %v6755_v10 = vsel %vm13012_vm4, %v6746_v48, %v11091_v38  ;;  %v6730_v21 = vsel %vm6726_vm15, %v6721_v34, %v13015_v59  ;;  %v6705_v38 = vsel %vm6699_vm12, %v6696_v36, %v13017_v23  ;;  %vm13020_vm11 = vcmask 359424   ;;  %vm13022_vm12 = vmmov %vm13004_vm2  ;;  %v13031_v60 = vld [vmem:[#allocation142_spill] sm:$0xff]  ;;  %v13032_v59 = vld [vmem:[#allocation145_spill] sm:$0xff] }
 0x451   :  { %v6764_v53 = vsel %vm13016_vm8, %v6755_v10, %v11193_v0  ;;  %v6739_v25 = vsel %vm6735_vm6, %v6730_v21, %v10856_v28  ;;  %v6714_v0 = vsel %vm6708_vm13, %v6705_v38, %v13019_v2  ;;  %v2312_v47 = vcombine.high %v11153_v45, %v11181_v26  ;;  %vm13024_vm13 = vmmov %vm13007_vm0 }
 0x452   :  { %v6773_v43 = vsel %vm13018_vm10, %v6764_v53, %v11357_v27  ;;  %v6748_v14 = vsel %vm6744_vm7, %v6739_v25, %v10998_v62  ;;  %v6723_v19 = vsel %vm6717_vm14, %v6714_v0, %v13021_v30  ;;  %6509 = vrot.lane.b32.xlu1 %v3420_v44, %s7094_s19  ;;  %v2280_v27 = vcombine.high %v11128_v39, %v11131_v63  ;;  %v6412_v17 = vpop.permute.xlu0 %6411  ;;  %vm13025_vm14 = vmmov %vm13009_vm3  ;;  %v6286_v48 = vpop.permute.xlu1 %6285 }
 0x453   :  { %v6782_v13 = vsel %vm13020_vm11, %v6773_v43, %v6282_v12  ;;  %v6757_v28 = vsel %vm13022_vm12, %v6748_v14, %v11112_v8  ;;  %v6732_v41 = vsel %vm6726_vm15, %v6723_v19, %v13023_v33  ;;  %v11529_v39 = vsel %vm6816_vm9, %v11400_v42, %v6412_v17  ;;  %vm13026_vm1 = vmmov %vm13020_vm11 }
 0x454   :  { %v6766_v62 = vsel %vm13024_vm13, %v6757_v28, %v11242_v24  ;;  %v6741_v11 = vsel %vm6735_vm6, %v6732_v41, %v10894_v56  ;;  %v4508_v63 = vcombine.high %v11296_v37, %v11299_v51  ;;  %v3368_v56 = vcombine.high %v11201_v15, %v11204_v22  ;;  %vm13027_vm6 = vmmov %vm13007_vm0 }
 0x455   :  { %v6775_v8 = vsel %vm13025_vm14, %v6766_v62, %v11396_v57  ;;  %v6750_v45 = vsel %vm6744_vm7, %v6741_v11, %v11027_v58  ;;  %v3400_v57 = vcombine.high %v11207_v50, %v11210_v7  ;;  %v2294_v51 = vrot.slane %v2280_v27, %v7272_v40  ;;  %vm13028_vm7 = vmmov %vm13009_vm3 }
 0x456   :  { %v6784_v26 = vsel %vm13026_vm1, %v6775_v8, %v6286_v48  ;;  %v6759_v24 = vsel %vm13004_vm2, %v6750_v45, %v11137_v54  ;;  %6513 = vrot.lane.b32.xlu1 %v4508_v63, %s7094_s19  ;;  %v6416_v37 = vpop.permute.xlu0 %6415  ;;  %v6290_v5 = vpop.permute.xlu1 %6289  ;;  %v5596_v15 = vcombine.high %v11306_v46, %v11322_v61  ;;  %v2326_v22 = vrot.slane %v2312_v47, %v7272_v40  ;;  %vm13029_vm0 = vmmov %vm13026_vm1 }
 0x457   :  { %v6768_v42 = vsel %vm13027_vm6, %v6759_v24, %v11272_v18  ;;  %v11550_v54 = vsel %vm6816_vm9, %v11437_v9, %v6416_v37  ;;  %v3382_v18 = vrot.slane %v3368_v56, %v7272_v40  ;;  %v3414_v4 = vrot.slane %v3400_v57, %v7272_v40  ;;  %vm13030_vm3 = vmmov %vm13029_vm0 }
 0x458   :  { %v6777_v58 = vsel %vm13028_vm7, %v6768_v42, %v11433_v32  ;;  %v4456_v32 = vcombine.high %v11214_v1, %v11217_v3  ;;  %v4488_v9 = vcombine.high %v11220_v29, %v11223_v35  ;;  %v2333_v61 = vcombine.low %v2294_v51, %v2326_v22  ;;  %v13033_v1 = vld [vmem:[#allocation135_spill] sm:$0xff] }
 0x459   :  { %v6786_v50 = vsel %vm13029_vm0, %v6777_v58, %v6290_v5  ;;  %v3421_v6 = vcombine.low %v3382_v18, %v3414_v4  ;;  %v5544_v36 = vcombine.high %v13031_v60, %v11232_v20  ;;  %v5576_v3 = vcombine.high %v13033_v1, %v13032_v59 }
 0x45a   :  { %6517 = vrot.lane.b32.xlu1 %v5596_v15, %s7094_s19  ;;  %v6420_v7 = vpop.permute.xlu0 %6419  ;;  %v6294_v31 = vpop.permute.xlu1 %6293  ;;  %v4470_v29 = vrot.slane %v4456_v32, %v7272_v40  ;;  %v4502_v35 = vrot.slane %v4488_v9, %v7272_v40  ;;  %vm13034_vm4 = vcmask 375808   ;;  %v2334_v14 = vcombine.high %v2294_v51, %v2326_v22 }
 0x45b   :  { %v11564_v46 = vsel %vm6816_vm9, %v6814_v55, %v6420_v7  ;;  %v6788_v34 = vsel %vm13030_vm3, %v6779_v16, %v6294_v31  ;;  %v5558_v44 = vrot.slane %v5544_v36, %v7272_v40  ;;  %v5590_v20 = vrot.slane %v5576_v3, %v7272_v40  ;;  %vm13035_vm8 = vmmov %vm13034_vm4 }
 0x45c   :  { %v4509_v52 = vcombine.low %v4470_v29, %v4502_v35  ;;  %vm13036_vm10 = vmmov %vm13034_vm4  ;;  %v3422_v19 = vcombine.high %v3382_v18, %v3414_v4  ;;  %vm13038_vm12 = vcmask 392192   ;;  %v4510_v33 = vcombine.high %v4470_v29, %v4502_v35 }
 0x45d   :  { %v5597_v43 = vcombine.low %v5558_v44, %v5590_v20  ;;  %vm13037_vm11 = vmmov %vm13034_vm4  ;;  %v5598_v11 = vcombine.high %v5558_v44, %v5590_v20  ;;  %vm6825_vm2 = vcmask 441344   ;;  %vm6834_vm6 = vcmask 457728  }
 0x45e   :  { %6537 = vrot.lane.b32.xlu1 %v2333_v61, %s7095_s0  ;;  %v11568_v10 = vpop.permute.xlu0 %6439  ;;  %v6314_v21 = vpop.permute.xlu1 %6313  ;;  %vm13039_vm13 = vmmov %vm13038_vm12  ;;  %vm6843_vm7 = vcmask 474112   ;;  %vm6861_vm0 = vcmask 506880   ;;  %vm6943_vm3 = vcmask 785408  }
 0x45f   :  { %v6791_v55 = vsel %vm13034_vm4, %v6782_v13, %v6314_v21  ;;  %vm13040_vm14 = vmmov %vm13038_vm12  ;;  %v6826_v36 = vsel %vm6825_vm2, %v11503_v49, %v11568_v10 }
 0x460   :  { %vm13041_vm1 = vmmov %vm13038_vm12 }
 0x462   :  { %6541 = vrot.lane.b32.xlu1 %v3421_v6, %s7095_s0  ;;  %v11578_v16 = vpop.permute.xlu0 %6443  ;;  %v6318_v53 = vpop.permute.xlu1 %6317 }
 0x463   :  { %v6793_v23 = vsel %vm13035_vm8, %v6784_v26, %v6318_v53 }
 0x466   :  { %6545 = vrot.lane.b32.xlu1 %v4509_v52, %s7095_s0  ;;  %v11584_v38 = vpop.permute.xlu0 %6447  ;;  %v6322_v25 = vpop.permute.xlu1 %6321 }
 0x467   :  { %v6795_v12 = vsel %vm13036_vm10, %v6786_v50, %v6322_v25 }
 0x46a   :  { %6549 = vrot.lane.b32.xlu1 %v5597_v43, %s7095_s0  ;;  %v11588_v2 = vpop.permute.xlu0 %6451  ;;  %v6326_v0 = vpop.permute.xlu1 %6325 }
 0x46b   :  { %v6797_v13 = vsel %vm13037_vm11, %v6788_v34, %v6326_v0 }
 0x46e   :  { %6569 = vrot.lane.b32.xlu1 %v2334_v14, %s7096_s20  ;;  %v6472_v40 = vpop.permute.xlu0 %6471  ;;  %v6346_v30 = vpop.permute.xlu1 %6345  ;;  %v6832_v14 = vsel %vm6825_vm2, %v11564_v46, %v11588_v2 }
 0x46f   :  { %v6800_v28 = vsel %vm13038_vm12, %v6791_v55, %v6346_v30  ;;  %v6835_v1 = vsel %vm6834_vm6, %v6826_v36, %v6472_v40  ;;  %v6828_v55 = vsel %vm6825_vm2, %v11529_v39, %v11578_v16 }
 0x472   :  { %6573 = vrot.lane.b32.xlu1 %v3422_v19, %s7096_s20  ;;  %v6476_v27 = vpop.permute.xlu0 %6475  ;;  %v6350_v47 = vpop.permute.xlu1 %6349 }
 0x473   :  { %v6802_v41 = vsel %vm13039_vm13, %v6793_v23, %v6350_v47  ;;  %v6837_v10 = vsel %vm6834_vm6, %v6828_v55, %v6476_v27  ;;  %v6830_v23 = vsel %vm6825_vm2, %v11550_v54, %v11584_v38 }
 0x476   :  { %6577 = vrot.lane.b32.xlu1 %v4510_v33, %s7096_s20  ;;  %v6480_v62 = vpop.permute.xlu0 %6479  ;;  %v6354_v17 = vpop.permute.xlu1 %6353 }
 0x477   :  { %v6804_v8 = vsel %vm13040_vm14, %v6795_v12, %v6354_v17  ;;  %v6839_v16 = vsel %vm6834_vm6, %v6830_v23, %v6480_v62 }
 0x47a   :  { %6581 = vrot.lane.b32.xlu1 %v5598_v11, %s7096_s20  ;;  %v6484_v48 = vpop.permute.xlu0 %6483  ;;  %v6358_v63 = vpop.permute.xlu1 %6357 }
 0x47b   :  { %v6806_v45 = vsel %vm13041_vm1, %v6797_v13, %v6358_v63  ;;  %v6841_v38 = vsel %vm6834_vm6, %v6832_v14, %v6484_v48 }
 0x47e   :  { %v6504_v26 = vpop.permute.xlu0 %6503 }
 0x47f   :  { %v6378_v24 = vpop.permute.xlu1 %6377  ;;  %v6844_v21 = vsel %vm6843_vm7, %v6835_v1, %v6504_v26 }
 0x480   :  { %v6809_v56 = vsel %vm6807_vm5, %v6800_v28, %v6378_v24 }
 0x482   :  { %v6508_v57 = vpop.permute.xlu0 %6507 }
 0x483   :  { %v6382_v42 = vpop.permute.xlu1 %6381  ;;  %v6846_v52 = vsel %vm6843_vm7, %v6837_v10, %v6508_v57 }
 0x484   :  { %v6811_v37 = vsel %vm6807_vm5, %v6802_v41, %v6382_v42 }
 0x486   :  { %v6512_v51 = vpop.permute.xlu0 %6511 }
 0x487   :  { %v6386_v58 = vpop.permute.xlu1 %6385  ;;  %v6848_v43 = vsel %vm6843_vm7, %v6839_v16, %v6512_v51 }
 0x488   :  { %v6813_v5 = vsel %vm6807_vm5, %v6804_v8, %v6386_v58 }
 0x48a   :  { %v6516_v15 = vpop.permute.xlu0 %6515 }
 0x48b   :  { %v6390_v22 = vpop.permute.xlu1 %6389  ;;  %v6850_v40 = vsel %vm6843_vm7, %v6841_v38, %v6516_v15 }
 0x48c   :  { %v6815_v50 = vsel %vm6807_vm5, %v6806_v45, %v6390_v22  ;;  %vm6852_vm5 = vcmask 490496  }
 0x48e   :  { %v6536_v7 = vpop.permute.xlu0 %6535 }
 0x48f   :  { %v6410_v18 = vpop.permute.xlu1 %6409  ;;  %v6853_v29 = vsel %vm6852_vm5, %v6844_v21, %v6536_v7 }
 0x490   :  { %v11604_v4 = vsel %vm6816_vm9, %v6809_v56, %v6410_v18 }
 0x492   :  { %v6540_v32 = vpop.permute.xlu0 %6539 }
 0x493   :  { %v6414_v9 = vpop.permute.xlu1 %6413  ;;  %v6855_v44 = vsel %vm6852_vm5, %v6846_v52, %v6540_v32 }
 0x494   :  { %v11607_v31 = vsel %vm6816_vm9, %v6811_v37, %v6414_v9 }
 0x496   :  { %v6544_v61 = vpop.permute.xlu0 %6543 }
 0x497   :  { %v6418_v34 = vpop.permute.xlu1 %6417  ;;  %v6857_v12 = vsel %vm6852_vm5, %v6848_v43, %v6544_v61 }
 0x498   :  { %v11610_v6 = vsel %vm6816_vm9, %v6813_v5, %v6418_v34 }
 0x49a   :  { %v6548_v60 = vpop.permute.xlu0 %6547 }
 0x49b   :  { %v6422_v59 = vpop.permute.xlu1 %6421  ;;  %v6859_v30 = vsel %vm6852_vm5, %v6850_v40, %v6548_v60 }
 0x49c   :  { %v11617_v3 = vsel %vm6816_vm9, %v6815_v50, %v6422_v59  ;;  %vm6934_vm9 = vcmask 523264  }
 0x49e   :  { %v6568_v35 = vpop.permute.xlu0 %6567 }
 0x49f   :  { %v6442_v53 = vpop.permute.xlu1 %6441  ;;  %v11625_v49 = vsel %vm6861_vm0, %v6853_v29, %v6568_v35 }
 0x4a0   :  { %6878 = vrot.lane.b32.xlu0 %v11625_v49, %s7081_s4  ;;  %v6827_v26 = vsel %vm6825_vm2, %v11604_v4, %v6442_v53 }
 0x4a2   :  { %v6572_v20 = vpop.permute.xlu0 %6571 }
 0x4a3   :  { %v6446_v25 = vpop.permute.xlu1 %6445  ;;  %v11636_v39 = vsel %vm6861_vm0, %v6855_v44, %v6572_v20 }
 0x4a4   :  { %6882 = vrot.lane.b32.xlu0 %v11636_v39, %s7081_s4  ;;  %v6829_v37 = vsel %vm6825_vm2, %v11607_v31, %v6446_v25 }
 0x4a6   :  { %v6576_v0 = vpop.permute.xlu0 %6575 }
 0x4a7   :  { %v6450_v13 = vpop.permute.xlu1 %6449  ;;  %v11647_v54 = vsel %vm6861_vm0, %v6857_v12, %v6576_v0 }
 0x4a8   :  { %6886 = vrot.lane.b32.xlu0 %v11647_v54, %s7081_s4  ;;  %v6831_v50 = vsel %vm6825_vm2, %v11610_v6, %v6450_v13 }
 0x4aa   :  { %v6580_v19 = vpop.permute.xlu0 %6579 }
 0x4ab   :  { %v6454_v28 = vpop.permute.xlu1 %6453  ;;  %v11655_v27 = vsel %vm6861_vm0, %v6859_v30, %v6580_v19 }
 0x4ac   :  { %6890 = vrot.lane.b32.xlu0 %v11655_v27, %s7081_s4  ;;  %v6833_v31 = vsel %vm6825_vm2, %v11617_v3, %v6454_v28 }
 0x4af   :  { %v6474_v46 = vpop.permute.xlu1 %6473 }
 0x4b0   :  { %6902 = vrot.lane.b32.xlu0 %v11625_v49, %s7097_s21  ;;  %v6836_v24 = vsel %vm6834_vm6, %v6827_v26, %v6474_v46 }
 0x4b3   :  { %v6478_v2 = vpop.permute.xlu1 %6477 }
 0x4b4   :  { %6906 = vrot.lane.b32.xlu0 %v11636_v39, %s7097_s21  ;;  %v6838_v58 = vsel %vm6834_vm6, %v6829_v37, %v6478_v2 }
 0x4b7   :  { %v6482_v47 = vpop.permute.xlu1 %6481 }
 0x4b8   :  { %6910 = vrot.lane.b32.xlu0 %v11647_v54, %s7097_s21  ;;  %v6840_v18 = vsel %vm6834_vm6, %v6831_v50, %v6482_v47 }
 0x4bb   :  { %v6486_v33 = vpop.permute.xlu1 %6485 }
 0x4bc   :  { %6914 = vrot.lane.b32.xlu0 %v11655_v27, %s7097_s21  ;;  %v6842_v34 = vsel %vm6834_vm6, %v6833_v31, %v6486_v33 }
 0x4c0   :  { %v6506_v41 = vpop.permute.xlu1 %6505 }
 0x4c1   :  { %v6845_v56 = vsel %vm6843_vm7, %v6836_v24, %v6506_v41 }
 0x4c4   :  { %v6510_v62 = vpop.permute.xlu1 %6509 }
 0x4c5   :  { %v6847_v5 = vsel %vm6843_vm7, %v6838_v58, %v6510_v62 }
 0x4c8   :  { %v6514_v17 = vpop.permute.xlu1 %6513 }
 0x4c9   :  { %v6849_v4 = vsel %vm6843_vm7, %v6840_v18, %v6514_v17 }
 0x4cc   :  { %v6518_v11 = vpop.permute.xlu1 %6517 }
 0x4cd   :  { %v6851_v6 = vsel %vm6843_vm7, %v6842_v34, %v6518_v11 }
 0x4d0   :  { %v6538_v8 = vpop.permute.xlu1 %6537 }
 0x4d1   :  { %v6854_v57 = vsel %vm6852_vm5, %v6845_v56, %v6538_v8 }
 0x4d4   :  { %v6542_v48 = vpop.permute.xlu1 %6541 }
 0x4d5   :  { %v6856_v15 = vsel %vm6852_vm5, %v6847_v5, %v6542_v48 }
 0x4d8   :  { %v6546_v63 = vpop.permute.xlu1 %6545 }
 0x4d9   :  { %v6858_v32 = vsel %vm6852_vm5, %v6849_v4, %v6546_v63 }
 0x4dc   :  { %v6550_v45 = vpop.permute.xlu1 %6549 }
 0x4dd   :  { %v6860_v60 = vsel %vm6852_vm5, %v6851_v6, %v6550_v45 }
 0x4e0   :  { %v6570_v42 = vpop.permute.xlu1 %6569 }
 0x4e1   :  { %v6863_v51 = vsel %vm6861_vm0, %v6854_v57, %v6570_v42 }
 0x4e2   :  { %6880 = vrot.lane.b32.xlu1 %v6863_v51, %s7081_s4 }
 0x4e4   :  { %v6574_v22 = vpop.permute.xlu1 %6573 }
 0x4e5   :  { %v6865_v7 = vsel %vm6861_vm0, %v6856_v15, %v6574_v22 }
 0x4e6   :  { %6884 = vrot.lane.b32.xlu1 %v6865_v7, %s7081_s4 }
 0x4e8   :  { %v6578_v9 = vpop.permute.xlu1 %6577 }
 0x4e9   :  { %v6867_v61 = vsel %vm6861_vm0, %v6858_v32, %v6578_v9 }
 0x4ea   :  { %6888 = vrot.lane.b32.xlu1 %v6867_v61, %s7081_s4 }
 0x4ec   :  { %v6582_v36 = vpop.permute.xlu1 %6581 }
 0x4ed   :  { %v6869_v59 = vsel %vm6861_vm0, %v6860_v60, %v6582_v36 }
 0x4ee   :  { %6892 = vrot.lane.b32.xlu1 %v6869_v59, %s7081_s4 }
 0x4f2   :  { %6904 = vrot.lane.b32.xlu1 %v6863_v51, %s7097_s21 }
 0x4f6   :  { %6908 = vrot.lane.b32.xlu1 %v6865_v7, %s7097_s21 }
 0x4fa   :  { %6912 = vrot.lane.b32.xlu1 %v6867_v61, %s7097_s21 }
 0x4fe   :  { %6916 = vrot.lane.b32.xlu1 %v6869_v59, %s7097_s21 }
 0x512   :  { %v6879_v1 = vpop.permute.xlu0 %6878 }
 0x513   :  { %v6926_v35 = vsel %vm6726_vm15, %v11625_v49, %v6879_v1 }
 0x514   :  { %v6935_v55 = vsel %vm6934_vm9, %v6926_v35, %v6879_v1 }
 0x516   :  { %v6883_v3 = vpop.permute.xlu0 %6882 }
 0x517   :  { %v6928_v10 = vsel %vm6726_vm15, %v11636_v39, %v6883_v3 }
 0x518   :  { %v6937_v44 = vsel %vm6934_vm9, %v6928_v10, %v6883_v3 }
 0x51a   :  { %v6887_v21 = vpop.permute.xlu0 %6886 }
 0x51b   :  { %v6930_v23 = vsel %vm6726_vm15, %v11647_v54, %v6887_v21 }
 0x51c   :  { %v6939_v49 = vsel %vm6934_vm9, %v6930_v23, %v6887_v21 }
 0x51e   :  { %v6891_v29 = vpop.permute.xlu0 %6890 }
 0x51f   :  { %v6932_v43 = vsel %vm6726_vm15, %v11655_v27, %v6891_v29 }
 0x520   :  { %v6941_v12 = vsel %vm6934_vm9, %v6932_v43, %v6891_v29 }
 0x522   :  { %v6903_v53 = vpop.permute.xlu0 %6902 }
 0x523   :  { %v6944_v52 = vsel %vm6943_vm3, %v6935_v55, %v6903_v53 }
 0x524   :  { %6952 = vst [vmem:[#allocation5] sm:$0xff] %v6944_v52 }
 0x526   :  { %v6907_v20 = vpop.permute.xlu0 %6906 }
 0x527   :  { %v6946_v25 = vsel %vm6943_vm3, %v6937_v44, %v6907_v20 }
 0x528   :  { %6954 = vst [vmem:[#allocation5 + $0x10] sm:$0xff] %v6946_v25 }
 0x52a   :  { %v6911_v16 = vpop.permute.xlu0 %6910 }
 0x52b   :  { %v6948_v39 = vsel %vm6943_vm3, %v6939_v49, %v6911_v16 }
 0x52c   :  { %6956 = vst [vmem:[#allocation5 + $0x20] sm:$0xff] %v6948_v39 }
 0x52e   :  { %v6915_v0 = vpop.permute.xlu0 %6914 }
 0x52f   :  { %v6950_v14 = vsel %vm6943_vm3, %v6941_v12, %v6915_v0 }
 0x530   :  { %6958 = vst [vmem:[#allocation5 + $0x30] sm:$0xff] %v6950_v14 }
 0x554   :  { %v6881_v13 = vpop.permute.xlu1 %6880 }
 0x555   :  { %v6927_v30 = vsel %vm6726_vm15, %v6863_v51, %v6881_v13 }
 0x556   :  { %v6936_v19 = vsel %vm6934_vm9, %v6927_v30, %v6881_v13 }
 0x558   :  { %v6885_v54 = vpop.permute.xlu1 %6884 }
 0x559   :  { %v6929_v27 = vsel %vm6726_vm15, %v6865_v7, %v6885_v54 }
 0x55a   :  { %v6938_v2 = vsel %vm6934_vm9, %v6929_v27, %v6885_v54 }
 0x55c   :  { %v6889_v38 = vpop.permute.xlu1 %6888 }
 0x55d   :  { %v6931_v33 = vsel %vm6726_vm15, %v6867_v61, %v6889_v38 }
 0x55e   :  { %v6940_v62 = vsel %vm6934_vm9, %v6931_v33, %v6889_v38 }
 0x560   :  { %v6893_v40 = vpop.permute.xlu1 %6892 }
 0x561   :  { %v6933_v11 = vsel %vm6726_vm15, %v6869_v59, %v6893_v40 }
 0x562   :  { %v6942_v48 = vsel %vm6934_vm9, %v6933_v11, %v6893_v40 }
 0x564   :  { %v6905_v28 = vpop.permute.xlu1 %6904 }
 0x565   :  { %v6945_v46 = vsel %vm6943_vm3, %v6936_v19, %v6905_v28 }
 0x566   :  { %6953 = vst [vmem:[#allocation5 + $0x8] sm:$0xff] %v6945_v46 }
 0x568   :  { %v6909_v47 = vpop.permute.xlu1 %6908 }
 0x569   :  { %v6947_v41 = vsel %vm6943_vm3, %v6938_v2, %v6909_v47 }
 0x56a   :  { %6955 = vst [vmem:[#allocation5 + $0x18] sm:$0xff] %v6947_v41 }
 0x56c   :  { %v6913_v17 = vpop.permute.xlu1 %6912 }
 0x56d   :  { %v6949_v8 = vsel %vm6943_vm3, %v6940_v62, %v6913_v17 }
 0x56e   :  { %6957 = vst [vmem:[#allocation5 + $0x28] sm:$0xff] %v6949_v8 }
 0x570   :  { %v6917_v63 = vpop.permute.xlu1 %6916 }
 0x571   :  { %v6951_v45 = vsel %vm6943_vm3, %v6942_v48, %v6917_v63 }
 0x572   :  { %6959 = vst [vmem:[#allocation5 + $0x38] sm:$0xff] %v6951_v45 }
 0x573   :  { %7047 = shalt.err (!%p7044_p12)
}
 0x574   :  { %s7048_s27 = scalar_lea.hbm %s11743_s1, 1024 }
 0x575   :  { %p7049_p13 = scmp.ne.s32.totalorder %s11743_s1, %s7048_s27  ;;  %p7052_p0 = scmp.lt.u32.totalorder %s7048_s27, %s11743_s1 }
 0x577   :  { %p7054_p1 = pnand %p7052_p0, %p7049_p13 }
 0x579   :  { %7057 = shalt.err (!%p7054_p1)
}
 0x57a   :  { %6971 = dma.vmem_to_hbm [thread:$0]  %s6966_s23, 1024, %s11743_s1, [#allocation4], %s7063_s16, %s7063_s16, %s7064_s17  }
 0x57b   :  { %7060 = dma.done.wait [#allocation4], 1024  }
 0x57c   :  { %7061 = vsyncadd [#allocation4], 4294966272 }
 0x57d   :  { %6975 = vsyncpa [#allocation3], 1 }
 0x57e   :  { %6976 = vsyncpa [#allocation4], 1 }

</bundles_post_ra>
